<compile_context>
chip_gen: v6e
topology: v6e:2x2x1
jax: 0.10.0
libtpu: 0.0.40
codegen_flags: <defaults>
</compile_context>

<pallas_src>
import functools
import math

import jax
import jax.numpy as jnp
from jax.experimental import pallas as pl
from jax.experimental.pallas import tpu as pltpu


# ----------------------------------------------------------------------------
# Kernel 1: input projection fused with positional-encoding add.
# grid=(B,), each step handles one batch's (S, F) slab -> lane-dense (S, D).
# ----------------------------------------------------------------------------
def _inproj_pe_kernel(x_ref, w_ref, b_ref, pe_ref, o_ref):
    x = x_ref[...].astype(jnp.bfloat16)
    acc = jnp.dot(x, w_ref[...], preferred_element_type=jnp.float32)
    o_ref[...] = (acc + b_ref[...] + pe_ref[...]).astype(o_ref.dtype)


def input_projection_with_pe(x, w, b, pe):
    """x: (B, S, F); w: (F, D) bf16; b: (D,); pe: (S, D) -> (B, S, D) f32."""
    bsz, s, f = x.shape
    d = w.shape[1]
    return pl.pallas_call(
        _inproj_pe_kernel,
        grid=(bsz,),
        in_specs=[
            pl.BlockSpec((None, s, f), lambda i: (i, 0, 0)),
            pl.BlockSpec((f, d), lambda i: (0, 0)),
            pl.BlockSpec((1, d), lambda i: (0, 0)),
            pl.BlockSpec((s, d), lambda i: (0, 0)),
        ],
        out_specs=pl.BlockSpec((None, s, d), lambda i: (i, 0, 0)),
        out_shape=jax.ShapeDtypeStruct((bsz, s, d), jnp.float32),
        compiler_params=pltpu.CompilerParams(dimension_semantics=("parallel",)),
    )(x, w, b.reshape(1, d), pe)


# ----------------------------------------------------------------------------
# Kernel 2: one full post-LN encoder layer, fused.
# grid=(B,): each step gets one batch's (S, D) activations; all weights are
# resident (same block index every step -> no re-DMA between steps).
# ----------------------------------------------------------------------------
def _encoder_layer_kernel(h_ref, wqkv_ref, bqkv_ref, wout_ref, bout_ref,
                          ln1g_ref, ln1b_ref, wf1_ref, bf1_ref, wf2_ref,
                          bf2_ref, ln2g_ref, ln2b_ref, o_ref, *, nhead, eps):
    s, d = h_ref.shape
    dh = d // nhead
    scale = 1.0 / math.sqrt(dh)

    h = h_ref[...]                                    # (S, D) f32 residual copy
    h_bf = h.astype(jnp.bfloat16)

    # ---- fused QKV projection: one lane-dense (S, D) @ (D, 3D) MXU matmul ----
    qkv = jnp.dot(h_bf, wqkv_ref[...], preferred_element_type=jnp.float32)
    qkv = qkv + bqkv_ref[...]                         # (S, 3D) f32

    # ---- multi-head self-attention (softmax in f32, per-head static slices).
    # The output projection is folded into the head loop as partial sums so the
    # accumulator stays lane-dense (S, D) and is stored once.
    att = jnp.zeros((s, d), jnp.float32)
    for hd in range(nhead):
        lo = hd * dh
        qh = qkv[:, lo:lo + dh]                       # (S, Dh)
        kh = qkv[:, d + lo:d + lo + dh]               # (S, Dh)
        vh = qkv[:, 2 * d + lo:2 * d + lo + dh]       # (S, Dh)
        sc = jnp.dot(qh, kh.T, preferred_element_type=jnp.float32) * scale
        sc = sc - jnp.max(sc, axis=-1, keepdims=True)
        p = jnp.exp(sc)
        p = p * pl.reciprocal(jnp.sum(p, axis=-1, keepdims=True), approx=True)
        oh = jnp.dot(p, vh, preferred_element_type=jnp.float32)   # (S, Dh)
        # att @ W_out == sum_h oh @ W_out[h*dh:(h+1)*dh, :]
        att = att + jnp.dot(oh.astype(jnp.bfloat16), wout_ref[lo:lo + dh, :],
                            preferred_element_type=jnp.float32)
    att = att + bout_ref[...]

    # ---- residual + LayerNorm 1 (post-LN, dropout == identity) ----
    z = h + att
    mu = jnp.mean(z, axis=-1, keepdims=True)
    var = jnp.mean(jnp.square(z - mu), axis=-1, keepdims=True)
    z = (z - mu) * jax.lax.rsqrt(var + eps)
    z = z * ln1g_ref[...] + ln1b_ref[...]

    # ---- feed-forward (ReLU) + residual + LayerNorm 2 ----
    f = jnp.dot(z.astype(jnp.bfloat16), wf1_ref[...],
                preferred_element_type=jnp.float32) + bf1_ref[...]
    f = jnp.maximum(f, 0.0)
    f = jnp.dot(f.astype(jnp.bfloat16), wf2_ref[...],
                preferred_element_type=jnp.float32) + bf2_ref[...]
    z2 = z + f
    mu2 = jnp.mean(z2, axis=-1, keepdims=True)
    var2 = jnp.mean(jnp.square(z2 - mu2), axis=-1, keepdims=True)
    z2 = (z2 - mu2) * jax.lax.rsqrt(var2 + eps)
    o_ref[...] = (z2 * ln2g_ref[...] + ln2b_ref[...]).astype(o_ref.dtype)


def encoder_layer(h, layer, nhead, eps=1e-5):
    """h: (B, S, D) f32 -> (B, S, D) f32; one fused kernel per layer."""
    bsz, s, d = h.shape
    wqkv, bqkv = layer["qkv"]
    wout, bout = layer["out"]
    wf1, bf1 = layer["ff1"]
    wf2, bf2 = layer["ff2"]
    dff = wf1.shape[1]
    return pl.pallas_call(
        functools.partial(_encoder_layer_kernel, nhead=nhead, eps=eps),
        grid=(bsz,),
        in_specs=[
            pl.BlockSpec((None, s, d), lambda i: (i, 0, 0)),   # h
            pl.BlockSpec((d, 3 * d), lambda i: (0, 0)),        # w_qkv (bf16)
            pl.BlockSpec((1, 3 * d), lambda i: (0, 0)),        # b_qkv
            pl.BlockSpec((d, d), lambda i: (0, 0)),            # w_out (bf16)
            pl.BlockSpec((1, d), lambda i: (0, 0)),            # b_out
            pl.BlockSpec((1, d), lambda i: (0, 0)),            # ln1 gamma
            pl.BlockSpec((1, d), lambda i: (0, 0)),            # ln1 beta
            pl.BlockSpec((d, dff), lambda i: (0, 0)),          # w_ff1 (bf16)
            pl.BlockSpec((1, dff), lambda i: (0, 0)),          # b_ff1
            pl.BlockSpec((dff, d), lambda i: (0, 0)),          # w_ff2 (bf16)
            pl.BlockSpec((1, d), lambda i: (0, 0)),            # b_ff2
            pl.BlockSpec((1, d), lambda i: (0, 0)),            # ln2 gamma
            pl.BlockSpec((1, d), lambda i: (0, 0)),            # ln2 beta
        ],
        out_specs=pl.BlockSpec((None, s, d), lambda i: (i, 0, 0)),
        out_shape=jax.ShapeDtypeStruct((bsz, s, d), jnp.float32),
        compiler_params=pltpu.CompilerParams(dimension_semantics=("parallel",)),
    )(h, wqkv, bqkv.reshape(1, 3 * d), wout, bout.reshape(1, d),
      layer["ln1_g"].reshape(1, d), layer["ln1_b"].reshape(1, d),
      wf1, bf1.reshape(1, dff), wf2, bf2.reshape(1, d),
      layer["ln2_g"].reshape(1, d), layer["ln2_b"].reshape(1, d))


# ----------------------------------------------------------------------------
# Parameter / buffer construction (deterministic, in-script)
# ----------------------------------------------------------------------------
def make_positional_encoding(max_len, d_model):
    position = jnp.arange(max_len, dtype=jnp.float32)[:, None]
    div_term = jnp.exp(
        jnp.arange(0, d_model, 2, dtype=jnp.float32) * (-math.log(10000.0) / d_model)
    )
    pe = jnp.zeros((max_len, d_model), jnp.float32)
    pe = pe.at[:, 0::2].set(jnp.sin(position * div_term))
    pe = pe.at[:, 1::2].set(jnp.cos(position * div_term))
    return pe


def _dense_init(key, fan_in, fan_out):
    kw, kb = jax.random.split(key)
    lim = 1.0 / math.sqrt(fan_in)
    # Weight matrices stored in bf16 (MXU operands, halved HBM/VMEM traffic);
    # biases / LN params stay f32, accumulation is always f32.
    w = jax.random.uniform(kw, (fan_in, fan_out), jnp.float32, -lim, lim)
    b = jax.random.uniform(kb, (fan_out,), jnp.float32, -lim, lim)
    return w.astype(jnp.bfloat16), b


def init_params(key, input_dim, d_model, num_layers, dim_feedforward, max_len):
    keys = jax.random.split(key, 1 + num_layers)
    params = {
        "in_proj": _dense_init(keys[0], input_dim, d_model),
        "pe": make_positional_encoding(max_len, d_model),
        "layers": [],
    }
    for li in range(num_layers):
        ks = jax.random.split(keys[1 + li], 4)
        params["layers"].append(
            {
                "qkv": _dense_init(ks[0], d_model, 3 * d_model),
                "out": _dense_init(ks[1], d_model, d_model),
                "ff1": _dense_init(ks[2], d_model, dim_feedforward),
                "ff2": _dense_init(ks[3], dim_feedforward, d_model),
                "ln1_g": jnp.ones((d_model,), jnp.float32),
                "ln1_b": jnp.zeros((d_model,), jnp.float32),
                "ln2_g": jnp.ones((d_model,), jnp.float32),
                "ln2_b": jnp.zeros((d_model,), jnp.float32),
            }
        )
    return params


# ----------------------------------------------------------------------------
# Forward pass: 1 fused kernel for in_proj+PE, then 1 fused kernel per layer.
# ----------------------------------------------------------------------------
def transformer_encoder(params, x, nhead):
    b, s, _ = x.shape
    w_in, b_in = params["in_proj"]
    h = input_projection_with_pe(x, w_in, b_in, params["pe"][:s])
    for layer in params["layers"]:
        h = encoder_layer(h, layer, nhead)
    return h


if __name__ == "__main__":
    B, S, INPUT_DIM = 2, 8, 16
    D_MODEL, NHEAD, DIM_FF, NUM_LAYERS, MAX_LEN = 128, 8, 512, 2, 50

    key = jax.random.PRNGKey(0)
    kx, kp = jax.random.split(key)
    x = jax.random.normal(kx, (B, S, INPUT_DIM), jnp.float32)
    params = init_params(kp, INPUT_DIM, D_MODEL, NUM_LAYERS, DIM_FF, MAX_LEN)

    fwd = jax.jit(lambda p, inp: transformer_encoder(p, inp, NHEAD))
    out = jax.block_until_ready(fwd(params, x))
    assert out.shape == (B, S, D_MODEL)
    assert bool(jnp.all(jnp.isfinite(out)))
    print("KERNEL_OK")
</pallas_src>

<mosaic_0001>
module attributes {stable_mosaic.version = 11 : i64} {
  func.func @_inproj_pe_kernel(%arg0: i32, %arg1: memref<1x8x16xf32, #tpu.memory_space<vmem>>, %arg2: memref<16x128xbf16, #tpu.memory_space<vmem>>, %arg3: memref<1x128xf32, #tpu.memory_space<vmem>>, %arg4: memref<8x128xf32, #tpu.memory_space<vmem>>, %arg5: memref<1x8x128xf32, #tpu.memory_space<vmem>>) attributes {dimension_semantics = [#tpu.dimension_semantics<parallel>], iteration_bounds = array<i64: 2>, scalar_prefetch = 0 : i64, scratch_operands = 0 : i64, tpu.core_type = #tpu.core_type<tc>, window_params = [{transform_indices = @transform_0, window_bounds = array<i64: 1, 8, 16>}, {pipeline_mode = #tpu.pipeline_mode<synchronous>, transform_indices = @transform_1, window_bounds = array<i64: 16, 128>}, {pipeline_mode = #tpu.pipeline_mode<synchronous>, transform_indices = @transform_2, window_bounds = array<i64: 1, 128>}, {pipeline_mode = #tpu.pipeline_mode<synchronous>, transform_indices = @transform_3, window_bounds = array<i64: 8, 128>}, {transform_indices = @transform_4, window_bounds = array<i64: 1, 8, 128>}]} {
    %c0 = arith.constant 0 : index
    %c0_0 = arith.constant 0 : index
    %c0_1 = arith.constant 0 : index
    %0 = vector.load %arg1[%c0, %c0_0, %c0_1] : memref<1x8x16xf32, #tpu.memory_space<vmem>>, vector<1x8x16xf32>
    %1 = vector.shape_cast %0 : vector<1x8x16xf32> to vector<8x16xf32>
    %2 = arith.truncf %1 : vector<8x16xf32> to vector<8x16xbf16>
    %c0_2 = arith.constant 0 : index
    %c0_3 = arith.constant 0 : index
    %3 = vector.load %arg2[%c0_2, %c0_3] : memref<16x128xbf16, #tpu.memory_space<vmem>>, vector<16x128xbf16>
    %cst = arith.constant dense<0.000000e+00> : vector<8x128xf32>
    %4 = tpu.matmul %2, %3, %cst {dimension_numbers = #tpu.dot_dimension_numbers<[1], [0], [0], [1], [0, 0, 1, 1], [], []>} : vector<8x16xbf16>, vector<16x128xbf16>, vector<8x128xf32> -> vector<8x128xf32>
    %c0_4 = arith.constant 0 : index
    %c0_5 = arith.constant 0 : index
    %5 = vector.load %arg3[%c0_4, %c0_5] : memref<1x128xf32, #tpu.memory_space<vmem>>, vector<1x128xf32>
    %6 = vector.broadcast %5 : vector<1x128xf32> to vector<8x128xf32>
    %7 = arith.addf %4, %6 : vector<8x128xf32>
    %c0_6 = arith.constant 0 : index
    %c0_7 = arith.constant 0 : index
    %8 = vector.load %arg4[%c0_6, %c0_7] : memref<8x128xf32, #tpu.memory_space<vmem>>, vector<8x128xf32>
    %9 = arith.addf %7, %8 : vector<8x128xf32>
    %c0_8 = arith.constant 0 : index
    %c0_9 = arith.constant 0 : index
    %c0_10 = arith.constant 0 : index
    %10 = vector.load %arg5[%c0_8, %c0_9, %c0_10] : memref<1x8x128xf32, #tpu.memory_space<vmem>>, vector<1x8x128xf32>
    %11 = vector.shape_cast %10 : vector<1x8x128xf32> to vector<8x128xf32>
    %12 = vector.shape_cast %9 : vector<8x128xf32> to vector<1x8x128xf32>
    tpu.vector_store %arg5[%c0_8, %c0_9, %c0_10], %12 {strides = array<i32>} : memref<1x8x128xf32, #tpu.memory_space<vmem>>, vector<1x8x128xf32>,
    return
  }
  func.func @transform_0(%arg0: i32) -> (i32, i32, i32) {
    %c0_i32 = arith.constant 0 : i32
    %c0_i32_0 = arith.constant 0 : i32
    %c0_i32_1 = arith.constant 0 : i32
    return %arg0, %c0_i32, %c0_i32_0 : i32, i32, i32
  }
  func.func @transform_1(%arg0: i32) -> (i32, i32) {
    %c0_i32 = arith.constant 0 : i32
    %c0_i32_0 = arith.constant 0 : i32
    %c0_i32_1 = arith.constant 0 : i32
    return %c0_i32, %c0_i32_0 : i32, i32
  }
  func.func @transform_2(%arg0: i32) -> (i32, i32) {
    %c0_i32 = arith.constant 0 : i32
    %c0_i32_0 = arith.constant 0 : i32
    %c0_i32_1 = arith.constant 0 : i32
    return %c0_i32, %c0_i32_0 : i32, i32
  }
  func.func @transform_3(%arg0: i32) -> (i32, i32) {
    %c0_i32 = arith.constant 0 : i32
    %c0_i32_0 = arith.constant 0 : i32
    %c0_i32_1 = arith.constant 0 : i32
    return %c0_i32, %c0_i32_0 : i32, i32
  }
  func.func @transform_4(%arg0: i32) -> (i32, i32, i32) {
    %c0_i32 = arith.constant 0 : i32
    %c0_i32_0 = arith.constant 0 : i32
    %c0_i32_1 = arith.constant 0 : i32
    return %arg0, %c0_i32, %c0_i32_0 : i32, i32, i32
  }
}

module attributes {stable_mosaic.version = 11 : i64} {
  func.func @_encoder_layer_kernel(%arg0: i32, %arg1: memref<1x8x128xf32, #tpu.memory_space<vmem>>, %arg2: memref<128x384xbf16, #tpu.memory_space<vmem>>, %arg3: memref<1x384xf32, #tpu.memory_space<vmem>>, %arg4: memref<128x128xbf16, #tpu.memory_space<vmem>>, %arg5: memref<1x128xf32, #tpu.memory_space<vmem>>, %arg6: memref<1x128xf32, #tpu.memory_space<vmem>>, %arg7: memref<1x128xf32, #tpu.memory_space<vmem>>, %arg8: memref<128x512xbf16, #tpu.memory_space<vmem>>, %arg9: memref<1x512xf32, #tpu.memory_space<vmem>>, %arg10: memref<512x128xbf16, #tpu.memory_space<vmem>>, %arg11: memref<1x128xf32, #tpu.memory_space<vmem>>, %arg12: memref<1x128xf32, #tpu.memory_space<vmem>>, %arg13: memref<1x128xf32, #tpu.memory_space<vmem>>, %arg14: memref<1x8x128xf32, #tpu.memory_space<vmem>>) attributes {dimension_semantics = [#tpu.dimension_semantics<parallel>], iteration_bounds = array<i64: 2>, scalar_prefetch = 0 : i64, scratch_operands = 0 : i64, tpu.core_type = #tpu.core_type<tc>, window_params = [{transform_indices = @transform_0, window_bounds = array<i64: 1, 8, 128>}, {pipeline_mode = #tpu.pipeline_mode<synchronous>, transform_indices = @transform_1, window_bounds = array<i64: 128, 384>}, {pipeline_mode = #tpu.pipeline_mode<synchronous>, transform_indices = @transform_2, window_bounds = array<i64: 1, 384>}, {pipeline_mode = #tpu.pipeline_mode<synchronous>, transform_indices = @transform_3, window_bounds = array<i64: 128, 128>}, {pipeline_mode = #tpu.pipeline_mode<synchronous>, transform_indices = @transform_4, window_bounds = array<i64: 1, 128>}, {pipeline_mode = #tpu.pipeline_mode<synchronous>, transform_indices = @transform_5, window_bounds = array<i64: 1, 128>}, {pipeline_mode = #tpu.pipeline_mode<synchronous>, transform_indices = @transform_6, window_bounds = array<i64: 1, 128>}, {pipeline_mode = #tpu.pipeline_mode<synchronous>, transform_indices = @transform_7, window_bounds = array<i64: 128, 512>}, {pipeline_mode = #tpu.pipeline_mode<synchronous>, transform_indices = @transform_8, window_bounds = array<i64: 1, 512>}, {pipeline_mode = #tpu.pipeline_mode<synchronous>, transform_indices = @transform_9, window_bounds = array<i64: 512, 128>}, {pipeline_mode = #tpu.pipeline_mode<synchronous>, transform_indices = @transform_10, window_bounds = array<i64: 1, 128>}, {pipeline_mode = #tpu.pipeline_mode<synchronous>, transform_indices = @transform_11, window_bounds = array<i64: 1, 128>}, {pipeline_mode = #tpu.pipeline_mode<synchronous>, transform_indices = @transform_12, window_bounds = array<i64: 1, 128>}, {transform_indices = @transform_13, window_bounds = array<i64: 1, 8, 128>}]} {
    %c0 = arith.constant 0 : index
    %c0_0 = arith.constant 0 : index
    %c0_1 = arith.constant 0 : index
    %0 = vector.load %arg1[%c0, %c0_0, %c0_1] : memref<1x8x128xf32, #tpu.memory_space<vmem>>, vector<1x8x128xf32>
    %1 = vector.shape_cast %0 : vector<1x8x128xf32> to vector<8x128xf32>
    %2 = arith.truncf %1 : vector<8x128xf32> to vector<8x128xbf16>
    %c0_2 = arith.constant 0 : index
    %c0_3 = arith.constant 0 : index
    %3 = vector.load %arg2[%c0_2, %c0_3] : memref<128x384xbf16, #tpu.memory_space<vmem>>, vector<128x384xbf16>
    %cst = arith.constant dense<0.000000e+00> : vector<8x384xf32>
    %4 = tpu.matmul %2, %3, %cst {dimension_numbers = #tpu.dot_dimension_numbers<[1], [0], [0], [1], [0, 0, 1, 1], [], []>} : vector<8x128xbf16>, vector<128x384xbf16>, vector<8x384xf32> -> vector<8x384xf32>
    %c0_4 = arith.constant 0 : index
    %c0_5 = arith.constant 0 : index
    %5 = vector.load %arg3[%c0_4, %c0_5] : memref<1x384xf32, #tpu.memory_space<vmem>>, vector<1x384xf32>
    %6 = vector.broadcast %5 : vector<1x384xf32> to vector<8x384xf32>
    %7 = arith.addf %4, %6 : vector<8x384xf32>
    %cst_6 = arith.constant 0.000000e+00 : f32
    %8 = vector.broadcast %cst_6 : f32 to vector<8x128xf32>
    %9 = vector.extract_strided_slice %7 {offsets = [0, 0], sizes = [8, 16], strides = [1, 1]} : vector<8x384xf32> to vector<8x16xf32>
    %10 = vector.extract_strided_slice %7 {offsets = [0, 128], sizes = [8, 16], strides = [1, 1]} : vector<8x384xf32> to vector<8x16xf32>
    %11 = vector.extract_strided_slice %7 {offsets = [0, 256], sizes = [8, 16], strides = [1, 1]} : vector<8x384xf32> to vector<8x16xf32>
    %12 = tpu.transpose %10, [1, 0] : vector<8x16xf32> -> vector<16x8xf32>
    %cst_7 = arith.constant dense<0.000000e+00> : vector<8x8xf32>
    %13 = tpu.matmul %9, %12, %cst_7 {dimension_numbers = #tpu.dot_dimension_numbers<[1], [0], [0], [1], [0, 0, 1, 1], [], []>} : vector<8x16xf32>, vector<16x8xf32>, vector<8x8xf32> -> vector<8x8xf32>
    %cst_8 = arith.constant 2.500000e-01 : f32
    %14 = vector.broadcast %cst_8 : f32 to vector<8x8xf32>
    %15 = arith.mulf %13, %14 : vector<8x8xf32>
    %cst_9 = arith.constant dense<0xFF800000> : vector<8xf32>
    %16 = vector.multi_reduction <maximumf>, %15, %cst_9 [1] : vector<8x8xf32> to vector<8xf32>
    %17 = vector.shape_cast %16 : vector<8xf32> to vector<8x1xf32>
    %18 = vector.broadcast %17 : vector<8x1xf32> to vector<8x8xf32>
    %19 = arith.subf %15, %18 : vector<8x8xf32>
    %20 = math.exp %19 : vector<8x8xf32>
    %cst_10 = arith.constant dense<0.000000e+00> : vector<8xf32>
    %21 = vector.multi_reduction <add>, %20, %cst_10 [1] : vector<8x8xf32> to vector<8xf32>
    %22 = vector.shape_cast %21 : vector<8xf32> to vector<8x1xf32>
    %23 = tpu.reciprocal %22 {approx = true} : vector<8x1xf32> -> vector<8x1xf32>
    %24 = vector.broadcast %23 : vector<8x1xf32> to vector<8x8xf32>
    %25 = arith.mulf %20, %24 : vector<8x8xf32>
    %cst_11 = arith.constant dense<0.000000e+00> : vector<8x16xf32>
    %26 = tpu.matmul %25, %11, %cst_11 {dimension_numbers = #tpu.dot_dimension_numbers<[1], [0], [0], [1], [0, 0, 1, 1], [], []>} : vector<8x8xf32>, vector<8x16xf32>, vector<8x16xf32> -> vector<8x16xf32>
    %27 = arith.truncf %26 : vector<8x16xf32> to vector<8x16xbf16>
    %c0_12 = arith.constant 0 : index
    %c0_13 = arith.constant 0 : index
    %28 = vector.load %arg4[%c0_12, %c0_13] : memref<128x128xbf16, #tpu.memory_space<vmem>>, vector<16x128xbf16>
    %cst_14 = arith.constant dense<0.000000e+00> : vector<8x128xf32>
    %29 = tpu.matmul %27, %28, %cst_14 {dimension_numbers = #tpu.dot_dimension_numbers<[1], [0], [0], [1], [0, 0, 1, 1], [], []>} : vector<8x16xbf16>, vector<16x128xbf16>, vector<8x128xf32> -> vector<8x128xf32>
    %30 = arith.addf %8, %29 : vector<8x128xf32>
    %31 = vector.extract_strided_slice %7 {offsets = [0, 16], sizes = [8, 16], strides = [1, 1]} : vector<8x384xf32> to vector<8x16xf32>
    %32 = vector.extract_strided_slice %7 {offsets = [0, 144], sizes = [8, 16], strides = [1, 1]} : vector<8x384xf32> to vector<8x16xf32>
    %33 = vector.extract_strided_slice %7 {offsets = [0, 272], sizes = [8, 16], strides = [1, 1]} : vector<8x384xf32> to vector<8x16xf32>
    %34 = tpu.transpose %32, [1, 0] : vector<8x16xf32> -> vector<16x8xf32>
    %cst_15 = arith.constant dense<0.000000e+00> : vector<8x8xf32>
    %35 = tpu.matmul %31, %34, %cst_15 {dimension_numbers = #tpu.dot_dimension_numbers<[1], [0], [0], [1], [0, 0, 1, 1], [], []>} : vector<8x16xf32>, vector<16x8xf32>, vector<8x8xf32> -> vector<8x8xf32>
    %cst_16 = arith.constant 2.500000e-01 : f32
    %36 = vector.broadcast %cst_16 : f32 to vector<8x8xf32>
    %37 = arith.mulf %35, %36 : vector<8x8xf32>
    %cst_17 = arith.constant dense<0xFF800000> : vector<8xf32>
    %38 = vector.multi_reduction <maximumf>, %37, %cst_17 [1] : vector<8x8xf32> to vector<8xf32>
    %39 = vector.shape_cast %38 : vector<8xf32> to vector<8x1xf32>
    %40 = vector.broadcast %39 : vector<8x1xf32> to vector<8x8xf32>
    %41 = arith.subf %37, %40 : vector<8x8xf32>
    %42 = math.exp %41 : vector<8x8xf32>
    %cst_18 = arith.constant dense<0.000000e+00> : vector<8xf32>
    %43 = vector.multi_reduction <add>, %42, %cst_18 [1] : vector<8x8xf32> to vector<8xf32>
    %44 = vector.shape_cast %43 : vector<8xf32> to vector<8x1xf32>
    %45 = tpu.reciprocal %44 {approx = true} : vector<8x1xf32> -> vector<8x1xf32>
    %46 = vector.broadcast %45 : vector<8x1xf32> to vector<8x8xf32>
    %47 = arith.mulf %42, %46 : vector<8x8xf32>
    %cst_19 = arith.constant dense<0.000000e+00> : vector<8x16xf32>
    %48 = tpu.matmul %47, %33, %cst_19 {dimension_numbers = #tpu.dot_dimension_numbers<[1], [0], [0], [1], [0, 0, 1, 1], [], []>} : vector<8x8xf32>, vector<8x16xf32>, vector<8x16xf32> -> vector<8x16xf32>
    %49 = arith.truncf %48 : vector<8x16xf32> to vector<8x16xbf16>
    %c16 = arith.constant 16 : index
    %c0_20 = arith.constant 0 : index
    %50 = vector.load %arg4[%c16, %c0_20] : memref<128x128xbf16, #tpu.memory_space<vmem>>, vector<16x128xbf16>
    %cst_21 = arith.constant dense<0.000000e+00> : vector<8x128xf32>
    %51 = tpu.matmul %49, %50, %cst_21 {dimension_numbers = #tpu.dot_dimension_numbers<[1], [0], [0], [1], [0, 0, 1, 1], [], []>} : vector<8x16xbf16>, vector<16x128xbf16>, vector<8x128xf32> -> vector<8x128xf32>
    %52 = arith.addf %30, %51 : vector<8x128xf32>
    %53 = vector.extract_strided_slice %7 {offsets = [0, 32], sizes = [8, 16], strides = [1, 1]} : vector<8x384xf32> to vector<8x16xf32>
    %54 = vector.extract_strided_slice %7 {offsets = [0, 160], sizes = [8, 16], strides = [1, 1]} : vector<8x384xf32> to vector<8x16xf32>
    %55 = vector.extract_strided_slice %7 {offsets = [0, 288], sizes = [8, 16], strides = [1, 1]} : vector<8x384xf32> to vector<8x16xf32>
    %56 = tpu.transpose %54, [1, 0] : vector<8x16xf32> -> vector<16x8xf32>
    %cst_22 = arith.constant dense<0.000000e+00> : vector<8x8xf32>
    %57 = tpu.matmul %53, %56, %cst_22 {dimension_numbers = #tpu.dot_dimension_numbers<[1], [0], [0], [1], [0, 0, 1, 1], [], []>} : vector<8x16xf32>, vector<16x8xf32>, vector<8x8xf32> -> vector<8x8xf32>
    %cst_23 = arith.constant 2.500000e-01 : f32
    %58 = vector.broadcast %cst_23 : f32 to vector<8x8xf32>
    %59 = arith.mulf %57, %58 : vector<8x8xf32>
    %cst_24 = arith.constant dense<0xFF800000> : vector<8xf32>
    %60 = vector.multi_reduction <maximumf>, %59, %cst_24 [1] : vector<8x8xf32> to vector<8xf32>
    %61 = vector.shape_cast %60 : vector<8xf32> to vector<8x1xf32>
    %62 = vector.broadcast %61 : vector<8x1xf32> to vector<8x8xf32>
    %63 = arith.subf %59, %62 : vector<8x8xf32>
    %64 = math.exp %63 : vector<8x8xf32>
    %cst_25 = arith.constant dense<0.000000e+00> : vector<8xf32>
    %65 = vector.multi_reduction <add>, %64, %cst_25 [1] : vector<8x8xf32> to vector<8xf32>
    %66 = vector.shape_cast %65 : vector<8xf32> to vector<8x1xf32>
    %67 = tpu.reciprocal %66 {approx = true} : vector<8x1xf32> -> vector<8x1xf32>
    %68 = vector.broadcast %67 : vector<8x1xf32> to vector<8x8xf32>
    %69 = arith.mulf %64, %68 : vector<8x8xf32>
    %cst_26 = arith.constant dense<0.000000e+00> : vector<8x16xf32>
    %70 = tpu.matmul %69, %55, %cst_26 {dimension_numbers = #tpu.dot_dimension_numbers<[1], [0], [0], [1], [0, 0, 1, 1], [], []>} : vector<8x8xf32>, vector<8x16xf32>, vector<8x16xf32> -> vector<8x16xf32>
    %71 = arith.truncf %70 : vector<8x16xf32> to vector<8x16xbf16>
    %c32 = arith.constant 32 : index
    %c0_27 = arith.constant 0 : index
    %72 = vector.load %arg4[%c32, %c0_27] : memref<128x128xbf16, #tpu.memory_space<vmem>>, vector<16x128xbf16>
    %cst_28 = arith.constant dense<0.000000e+00> : vector<8x128xf32>
    %73 = tpu.matmul %71, %72, %cst_28 {dimension_numbers = #tpu.dot_dimension_numbers<[1], [0], [0], [1], [0, 0, 1, 1], [], []>} : vector<8x16xbf16>, vector<16x128xbf16>, vector<8x128xf32> -> vector<8x128xf32>
    %74 = arith.addf %52, %73 : vector<8x128xf32>
    %75 = vector.extract_strided_slice %7 {offsets = [0, 48], sizes = [8, 16], strides = [1, 1]} : vector<8x384xf32> to vector<8x16xf32>
    %76 = vector.extract_strided_slice %7 {offsets = [0, 176], sizes = [8, 16], strides = [1, 1]} : vector<8x384xf32> to vector<8x16xf32>
    %77 = vector.extract_strided_slice %7 {offsets = [0, 304], sizes = [8, 16], strides = [1, 1]} : vector<8x384xf32> to vector<8x16xf32>
    %78 = tpu.transpose %76, [1, 0] : vector<8x16xf32> -> vector<16x8xf32>
    %cst_29 = arith.constant dense<0.000000e+00> : vector<8x8xf32>
    %79 = tpu.matmul %75, %78, %cst_29 {dimension_numbers = #tpu.dot_dimension_numbers<[1], [0], [0], [1], [0, 0, 1, 1], [], []>} : vector<8x16xf32>, vector<16x8xf32>, vector<8x8xf32> -> vector<8x8xf32>
    %cst_30 = arith.constant 2.500000e-01 : f32
    %80 = vector.broadcast %cst_30 : f32 to vector<8x8xf32>
    %81 = arith.mulf %79, %80 : vector<8x8xf32>
    %cst_31 = arith.constant dense<0xFF800000> : vector<8xf32>
    %82 = vector.multi_reduction <maximumf>, %81, %cst_31 [1] : vector<8x8xf32> to vector<8xf32>
    %83 = vector.shape_cast %82 : vector<8xf32> to vector<8x1xf32>
    %84 = vector.broadcast %83 : vector<8x1xf32> to vector<8x8xf32>
    %85 = arith.subf %81, %84 : vector<8x8xf32>
    %86 = math.exp %85 : vector<8x8xf32>
    %cst_32 = arith.constant dense<0.000000e+00> : vector<8xf32>
    %87 = vector.multi_reduction <add>, %86, %cst_32 [1] : vector<8x8xf32> to vector<8xf32>
    %88 = vector.shape_cast %87 : vector<8xf32> to vector<8x1xf32>
    %89 = tpu.reciprocal %88 {approx = true} : vector<8x1xf32> -> vector<8x1xf32>
    %90 = vector.broadcast %89 : vector<8x1xf32> to vector<8x8xf32>
    %91 = arith.mulf %86, %90 : vector<8x8xf32>
    %cst_33 = arith.constant dense<0.000000e+00> : vector<8x16xf32>
    %92 = tpu.matmul %91, %77, %cst_33 {dimension_numbers = #tpu.dot_dimension_numbers<[1], [0], [0], [1], [0, 0, 1, 1], [], []>} : vector<8x8xf32>, vector<8x16xf32>, vector<8x16xf32> -> vector<8x16xf32>
    %93 = arith.truncf %92 : vector<8x16xf32> to vector<8x16xbf16>
    %c48 = arith.constant 48 : index
    %c0_34 = arith.constant 0 : index
    %94 = vector.load %arg4[%c48, %c0_34] : memref<128x128xbf16, #tpu.memory_space<vmem>>, vector<16x128xbf16>
    %cst_35 = arith.constant dense<0.000000e+00> : vector<8x128xf32>
    %95 = tpu.matmul %93, %94, %cst_35 {dimension_numbers = #tpu.dot_dimension_numbers<[1], [0], [0], [1], [0, 0, 1, 1], [], []>} : vector<8x16xbf16>, vector<16x128xbf16>, vector<8x128xf32> -> vector<8x128xf32>
    %96 = arith.addf %74, %95 : vector<8x128xf32>
    %97 = vector.extract_strided_slice %7 {offsets = [0, 64], sizes = [8, 16], strides = [1, 1]} : vector<8x384xf32> to vector<8x16xf32>
    %98 = vector.extract_strided_slice %7 {offsets = [0, 192], sizes = [8, 16], strides = [1, 1]} : vector<8x384xf32> to vector<8x16xf32>
    %99 = vector.extract_strided_slice %7 {offsets = [0, 320], sizes = [8, 16], strides = [1, 1]} : vector<8x384xf32> to vector<8x16xf32>
    %100 = tpu.transpose %98, [1, 0] : vector<8x16xf32> -> vector<16x8xf32>
    %cst_36 = arith.constant dense<0.000000e+00> : vector<8x8xf32>
    %101 = tpu.matmul %97, %100, %cst_36 {dimension_numbers = #tpu.dot_dimension_numbers<[1], [0], [0], [1], [0, 0, 1, 1], [], []>} : vector<8x16xf32>, vector<16x8xf32>, vector<8x8xf32> -> vector<8x8xf32>
    %cst_37 = arith.constant 2.500000e-01 : f32
    %102 = vector.broadcast %cst_37 : f32 to vector<8x8xf32>
    %103 = arith.mulf %101, %102 : vector<8x8xf32>
    %cst_38 = arith.constant dense<0xFF800000> : vector<8xf32>
    %104 = vector.multi_reduction <maximumf>, %103, %cst_38 [1] : vector<8x8xf32> to vector<8xf32>
    %105 = vector.shape_cast %104 : vector<8xf32> to vector<8x1xf32>
    %106 = vector.broadcast %105 : vector<8x1xf32> to vector<8x8xf32>
    %107 = arith.subf %103, %106 : vector<8x8xf32>
    %108 = math.exp %107 : vector<8x8xf32>
    %cst_39 = arith.constant dense<0.000000e+00> : vector<8xf32>
    %109 = vector.multi_reduction <add>, %108, %cst_39 [1] : vector<8x8xf32> to vector<8xf32>
    %110 = vector.shape_cast %109 : vector<8xf32> to vector<8x1xf32>
    %111 = tpu.reciprocal %110 {approx = true} : vector<8x1xf32> -> vector<8x1xf32>
    %112 = vector.broadcast %111 : vector<8x1xf32> to vector<8x8xf32>
    %113 = arith.mulf %108, %112 : vector<8x8xf32>
    %cst_40 = arith.constant dense<0.000000e+00> : vector<8x16xf32>
    %114 = tpu.matmul %113, %99, %cst_40 {dimension_numbers = #tpu.dot_dimension_numbers<[1], [0], [0], [1], [0, 0, 1, 1], [], []>} : vector<8x8xf32>, vector<8x16xf32>, vector<8x16xf32> -> vector<8x16xf32>
    %115 = arith.truncf %114 : vector<8x16xf32> to vector<8x16xbf16>
    %c64 = arith.constant 64 : index
    %c0_41 = arith.constant 0 : index
    %116 = vector.load %arg4[%c64, %c0_41] : memref<128x128xbf16, #tpu.memory_space<vmem>>, vector<16x128xbf16>
    %cst_42 = arith.constant dense<0.000000e+00> : vector<8x128xf32>
    %117 = tpu.matmul %115, %116, %cst_42 {dimension_numbers = #tpu.dot_dimension_numbers<[1], [0], [0], [1], [0, 0, 1, 1], [], []>} : vector<8x16xbf16>, vector<16x128xbf16>, vector<8x128xf32> -> vector<8x128xf32>
    %118 = arith.addf %96, %117 : vector<8x128xf32>
    %119 = vector.extract_strided_slice %7 {offsets = [0, 80], sizes = [8, 16], strides = [1, 1]} : vector<8x384xf32> to vector<8x16xf32>
    %120 = vector.extract_strided_slice %7 {offsets = [0, 208], sizes = [8, 16], strides = [1, 1]} : vector<8x384xf32> to vector<8x16xf32>
    %121 = vector.extract_strided_slice %7 {offsets = [0, 336], sizes = [8, 16], strides = [1, 1]} : vector<8x384xf32> to vector<8x16xf32>
    %122 = tpu.transpose %120, [1, 0] : vector<8x16xf32> -> vector<16x8xf32>
    %cst_43 = arith.constant dense<0.000000e+00> : vector<8x8xf32>
    %123 = tpu.matmul %119, %122, %cst_43 {dimension_numbers = #tpu.dot_dimension_numbers<[1], [0], [0], [1], [0, 0, 1, 1], [], []>} : vector<8x16xf32>, vector<16x8xf32>, vector<8x8xf32> -> vector<8x8xf32>
    %cst_44 = arith.constant 2.500000e-01 : f32
    %124 = vector.broadcast %cst_44 : f32 to vector<8x8xf32>
    %125 = arith.mulf %123, %124 : vector<8x8xf32>
    %cst_45 = arith.constant dense<0xFF800000> : vector<8xf32>
    %126 = vector.multi_reduction <maximumf>, %125, %cst_45 [1] : vector<8x8xf32> to vector<8xf32>
    %127 = vector.shape_cast %126 : vector<8xf32> to vector<8x1xf32>
    %128 = vector.broadcast %127 : vector<8x1xf32> to vector<8x8xf32>
    %129 = arith.subf %125, %128 : vector<8x8xf32>
    %130 = math.exp %129 : vector<8x8xf32>
    %cst_46 = arith.constant dense<0.000000e+00> : vector<8xf32>
    %131 = vector.multi_reduction <add>, %130, %cst_46 [1] : vector<8x8xf32> to vector<8xf32>
    %132 = vector.shape_cast %131 : vector<8xf32> to vector<8x1xf32>
    %133 = tpu.reciprocal %132 {approx = true} : vector<8x1xf32> -> vector<8x1xf32>
    %134 = vector.broadcast %133 : vector<8x1xf32> to vector<8x8xf32>
    %135 = arith.mulf %130, %134 : vector<8x8xf32>
    %cst_47 = arith.constant dense<0.000000e+00> : vector<8x16xf32>
    %136 = tpu.matmul %135, %121, %cst_47 {dimension_numbers = #tpu.dot_dimension_numbers<[1], [0], [0], [1], [0, 0, 1, 1], [], []>} : vector<8x8xf32>, vector<8x16xf32>, vector<8x16xf32> -> vector<8x16xf32>
    %137 = arith.truncf %136 : vector<8x16xf32> to vector<8x16xbf16>
    %c80 = arith.constant 80 : index
    %c0_48 = arith.constant 0 : index
    %138 = vector.load %arg4[%c80, %c0_48] : memref<128x128xbf16, #tpu.memory_space<vmem>>, vector<16x128xbf16>
    %cst_49 = arith.constant dense<0.000000e+00> : vector<8x128xf32>
    %139 = tpu.matmul %137, %138, %cst_49 {dimension_numbers = #tpu.dot_dimension_numbers<[1], [0], [0], [1], [0, 0, 1, 1], [], []>} : vector<8x16xbf16>, vector<16x128xbf16>, vector<8x128xf32> -> vector<8x128xf32>
    %140 = arith.addf %118, %139 : vector<8x128xf32>
    %141 = vector.extract_strided_slice %7 {offsets = [0, 96], sizes = [8, 16], strides = [1, 1]} : vector<8x384xf32> to vector<8x16xf32>
    %142 = vector.extract_strided_slice %7 {offsets = [0, 224], sizes = [8, 16], strides = [1, 1]} : vector<8x384xf32> to vector<8x16xf32>
    %143 = vector.extract_strided_slice %7 {offsets = [0, 352], sizes = [8, 16], strides = [1, 1]} : vector<8x384xf32> to vector<8x16xf32>
    %144 = tpu.transpose %142, [1, 0] : vector<8x16xf32> -> vector<16x8xf32>
    %cst_50 = arith.constant dense<0.000000e+00> : vector<8x8xf32>
    %145 = tpu.matmul %141, %144, %cst_50 {dimension_numbers = #tpu.dot_dimension_numbers<[1], [0], [0], [1], [0, 0, 1, 1], [], []>} : vector<8x16xf32>, vector<16x8xf32>, vector<8x8xf32> -> vector<8x8xf32>
    %cst_51 = arith.constant 2.500000e-01 : f32
    %146 = vector.broadcast %cst_51 : f32 to vector<8x8xf32>
    %147 = arith.mulf %145, %146 : vector<8x8xf32>
    %cst_52 = arith.constant dense<0xFF800000> : vector<8xf32>
    %148 = vector.multi_reduction <maximumf>, %147, %cst_52 [1] : vector<8x8xf32> to vector<8xf32>
    %149 = vector.shape_cast %148 : vector<8xf32> to vector<8x1xf32>
    %150 = vector.broadcast %149 : vector<8x1xf32> to vector<8x8xf32>
    %151 = arith.subf %147, %150 : vector<8x8xf32>
    %152 = math.exp %151 : vector<8x8xf32>
    %cst_53 = arith.constant dense<0.000000e+00> : vector<8xf32>
    %153 = vector.multi_reduction <add>, %152, %cst_53 [1] : vector<8x8xf32> to vector<8xf32>
    %154 = vector.shape_cast %153 : vector<8xf32> to vector<8x1xf32>
    %155 = tpu.reciprocal %154 {approx = true} : vector<8x1xf32> -> vector<8x1xf32>
    %156 = vector.broadcast %155 : vector<8x1xf32> to vector<8x8xf32>
    %157 = arith.mulf %152, %156 : vector<8x8xf32>
    %cst_54 = arith.constant dense<0.000000e+00> : vector<8x16xf32>
    %158 = tpu.matmul %157, %143, %cst_54 {dimension_numbers = #tpu.dot_dimension_numbers<[1], [0], [0], [1], [0, 0, 1, 1], [], []>} : vector<8x8xf32>, vector<8x16xf32>, vector<8x16xf32> -> vector<8x16xf32>
    %159 = arith.truncf %158 : vector<8x16xf32> to vector<8x16xbf16>
    %c96 = arith.constant 96 : index
    %c0_55 = arith.constant 0 : index
    %160 = vector.load %arg4[%c96, %c0_55] : memref<128x128xbf16, #tpu.memory_space<vmem>>, vector<16x128xbf16>
    %cst_56 = arith.constant dense<0.000000e+00> : vector<8x128xf32>
    %161 = tpu.matmul %159, %160, %cst_56 {dimension_numbers = #tpu.dot_dimension_numbers<[1], [0], [0], [1], [0, 0, 1, 1], [], []>} : vector<8x16xbf16>, vector<16x128xbf16>, vector<8x128xf32> -> vector<8x128xf32>
    %162 = arith.addf %140, %161 : vector<8x128xf32>
    %163 = vector.extract_strided_slice %7 {offsets = [0, 112], sizes = [8, 16], strides = [1, 1]} : vector<8x384xf32> to vector<8x16xf32>
    %164 = vector.extract_strided_slice %7 {offsets = [0, 240], sizes = [8, 16], strides = [1, 1]} : vector<8x384xf32> to vector<8x16xf32>
    %165 = vector.extract_strided_slice %7 {offsets = [0, 368], sizes = [8, 16], strides = [1, 1]} : vector<8x384xf32> to vector<8x16xf32>
    %166 = tpu.transpose %164, [1, 0] : vector<8x16xf32> -> vector<16x8xf32>
    %cst_57 = arith.constant dense<0.000000e+00> : vector<8x8xf32>
    %167 = tpu.matmul %163, %166, %cst_57 {dimension_numbers = #tpu.dot_dimension_numbers<[1], [0], [0], [1], [0, 0, 1, 1], [], []>} : vector<8x16xf32>, vector<16x8xf32>, vector<8x8xf32> -> vector<8x8xf32>
    %cst_58 = arith.constant 2.500000e-01 : f32
    %168 = vector.broadcast %cst_58 : f32 to vector<8x8xf32>
    %169 = arith.mulf %167, %168 : vector<8x8xf32>
    %cst_59 = arith.constant dense<0xFF800000> : vector<8xf32>
    %170 = vector.multi_reduction <maximumf>, %169, %cst_59 [1] : vector<8x8xf32> to vector<8xf32>
    %171 = vector.shape_cast %170 : vector<8xf32> to vector<8x1xf32>
    %172 = vector.broadcast %171 : vector<8x1xf32> to vector<8x8xf32>
    %173 = arith.subf %169, %172 : vector<8x8xf32>
    %174 = math.exp %173 : vector<8x8xf32>
    %cst_60 = arith.constant dense<0.000000e+00> : vector<8xf32>
    %175 = vector.multi_reduction <add>, %174, %cst_60 [1] : vector<8x8xf32> to vector<8xf32>
    %176 = vector.shape_cast %175 : vector<8xf32> to vector<8x1xf32>
    %177 = tpu.reciprocal %176 {approx = true} : vector<8x1xf32> -> vector<8x1xf32>
    %178 = vector.broadcast %177 : vector<8x1xf32> to vector<8x8xf32>
    %179 = arith.mulf %174, %178 : vector<8x8xf32>
    %cst_61 = arith.constant dense<0.000000e+00> : vector<8x16xf32>
    %180 = tpu.matmul %179, %165, %cst_61 {dimension_numbers = #tpu.dot_dimension_numbers<[1], [0], [0], [1], [0, 0, 1, 1], [], []>} : vector<8x8xf32>, vector<8x16xf32>, vector<8x16xf32> -> vector<8x16xf32>
    %181 = arith.truncf %180 : vector<8x16xf32> to vector<8x16xbf16>
    %c112 = arith.constant 112 : index
    %c0_62 = arith.constant 0 : index
    %182 = vector.load %arg4[%c112, %c0_62] : memref<128x128xbf16, #tpu.memory_space<vmem>>, vector<16x128xbf16>
    %cst_63 = arith.constant dense<0.000000e+00> : vector<8x128xf32>
    %183 = tpu.matmul %181, %182, %cst_63 {dimension_numbers = #tpu.dot_dimension_numbers<[1], [0], [0], [1], [0, 0, 1, 1], [], []>} : vector<8x16xbf16>, vector<16x128xbf16>, vector<8x128xf32> -> vector<8x128xf32>
    %184 = arith.addf %162, %183 : vector<8x128xf32>
    %c0_64 = arith.constant 0 : index
    %c0_65 = arith.constant 0 : index
    %185 = vector.load %arg5[%c0_64, %c0_65] : memref<1x128xf32, #tpu.memory_space<vmem>>, vector<1x128xf32>
    %186 = vector.broadcast %185 : vector<1x128xf32> to vector<8x128xf32>
    %187 = arith.addf %184, %186 : vector<8x128xf32>
    %188 = arith.addf %1, %187 : vector<8x128xf32>
    %cst_66 = arith.constant dense<0.000000e+00> : vector<8xf32>
    %189 = vector.multi_reduction <add>, %188, %cst_66 [1] : vector<8x128xf32> to vector<8xf32>
    %190 = vector.shape_cast %189 : vector<8xf32> to vector<8x1xf32>
    %cst_67 = arith.constant 1.280000e+02 : f32
    %191 = vector.broadcast %cst_67 : f32 to vector<8x1xf32>
    %192 = arith.divf %190, %191 : vector<8x1xf32>
    %193 = vector.broadcast %192 : vector<8x1xf32> to vector<8x128xf32>
    %194 = arith.subf %188, %193 : vector<8x128xf32>
    %195 = arith.mulf %194, %194 : vector<8x128xf32>
    %cst_68 = arith.constant dense<0.000000e+00> : vector<8xf32>
    %196 = vector.multi_reduction <add>, %195, %cst_68 [1] : vector<8x128xf32> to vector<8xf32>
    %197 = vector.shape_cast %196 : vector<8xf32> to vector<8x1xf32>
    %cst_69 = arith.constant 1.280000e+02 : f32
    %198 = vector.broadcast %cst_69 : f32 to vector<8x1xf32>
    %199 = arith.divf %197, %198 : vector<8x1xf32>
    %200 = vector.broadcast %192 : vector<8x1xf32> to vector<8x128xf32>
    %201 = arith.subf %188, %200 : vector<8x128xf32>
    %cst_70 = arith.constant 9.99999974E-6 : f32
    %202 = vector.broadcast %cst_70 : f32 to vector<8x1xf32>
    %203 = arith.addf %199, %202 : vector<8x1xf32>
    %204 = math.rsqrt %203 : vector<8x1xf32>
    %205 = vector.broadcast %204 : vector<8x1xf32> to vector<8x128xf32>
    %206 = arith.mulf %201, %205 : vector<8x128xf32>
    %c0_71 = arith.constant 0 : index
    %c0_72 = arith.constant 0 : index
    %207 = vector.load %arg6[%c0_71, %c0_72] : memref<1x128xf32, #tpu.memory_space<vmem>>, vector<1x128xf32>
    %208 = vector.broadcast %207 : vector<1x128xf32> to vector<8x128xf32>
    %209 = arith.mulf %206, %208 : vector<8x128xf32>
    %c0_73 = arith.constant 0 : index
    %c0_74 = arith.constant 0 : index
    %210 = vector.load %arg7[%c0_73, %c0_74] : memref<1x128xf32, #tpu.memory_space<vmem>>, vector<1x128xf32>
    %211 = vector.broadcast %210 : vector<1x128xf32> to vector<8x128xf32>
    %212 = arith.addf %209, %211 : vector<8x128xf32>
    %213 = arith.truncf %212 : vector<8x128xf32> to vector<8x128xbf16>
    %c0_75 = arith.constant 0 : index
    %c0_76 = arith.constant 0 : index
    %214 = vector.load %arg8[%c0_75, %c0_76] : memref<128x512xbf16, #tpu.memory_space<vmem>>, vector<128x512xbf16>
    %cst_77 = arith.constant dense<0.000000e+00> : vector<8x512xf32>
    %215 = tpu.matmul %213, %214, %cst_77 {dimension_numbers = #tpu.dot_dimension_numbers<[1], [0], [0], [1], [0, 0, 1, 1], [], []>} : vector<8x128xbf16>, vector<128x512xbf16>, vector<8x512xf32> -> vector<8x512xf32>
    %c0_78 = arith.constant 0 : index
    %c0_79 = arith.constant 0 : index
    %216 = vector.load %arg9[%c0_78, %c0_79] : memref<1x512xf32, #tpu.memory_space<vmem>>, vector<1x512xf32>
    %217 = vector.broadcast %216 : vector<1x512xf32> to vector<8x512xf32>
    %218 = arith.addf %215, %217 : vector<8x512xf32>
    %cst_80 = arith.constant 0.000000e+00 : f32
    %219 = vector.broadcast %cst_80 : f32 to vector<8x512xf32>
    %220 = arith.maximumf %218, %219 : vector<8x512xf32>
    %221 = arith.truncf %220 : vector<8x512xf32> to vector<8x512xbf16>
    %c0_81 = arith.constant 0 : index
    %c0_82 = arith.constant 0 : index
    %222 = vector.load %arg10[%c0_81, %c0_82] : memref<512x128xbf16, #tpu.memory_space<vmem>>, vector<512x128xbf16>
    %cst_83 = arith.constant dense<0.000000e+00> : vector<8x128xf32>
    %223 = tpu.matmul %221, %222, %cst_83 {dimension_numbers = #tpu.dot_dimension_numbers<[1], [0], [0], [1], [0, 0, 1, 1], [], []>} : vector<8x512xbf16>, vector<512x128xbf16>, vector<8x128xf32> -> vector<8x128xf32>
    %c0_84 = arith.constant 0 : index
    %c0_85 = arith.constant 0 : index
    %224 = vector.load %arg11[%c0_84, %c0_85] : memref<1x128xf32, #tpu.memory_space<vmem>>, vector<1x128xf32>
    %225 = vector.broadcast %224 : vector<1x128xf32> to vector<8x128xf32>
    %226 = arith.addf %223, %225 : vector<8x128xf32>
    %227 = arith.addf %212, %226 : vector<8x128xf32>
    %cst_86 = arith.constant dense<0.000000e+00> : vector<8xf32>
    %228 = vector.multi_reduction <add>, %227, %cst_86 [1] : vector<8x128xf32> to vector<8xf32>
    %229 = vector.shape_cast %228 : vector<8xf32> to vector<8x1xf32>
    %cst_87 = arith.constant 1.280000e+02 : f32
    %230 = vector.broadcast %cst_87 : f32 to vector<8x1xf32>
    %231 = arith.divf %229, %230 : vector<8x1xf32>
    %232 = vector.broadcast %231 : vector<8x1xf32> to vector<8x128xf32>
    %233 = arith.subf %227, %232 : vector<8x128xf32>
    %234 = arith.mulf %233, %233 : vector<8x128xf32>
    %cst_88 = arith.constant dense<0.000000e+00> : vector<8xf32>
    %235 = vector.multi_reduction <add>, %234, %cst_88 [1] : vector<8x128xf32> to vector<8xf32>
    %236 = vector.shape_cast %235 : vector<8xf32> to vector<8x1xf32>
    %cst_89 = arith.constant 1.280000e+02 : f32
    %237 = vector.broadcast %cst_89 : f32 to vector<8x1xf32>
    %238 = arith.divf %236, %237 : vector<8x1xf32>
    %239 = vector.broadcast %231 : vector<8x1xf32> to vector<8x128xf32>
    %240 = arith.subf %227, %239 : vector<8x128xf32>
    %cst_90 = arith.constant 9.99999974E-6 : f32
    %241 = vector.broadcast %cst_90 : f32 to vector<8x1xf32>
    %242 = arith.addf %238, %241 : vector<8x1xf32>
    %243 = math.rsqrt %242 : vector<8x1xf32>
    %244 = vector.broadcast %243 : vector<8x1xf32> to vector<8x128xf32>
    %245 = arith.mulf %240, %244 : vector<8x128xf32>
    %c0_91 = arith.constant 0 : index
    %c0_92 = arith.constant 0 : index
    %246 = vector.load %arg12[%c0_91, %c0_92] : memref<1x128xf32, #tpu.memory_space<vmem>>, vector<1x128xf32>
    %247 = vector.broadcast %246 : vector<1x128xf32> to vector<8x128xf32>
    %248 = arith.mulf %245, %247 : vector<8x128xf32>
    %c0_93 = arith.constant 0 : index
    %c0_94 = arith.constant 0 : index
    %249 = vector.load %arg13[%c0_93, %c0_94] : memref<1x128xf32, #tpu.memory_space<vmem>>, vector<1x128xf32>
    %250 = vector.broadcast %249 : vector<1x128xf32> to vector<8x128xf32>
    %251 = arith.addf %248, %250 : vector<8x128xf32>
    %c0_95 = arith.constant 0 : index
    %c0_96 = arith.constant 0 : index
    %c0_97 = arith.constant 0 : index
    %252 = vector.load %arg14[%c0_95, %c0_96, %c0_97] : memref<1x8x128xf32, #tpu.memory_space<vmem>>, vector<1x8x128xf32>
    %253 = vector.shape_cast %252 : vector<1x8x128xf32> to vector<8x128xf32>
    %254 = vector.shape_cast %251 : vector<8x128xf32> to vector<1x8x128xf32>
    tpu.vector_store %arg14[%c0_95, %c0_96, %c0_97], %254 {strides = array<i32>} : memref<1x8x128xf32, #tpu.memory_space<vmem>>, vector<1x8x128xf32>,
    return
  }
  func.func @transform_0(%arg0: i32) -> (i32, i32, i32) {
    %c0_i32 = arith.constant 0 : i32
    %c0_i32_0 = arith.constant 0 : i32
    %c0_i32_1 = arith.constant 0 : i32
    return %arg0, %c0_i32, %c0_i32_0 : i32, i32, i32
  }
  func.func @transform_1(%arg0: i32) -> (i32, i32) {
    %c0_i32 = arith.constant 0 : i32
    %c0_i32_0 = arith.constant 0 : i32
    %c0_i32_1 = arith.constant 0 : i32
    return %c0_i32, %c0_i32_0 : i32, i32
  }
  func.func @transform_2(%arg0: i32) -> (i32, i32) {
    %c0_i32 = arith.constant 0 : i32
    %c0_i32_0 = arith.constant 0 : i32
    %c0_i32_1 = arith.constant 0 : i32
    return %c0_i32, %c0_i32_0 : i32, i32
  }
  func.func @transform_3(%arg0: i32) -> (i32, i32) {
    %c0_i32 = arith.constant 0 : i32
    %c0_i32_0 = arith.constant 0 : i32
    %c0_i32_1 = arith.constant 0 : i32
    return %c0_i32, %c0_i32_0 : i32, i32
  }
  func.func @transform_4(%arg0: i32) -> (i32, i32) {
    %c0_i32 = arith.constant 0 : i32
    %c0_i32_0 = arith.constant 0 : i32
    %c0_i32_1 = arith.constant 0 : i32
    return %c0_i32, %c0_i32_0 : i32, i32
  }
  func.func @transform_5(%arg0: i32) -> (i32, i32) {
    %c0_i32 = arith.constant 0 : i32
    %c0_i32_0 = arith.constant 0 : i32
    %c0_i32_1 = arith.constant 0 : i32
    return %c0_i32, %c0_i32_0 : i32, i32
  }
  func.func @transform_6(%arg0: i32) -> (i32, i32) {
    %c0_i32 = arith.constant 0 : i32
    %c0_i32_0 = arith.constant 0 : i32
    %c0_i32_1 = arith.constant 0 : i32
    return %c0_i32, %c0_i32_0 : i32, i32
  }
  func.func @transform_7(%arg0: i32) -> (i32, i32) {
    %c0_i32 = arith.constant 0 : i32
    %c0_i32_0 = arith.constant 0 : i32
    %c0_i32_1 = arith.constant 0 : i32
    return %c0_i32, %c0_i32_0 : i32, i32
  }
  func.func @transform_8(%arg0: i32) -> (i32, i32) {
    %c0_i32 = arith.constant 0 : i32
    %c0_i32_0 = arith.constant 0 : i32
    %c0_i32_1 = arith.constant 0 : i32
    return %c0_i32, %c0_i32_0 : i32, i32
  }
  func.func @transform_9(%arg0: i32) -> (i32, i32) {
    %c0_i32 = arith.constant 0 : i32
    %c0_i32_0 = arith.constant 0 : i32
    %c0_i32_1 = arith.constant 0 : i32
    return %c0_i32, %c0_i32_0 : i32, i32
  }
  func.func @transform_10(%arg0: i32) -> (i32, i32) {
    %c0_i32 = arith.constant 0 : i32
    %c0_i32_0 = arith.constant 0 : i32
    %c0_i32_1 = arith.constant 0 : i32
    return %c0_i32, %c0_i32_0 : i32, i32
  }
  func.func @transform_11(%arg0: i32) -> (i32, i32) {
    %c0_i32 = arith.constant 0 : i32
    %c0_i32_0 = arith.constant 0 : i32
    %c0_i32_1 = arith.constant 0 : i32
    return %c0_i32, %c0_i32_0 : i32, i32
  }
  func.func @transform_12(%arg0: i32) -> (i32, i32) {
    %c0_i32 = arith.constant 0 : i32
    %c0_i32_0 = arith.constant 0 : i32
    %c0_i32_1 = arith.constant 0 : i32
    return %c0_i32, %c0_i32_0 : i32, i32
  }
  func.func @transform_13(%arg0: i32) -> (i32, i32, i32) {
    %c0_i32 = arith.constant 0 : i32
    %c0_i32_0 = arith.constant 0 : i32
    %c0_i32_1 = arith.constant 0 : i32
    return %arg0, %c0_i32, %c0_i32_0 : i32, i32, i32
  }
}

module attributes {stable_mosaic.version = 11 : i64} {
  func.func @_encoder_layer_kernel(%arg0: i32, %arg1: memref<1x8x128xf32, #tpu.memory_space<vmem>>, %arg2: memref<128x384xbf16, #tpu.memory_space<vmem>>, %arg3: memref<1x384xf32, #tpu.memory_space<vmem>>, %arg4: memref<128x128xbf16, #tpu.memory_space<vmem>>, %arg5: memref<1x128xf32, #tpu.memory_space<vmem>>, %arg6: memref<1x128xf32, #tpu.memory_space<vmem>>, %arg7: memref<1x128xf32, #tpu.memory_space<vmem>>, %arg8: memref<128x512xbf16, #tpu.memory_space<vmem>>, %arg9: memref<1x512xf32, #tpu.memory_space<vmem>>, %arg10: memref<512x128xbf16, #tpu.memory_space<vmem>>, %arg11: memref<1x128xf32, #tpu.memory_space<vmem>>, %arg12: memref<1x128xf32, #tpu.memory_space<vmem>>, %arg13: memref<1x128xf32, #tpu.memory_space<vmem>>, %arg14: memref<1x8x128xf32, #tpu.memory_space<vmem>>) attributes {dimension_semantics = [#tpu.dimension_semantics<parallel>], iteration_bounds = array<i64: 2>, scalar_prefetch = 0 : i64, scratch_operands = 0 : i64, tpu.core_type = #tpu.core_type<tc>, window_params = [{transform_indices = @transform_0, window_bounds = array<i64: 1, 8, 128>}, {pipeline_mode = #tpu.pipeline_mode<synchronous>, transform_indices = @transform_1, window_bounds = array<i64: 128, 384>}, {pipeline_mode = #tpu.pipeline_mode<synchronous>, transform_indices = @transform_2, window_bounds = array<i64: 1, 384>}, {pipeline_mode = #tpu.pipeline_mode<synchronous>, transform_indices = @transform_3, window_bounds = array<i64: 128, 128>}, {pipeline_mode = #tpu.pipeline_mode<synchronous>, transform_indices = @transform_4, window_bounds = array<i64: 1, 128>}, {pipeline_mode = #tpu.pipeline_mode<synchronous>, transform_indices = @transform_5, window_bounds = array<i64: 1, 128>}, {pipeline_mode = #tpu.pipeline_mode<synchronous>, transform_indices = @transform_6, window_bounds = array<i64: 1, 128>}, {pipeline_mode = #tpu.pipeline_mode<synchronous>, transform_indices = @transform_7, window_bounds = array<i64: 128, 512>}, {pipeline_mode = #tpu.pipeline_mode<synchronous>, transform_indices = @transform_8, window_bounds = array<i64: 1, 512>}, {pipeline_mode = #tpu.pipeline_mode<synchronous>, transform_indices = @transform_9, window_bounds = array<i64: 512, 128>}, {pipeline_mode = #tpu.pipeline_mode<synchronous>, transform_indices = @transform_10, window_bounds = array<i64: 1, 128>}, {pipeline_mode = #tpu.pipeline_mode<synchronous>, transform_indices = @transform_11, window_bounds = array<i64: 1, 128>}, {pipeline_mode = #tpu.pipeline_mode<synchronous>, transform_indices = @transform_12, window_bounds = array<i64: 1, 128>}, {transform_indices = @transform_13, window_bounds = array<i64: 1, 8, 128>}]} {
    %c0 = arith.constant 0 : index
    %c0_0 = arith.constant 0 : index
    %c0_1 = arith.constant 0 : index
    %0 = vector.load %arg1[%c0, %c0_0, %c0_1] : memref<1x8x128xf32, #tpu.memory_space<vmem>>, vector<1x8x128xf32>
    %1 = vector.shape_cast %0 : vector<1x8x128xf32> to vector<8x128xf32>
    %2 = arith.truncf %1 : vector<8x128xf32> to vector<8x128xbf16>
    %c0_2 = arith.constant 0 : index
    %c0_3 = arith.constant 0 : index
    %3 = vector.load %arg2[%c0_2, %c0_3] : memref<128x384xbf16, #tpu.memory_space<vmem>>, vector<128x384xbf16>
    %cst = arith.constant dense<0.000000e+00> : vector<8x384xf32>
    %4 = tpu.matmul %2, %3, %cst {dimension_numbers = #tpu.dot_dimension_numbers<[1], [0], [0], [1], [0, 0, 1, 1], [], []>} : vector<8x128xbf16>, vector<128x384xbf16>, vector<8x384xf32> -> vector<8x384xf32>
    %c0_4 = arith.constant 0 : index
    %c0_5 = arith.constant 0 : index
    %5 = vector.load %arg3[%c0_4, %c0_5] : memref<1x384xf32, #tpu.memory_space<vmem>>, vector<1x384xf32>
    %6 = vector.broadcast %5 : vector<1x384xf32> to vector<8x384xf32>
    %7 = arith.addf %4, %6 : vector<8x384xf32>
    %cst_6 = arith.constant 0.000000e+00 : f32
    %8 = vector.broadcast %cst_6 : f32 to vector<8x128xf32>
    %9 = vector.extract_strided_slice %7 {offsets = [0, 0], sizes = [8, 16], strides = [1, 1]} : vector<8x384xf32> to vector<8x16xf32>
    %10 = vector.extract_strided_slice %7 {offsets = [0, 128], sizes = [8, 16], strides = [1, 1]} : vector<8x384xf32> to vector<8x16xf32>
    %11 = vector.extract_strided_slice %7 {offsets = [0, 256], sizes = [8, 16], strides = [1, 1]} : vector<8x384xf32> to vector<8x16xf32>
    %12 = tpu.transpose %10, [1, 0] : vector<8x16xf32> -> vector<16x8xf32>
    %cst_7 = arith.constant dense<0.000000e+00> : vector<8x8xf32>
    %13 = tpu.matmul %9, %12, %cst_7 {dimension_numbers = #tpu.dot_dimension_numbers<[1], [0], [0], [1], [0, 0, 1, 1], [], []>} : vector<8x16xf32>, vector<16x8xf32>, vector<8x8xf32> -> vector<8x8xf32>
    %cst_8 = arith.constant 2.500000e-01 : f32
    %14 = vector.broadcast %cst_8 : f32 to vector<8x8xf32>
    %15 = arith.mulf %13, %14 : vector<8x8xf32>
    %cst_9 = arith.constant dense<0xFF800000> : vector<8xf32>
    %16 = vector.multi_reduction <maximumf>, %15, %cst_9 [1] : vector<8x8xf32> to vector<8xf32>
    %17 = vector.shape_cast %16 : vector<8xf32> to vector<8x1xf32>
    %18 = vector.broadcast %17 : vector<8x1xf32> to vector<8x8xf32>
    %19 = arith.subf %15, %18 : vector<8x8xf32>
    %20 = math.exp %19 : vector<8x8xf32>
    %cst_10 = arith.constant dense<0.000000e+00> : vector<8xf32>
    %21 = vector.multi_reduction <add>, %20, %cst_10 [1] : vector<8x8xf32> to vector<8xf32>
    %22 = vector.shape_cast %21 : vector<8xf32> to vector<8x1xf32>
    %23 = tpu.reciprocal %22 {approx = true} : vector<8x1xf32> -> vector<8x1xf32>
    %24 = vector.broadcast %23 : vector<8x1xf32> to vector<8x8xf32>
    %25 = arith.mulf %20, %24 : vector<8x8xf32>
    %cst_11 = arith.constant dense<0.000000e+00> : vector<8x16xf32>
    %26 = tpu.matmul %25, %11, %cst_11 {dimension_numbers = #tpu.dot_dimension_numbers<[1], [0], [0], [1], [0, 0, 1, 1], [], []>} : vector<8x8xf32>, vector<8x16xf32>, vector<8x16xf32> -> vector<8x16xf32>
    %27 = arith.truncf %26 : vector<8x16xf32> to vector<8x16xbf16>
    %c0_12 = arith.constant 0 : index
    %c0_13 = arith.constant 0 : index
    %28 = vector.load %arg4[%c0_12, %c0_13] : memref<128x128xbf16, #tpu.memory_space<vmem>>, vector<16x128xbf16>
    %cst_14 = arith.constant dense<0.000000e+00> : vector<8x128xf32>
    %29 = tpu.matmul %27, %28, %cst_14 {dimension_numbers = #tpu.dot_dimension_numbers<[1], [0], [0], [1], [0, 0, 1, 1], [], []>} : vector<8x16xbf16>, vector<16x128xbf16>, vector<8x128xf32> -> vector<8x128xf32>
    %30 = arith.addf %8, %29 : vector<8x128xf32>
    %31 = vector.extract_strided_slice %7 {offsets = [0, 16], sizes = [8, 16], strides = [1, 1]} : vector<8x384xf32> to vector<8x16xf32>
    %32 = vector.extract_strided_slice %7 {offsets = [0, 144], sizes = [8, 16], strides = [1, 1]} : vector<8x384xf32> to vector<8x16xf32>
    %33 = vector.extract_strided_slice %7 {offsets = [0, 272], sizes = [8, 16], strides = [1, 1]} : vector<8x384xf32> to vector<8x16xf32>
    %34 = tpu.transpose %32, [1, 0] : vector<8x16xf32> -> vector<16x8xf32>
    %cst_15 = arith.constant dense<0.000000e+00> : vector<8x8xf32>
    %35 = tpu.matmul %31, %34, %cst_15 {dimension_numbers = #tpu.dot_dimension_numbers<[1], [0], [0], [1], [0, 0, 1, 1], [], []>} : vector<8x16xf32>, vector<16x8xf32>, vector<8x8xf32> -> vector<8x8xf32>
    %cst_16 = arith.constant 2.500000e-01 : f32
    %36 = vector.broadcast %cst_16 : f32 to vector<8x8xf32>
    %37 = arith.mulf %35, %36 : vector<8x8xf32>
    %cst_17 = arith.constant dense<0xFF800000> : vector<8xf32>
    %38 = vector.multi_reduction <maximumf>, %37, %cst_17 [1] : vector<8x8xf32> to vector<8xf32>
    %39 = vector.shape_cast %38 : vector<8xf32> to vector<8x1xf32>
    %40 = vector.broadcast %39 : vector<8x1xf32> to vector<8x8xf32>
    %41 = arith.subf %37, %40 : vector<8x8xf32>
    %42 = math.exp %41 : vector<8x8xf32>
    %cst_18 = arith.constant dense<0.000000e+00> : vector<8xf32>
    %43 = vector.multi_reduction <add>, %42, %cst_18 [1] : vector<8x8xf32> to vector<8xf32>
    %44 = vector.shape_cast %43 : vector<8xf32> to vector<8x1xf32>
    %45 = tpu.reciprocal %44 {approx = true} : vector<8x1xf32> -> vector<8x1xf32>
    %46 = vector.broadcast %45 : vector<8x1xf32> to vector<8x8xf32>
    %47 = arith.mulf %42, %46 : vector<8x8xf32>
    %cst_19 = arith.constant dense<0.000000e+00> : vector<8x16xf32>
    %48 = tpu.matmul %47, %33, %cst_19 {dimension_numbers = #tpu.dot_dimension_numbers<[1], [0], [0], [1], [0, 0, 1, 1], [], []>} : vector<8x8xf32>, vector<8x16xf32>, vector<8x16xf32> -> vector<8x16xf32>
    %49 = arith.truncf %48 : vector<8x16xf32> to vector<8x16xbf16>
    %c16 = arith.constant 16 : index
    %c0_20 = arith.constant 0 : index
    %50 = vector.load %arg4[%c16, %c0_20] : memref<128x128xbf16, #tpu.memory_space<vmem>>, vector<16x128xbf16>
    %cst_21 = arith.constant dense<0.000000e+00> : vector<8x128xf32>
    %51 = tpu.matmul %49, %50, %cst_21 {dimension_numbers = #tpu.dot_dimension_numbers<[1], [0], [0], [1], [0, 0, 1, 1], [], []>} : vector<8x16xbf16>, vector<16x128xbf16>, vector<8x128xf32> -> vector<8x128xf32>
    %52 = arith.addf %30, %51 : vector<8x128xf32>
    %53 = vector.extract_strided_slice %7 {offsets = [0, 32], sizes = [8, 16], strides = [1, 1]} : vector<8x384xf32> to vector<8x16xf32>
    %54 = vector.extract_strided_slice %7 {offsets = [0, 160], sizes = [8, 16], strides = [1, 1]} : vector<8x384xf32> to vector<8x16xf32>
    %55 = vector.extract_strided_slice %7 {offsets = [0, 288], sizes = [8, 16], strides = [1, 1]} : vector<8x384xf32> to vector<8x16xf32>
    %56 = tpu.transpose %54, [1, 0] : vector<8x16xf32> -> vector<16x8xf32>
    %cst_22 = arith.constant dense<0.000000e+00> : vector<8x8xf32>
    %57 = tpu.matmul %53, %56, %cst_22 {dimension_numbers = #tpu.dot_dimension_numbers<[1], [0], [0], [1], [0, 0, 1, 1], [], []>} : vector<8x16xf32>, vector<16x8xf32>, vector<8x8xf32> -> vector<8x8xf32>
    %cst_23 = arith.constant 2.500000e-01 : f32
    %58 = vector.broadcast %cst_23 : f32 to vector<8x8xf32>
    %59 = arith.mulf %57, %58 : vector<8x8xf32>
    %cst_24 = arith.constant dense<0xFF800000> : vector<8xf32>
    %60 = vector.multi_reduction <maximumf>, %59, %cst_24 [1] : vector<8x8xf32> to vector<8xf32>
    %61 = vector.shape_cast %60 : vector<8xf32> to vector<8x1xf32>
    %62 = vector.broadcast %61 : vector<8x1xf32> to vector<8x8xf32>
    %63 = arith.subf %59, %62 : vector<8x8xf32>
    %64 = math.exp %63 : vector<8x8xf32>
    %cst_25 = arith.constant dense<0.000000e+00> : vector<8xf32>
    %65 = vector.multi_reduction <add>, %64, %cst_25 [1] : vector<8x8xf32> to vector<8xf32>
    %66 = vector.shape_cast %65 : vector<8xf32> to vector<8x1xf32>
    %67 = tpu.reciprocal %66 {approx = true} : vector<8x1xf32> -> vector<8x1xf32>
    %68 = vector.broadcast %67 : vector<8x1xf32> to vector<8x8xf32>
    %69 = arith.mulf %64, %68 : vector<8x8xf32>
    %cst_26 = arith.constant dense<0.000000e+00> : vector<8x16xf32>
    %70 = tpu.matmul %69, %55, %cst_26 {dimension_numbers = #tpu.dot_dimension_numbers<[1], [0], [0], [1], [0, 0, 1, 1], [], []>} : vector<8x8xf32>, vector<8x16xf32>, vector<8x16xf32> -> vector<8x16xf32>
    %71 = arith.truncf %70 : vector<8x16xf32> to vector<8x16xbf16>
    %c32 = arith.constant 32 : index
    %c0_27 = arith.constant 0 : index
    %72 = vector.load %arg4[%c32, %c0_27] : memref<128x128xbf16, #tpu.memory_space<vmem>>, vector<16x128xbf16>
    %cst_28 = arith.constant dense<0.000000e+00> : vector<8x128xf32>
    %73 = tpu.matmul %71, %72, %cst_28 {dimension_numbers = #tpu.dot_dimension_numbers<[1], [0], [0], [1], [0, 0, 1, 1], [], []>} : vector<8x16xbf16>, vector<16x128xbf16>, vector<8x128xf32> -> vector<8x128xf32>
    %74 = arith.addf %52, %73 : vector<8x128xf32>
    %75 = vector.extract_strided_slice %7 {offsets = [0, 48], sizes = [8, 16], strides = [1, 1]} : vector<8x384xf32> to vector<8x16xf32>
    %76 = vector.extract_strided_slice %7 {offsets = [0, 176], sizes = [8, 16], strides = [1, 1]} : vector<8x384xf32> to vector<8x16xf32>
    %77 = vector.extract_strided_slice %7 {offsets = [0, 304], sizes = [8, 16], strides = [1, 1]} : vector<8x384xf32> to vector<8x16xf32>
    %78 = tpu.transpose %76, [1, 0] : vector<8x16xf32> -> vector<16x8xf32>
    %cst_29 = arith.constant dense<0.000000e+00> : vector<8x8xf32>
    %79 = tpu.matmul %75, %78, %cst_29 {dimension_numbers = #tpu.dot_dimension_numbers<[1], [0], [0], [1], [0, 0, 1, 1], [], []>} : vector<8x16xf32>, vector<16x8xf32>, vector<8x8xf32> -> vector<8x8xf32>
    %cst_30 = arith.constant 2.500000e-01 : f32
    %80 = vector.broadcast %cst_30 : f32 to vector<8x8xf32>
    %81 = arith.mulf %79, %80 : vector<8x8xf32>
    %cst_31 = arith.constant dense<0xFF800000> : vector<8xf32>
    %82 = vector.multi_reduction <maximumf>, %81, %cst_31 [1] : vector<8x8xf32> to vector<8xf32>
    %83 = vector.shape_cast %82 : vector<8xf32> to vector<8x1xf32>
    %84 = vector.broadcast %83 : vector<8x1xf32> to vector<8x8xf32>
    %85 = arith.subf %81, %84 : vector<8x8xf32>
    %86 = math.exp %85 : vector<8x8xf32>
    %cst_32 = arith.constant dense<0.000000e+00> : vector<8xf32>
    %87 = vector.multi_reduction <add>, %86, %cst_32 [1] : vector<8x8xf32> to vector<8xf32>
    %88 = vector.shape_cast %87 : vector<8xf32> to vector<8x1xf32>
    %89 = tpu.reciprocal %88 {approx = true} : vector<8x1xf32> -> vector<8x1xf32>
    %90 = vector.broadcast %89 : vector<8x1xf32> to vector<8x8xf32>
    %91 = arith.mulf %86, %90 : vector<8x8xf32>
    %cst_33 = arith.constant dense<0.000000e+00> : vector<8x16xf32>
    %92 = tpu.matmul %91, %77, %cst_33 {dimension_numbers = #tpu.dot_dimension_numbers<[1], [0], [0], [1], [0, 0, 1, 1], [], []>} : vector<8x8xf32>, vector<8x16xf32>, vector<8x16xf32> -> vector<8x16xf32>
    %93 = arith.truncf %92 : vector<8x16xf32> to vector<8x16xbf16>
    %c48 = arith.constant 48 : index
    %c0_34 = arith.constant 0 : index
    %94 = vector.load %arg4[%c48, %c0_34] : memref<128x128xbf16, #tpu.memory_space<vmem>>, vector<16x128xbf16>
    %cst_35 = arith.constant dense<0.000000e+00> : vector<8x128xf32>
    %95 = tpu.matmul %93, %94, %cst_35 {dimension_numbers = #tpu.dot_dimension_numbers<[1], [0], [0], [1], [0, 0, 1, 1], [], []>} : vector<8x16xbf16>, vector<16x128xbf16>, vector<8x128xf32> -> vector<8x128xf32>
    %96 = arith.addf %74, %95 : vector<8x128xf32>
    %97 = vector.extract_strided_slice %7 {offsets = [0, 64], sizes = [8, 16], strides = [1, 1]} : vector<8x384xf32> to vector<8x16xf32>
    %98 = vector.extract_strided_slice %7 {offsets = [0, 192], sizes = [8, 16], strides = [1, 1]} : vector<8x384xf32> to vector<8x16xf32>
    %99 = vector.extract_strided_slice %7 {offsets = [0, 320], sizes = [8, 16], strides = [1, 1]} : vector<8x384xf32> to vector<8x16xf32>
    %100 = tpu.transpose %98, [1, 0] : vector<8x16xf32> -> vector<16x8xf32>
    %cst_36 = arith.constant dense<0.000000e+00> : vector<8x8xf32>
    %101 = tpu.matmul %97, %100, %cst_36 {dimension_numbers = #tpu.dot_dimension_numbers<[1], [0], [0], [1], [0, 0, 1, 1], [], []>} : vector<8x16xf32>, vector<16x8xf32>, vector<8x8xf32> -> vector<8x8xf32>
    %cst_37 = arith.constant 2.500000e-01 : f32
    %102 = vector.broadcast %cst_37 : f32 to vector<8x8xf32>
    %103 = arith.mulf %101, %102 : vector<8x8xf32>
    %cst_38 = arith.constant dense<0xFF800000> : vector<8xf32>
    %104 = vector.multi_reduction <maximumf>, %103, %cst_38 [1] : vector<8x8xf32> to vector<8xf32>
    %105 = vector.shape_cast %104 : vector<8xf32> to vector<8x1xf32>
    %106 = vector.broadcast %105 : vector<8x1xf32> to vector<8x8xf32>
    %107 = arith.subf %103, %106 : vector<8x8xf32>
    %108 = math.exp %107 : vector<8x8xf32>
    %cst_39 = arith.constant dense<0.000000e+00> : vector<8xf32>
    %109 = vector.multi_reduction <add>, %108, %cst_39 [1] : vector<8x8xf32> to vector<8xf32>
    %110 = vector.shape_cast %109 : vector<8xf32> to vector<8x1xf32>
    %111 = tpu.reciprocal %110 {approx = true} : vector<8x1xf32> -> vector<8x1xf32>
    %112 = vector.broadcast %111 : vector<8x1xf32> to vector<8x8xf32>
    %113 = arith.mulf %108, %112 : vector<8x8xf32>
    %cst_40 = arith.constant dense<0.000000e+00> : vector<8x16xf32>
    %114 = tpu.matmul %113, %99, %cst_40 {dimension_numbers = #tpu.dot_dimension_numbers<[1], [0], [0], [1], [0, 0, 1, 1], [], []>} : vector<8x8xf32>, vector<8x16xf32>, vector<8x16xf32> -> vector<8x16xf32>
    %115 = arith.truncf %114 : vector<8x16xf32> to vector<8x16xbf16>
    %c64 = arith.constant 64 : index
    %c0_41 = arith.constant 0 : index
    %116 = vector.load %arg4[%c64, %c0_41] : memref<128x128xbf16, #tpu.memory_space<vmem>>, vector<16x128xbf16>
    %cst_42 = arith.constant dense<0.000000e+00> : vector<8x128xf32>
    %117 = tpu.matmul %115, %116, %cst_42 {dimension_numbers = #tpu.dot_dimension_numbers<[1], [0], [0], [1], [0, 0, 1, 1], [], []>} : vector<8x16xbf16>, vector<16x128xbf16>, vector<8x128xf32> -> vector<8x128xf32>
    %118 = arith.addf %96, %117 : vector<8x128xf32>
    %119 = vector.extract_strided_slice %7 {offsets = [0, 80], sizes = [8, 16], strides = [1, 1]} : vector<8x384xf32> to vector<8x16xf32>
    %120 = vector.extract_strided_slice %7 {offsets = [0, 208], sizes = [8, 16], strides = [1, 1]} : vector<8x384xf32> to vector<8x16xf32>
    %121 = vector.extract_strided_slice %7 {offsets = [0, 336], sizes = [8, 16], strides = [1, 1]} : vector<8x384xf32> to vector<8x16xf32>
    %122 = tpu.transpose %120, [1, 0] : vector<8x16xf32> -> vector<16x8xf32>
    %cst_43 = arith.constant dense<0.000000e+00> : vector<8x8xf32>
    %123 = tpu.matmul %119, %122, %cst_43 {dimension_numbers = #tpu.dot_dimension_numbers<[1], [0], [0], [1], [0, 0, 1, 1], [], []>} : vector<8x16xf32>, vector<16x8xf32>, vector<8x8xf32> -> vector<8x8xf32>
    %cst_44 = arith.constant 2.500000e-01 : f32
    %124 = vector.broadcast %cst_44 : f32 to vector<8x8xf32>
    %125 = arith.mulf %123, %124 : vector<8x8xf32>
    %cst_45 = arith.constant dense<0xFF800000> : vector<8xf32>
    %126 = vector.multi_reduction <maximumf>, %125, %cst_45 [1] : vector<8x8xf32> to vector<8xf32>
    %127 = vector.shape_cast %126 : vector<8xf32> to vector<8x1xf32>
    %128 = vector.broadcast %127 : vector<8x1xf32> to vector<8x8xf32>
    %129 = arith.subf %125, %128 : vector<8x8xf32>
    %130 = math.exp %129 : vector<8x8xf32>
    %cst_46 = arith.constant dense<0.000000e+00> : vector<8xf32>
    %131 = vector.multi_reduction <add>, %130, %cst_46 [1] : vector<8x8xf32> to vector<8xf32>
    %132 = vector.shape_cast %131 : vector<8xf32> to vector<8x1xf32>
    %133 = tpu.reciprocal %132 {approx = true} : vector<8x1xf32> -> vector<8x1xf32>
    %134 = vector.broadcast %133 : vector<8x1xf32> to vector<8x8xf32>
    %135 = arith.mulf %130, %134 : vector<8x8xf32>
    %cst_47 = arith.constant dense<0.000000e+00> : vector<8x16xf32>
    %136 = tpu.matmul %135, %121, %cst_47 {dimension_numbers = #tpu.dot_dimension_numbers<[1], [0], [0], [1], [0, 0, 1, 1], [], []>} : vector<8x8xf32>, vector<8x16xf32>, vector<8x16xf32> -> vector<8x16xf32>
    %137 = arith.truncf %136 : vector<8x16xf32> to vector<8x16xbf16>
    %c80 = arith.constant 80 : index
    %c0_48 = arith.constant 0 : index
    %138 = vector.load %arg4[%c80, %c0_48] : memref<128x128xbf16, #tpu.memory_space<vmem>>, vector<16x128xbf16>
    %cst_49 = arith.constant dense<0.000000e+00> : vector<8x128xf32>
    %139 = tpu.matmul %137, %138, %cst_49 {dimension_numbers = #tpu.dot_dimension_numbers<[1], [0], [0], [1], [0, 0, 1, 1], [], []>} : vector<8x16xbf16>, vector<16x128xbf16>, vector<8x128xf32> -> vector<8x128xf32>
    %140 = arith.addf %118, %139 : vector<8x128xf32>
    %141 = vector.extract_strided_slice %7 {offsets = [0, 96], sizes = [8, 16], strides = [1, 1]} : vector<8x384xf32> to vector<8x16xf32>
    %142 = vector.extract_strided_slice %7 {offsets = [0, 224], sizes = [8, 16], strides = [1, 1]} : vector<8x384xf32> to vector<8x16xf32>
    %143 = vector.extract_strided_slice %7 {offsets = [0, 352], sizes = [8, 16], strides = [1, 1]} : vector<8x384xf32> to vector<8x16xf32>
    %144 = tpu.transpose %142, [1, 0] : vector<8x16xf32> -> vector<16x8xf32>
    %cst_50 = arith.constant dense<0.000000e+00> : vector<8x8xf32>
    %145 = tpu.matmul %141, %144, %cst_50 {dimension_numbers = #tpu.dot_dimension_numbers<[1], [0], [0], [1], [0, 0, 1, 1], [], []>} : vector<8x16xf32>, vector<16x8xf32>, vector<8x8xf32> -> vector<8x8xf32>
    %cst_51 = arith.constant 2.500000e-01 : f32
    %146 = vector.broadcast %cst_51 : f32 to vector<8x8xf32>
    %147 = arith.mulf %145, %146 : vector<8x8xf32>
    %cst_52 = arith.constant dense<0xFF800000> : vector<8xf32>
    %148 = vector.multi_reduction <maximumf>, %147, %cst_52 [1] : vector<8x8xf32> to vector<8xf32>
    %149 = vector.shape_cast %148 : vector<8xf32> to vector<8x1xf32>
    %150 = vector.broadcast %149 : vector<8x1xf32> to vector<8x8xf32>
    %151 = arith.subf %147, %150 : vector<8x8xf32>
    %152 = math.exp %151 : vector<8x8xf32>
    %cst_53 = arith.constant dense<0.000000e+00> : vector<8xf32>
    %153 = vector.multi_reduction <add>, %152, %cst_53 [1] : vector<8x8xf32> to vector<8xf32>
    %154 = vector.shape_cast %153 : vector<8xf32> to vector<8x1xf32>
    %155 = tpu.reciprocal %154 {approx = true} : vector<8x1xf32> -> vector<8x1xf32>
    %156 = vector.broadcast %155 : vector<8x1xf32> to vector<8x8xf32>
    %157 = arith.mulf %152, %156 : vector<8x8xf32>
    %cst_54 = arith.constant dense<0.000000e+00> : vector<8x16xf32>
    %158 = tpu.matmul %157, %143, %cst_54 {dimension_numbers = #tpu.dot_dimension_numbers<[1], [0], [0], [1], [0, 0, 1, 1], [], []>} : vector<8x8xf32>, vector<8x16xf32>, vector<8x16xf32> -> vector<8x16xf32>
    %159 = arith.truncf %158 : vector<8x16xf32> to vector<8x16xbf16>
    %c96 = arith.constant 96 : index
    %c0_55 = arith.constant 0 : index
    %160 = vector.load %arg4[%c96, %c0_55] : memref<128x128xbf16, #tpu.memory_space<vmem>>, vector<16x128xbf16>
    %cst_56 = arith.constant dense<0.000000e+00> : vector<8x128xf32>
    %161 = tpu.matmul %159, %160, %cst_56 {dimension_numbers = #tpu.dot_dimension_numbers<[1], [0], [0], [1], [0, 0, 1, 1], [], []>} : vector<8x16xbf16>, vector<16x128xbf16>, vector<8x128xf32> -> vector<8x128xf32>
    %162 = arith.addf %140, %161 : vector<8x128xf32>
    %163 = vector.extract_strided_slice %7 {offsets = [0, 112], sizes = [8, 16], strides = [1, 1]} : vector<8x384xf32> to vector<8x16xf32>
    %164 = vector.extract_strided_slice %7 {offsets = [0, 240], sizes = [8, 16], strides = [1, 1]} : vector<8x384xf32> to vector<8x16xf32>
    %165 = vector.extract_strided_slice %7 {offsets = [0, 368], sizes = [8, 16], strides = [1, 1]} : vector<8x384xf32> to vector<8x16xf32>
    %166 = tpu.transpose %164, [1, 0] : vector<8x16xf32> -> vector<16x8xf32>
    %cst_57 = arith.constant dense<0.000000e+00> : vector<8x8xf32>
    %167 = tpu.matmul %163, %166, %cst_57 {dimension_numbers = #tpu.dot_dimension_numbers<[1], [0], [0], [1], [0, 0, 1, 1], [], []>} : vector<8x16xf32>, vector<16x8xf32>, vector<8x8xf32> -> vector<8x8xf32>
    %cst_58 = arith.constant 2.500000e-01 : f32
    %168 = vector.broadcast %cst_58 : f32 to vector<8x8xf32>
    %169 = arith.mulf %167, %168 : vector<8x8xf32>
    %cst_59 = arith.constant dense<0xFF800000> : vector<8xf32>
    %170 = vector.multi_reduction <maximumf>, %169, %cst_59 [1] : vector<8x8xf32> to vector<8xf32>
    %171 = vector.shape_cast %170 : vector<8xf32> to vector<8x1xf32>
    %172 = vector.broadcast %171 : vector<8x1xf32> to vector<8x8xf32>
    %173 = arith.subf %169, %172 : vector<8x8xf32>
    %174 = math.exp %173 : vector<8x8xf32>
    %cst_60 = arith.constant dense<0.000000e+00> : vector<8xf32>
    %175 = vector.multi_reduction <add>, %174, %cst_60 [1] : vector<8x8xf32> to vector<8xf32>
    %176 = vector.shape_cast %175 : vector<8xf32> to vector<8x1xf32>
    %177 = tpu.reciprocal %176 {approx = true} : vector<8x1xf32> -> vector<8x1xf32>
    %178 = vector.broadcast %177 : vector<8x1xf32> to vector<8x8xf32>
    %179 = arith.mulf %174, %178 : vector<8x8xf32>
    %cst_61 = arith.constant dense<0.000000e+00> : vector<8x16xf32>
    %180 = tpu.matmul %179, %165, %cst_61 {dimension_numbers = #tpu.dot_dimension_numbers<[1], [0], [0], [1], [0, 0, 1, 1], [], []>} : vector<8x8xf32>, vector<8x16xf32>, vector<8x16xf32> -> vector<8x16xf32>
    %181 = arith.truncf %180 : vector<8x16xf32> to vector<8x16xbf16>
    %c112 = arith.constant 112 : index
    %c0_62 = arith.constant 0 : index
    %182 = vector.load %arg4[%c112, %c0_62] : memref<128x128xbf16, #tpu.memory_space<vmem>>, vector<16x128xbf16>
    %cst_63 = arith.constant dense<0.000000e+00> : vector<8x128xf32>
    %183 = tpu.matmul %181, %182, %cst_63 {dimension_numbers = #tpu.dot_dimension_numbers<[1], [0], [0], [1], [0, 0, 1, 1], [], []>} : vector<8x16xbf16>, vector<16x128xbf16>, vector<8x128xf32> -> vector<8x128xf32>
    %184 = arith.addf %162, %183 : vector<8x128xf32>
    %c0_64 = arith.constant 0 : index
    %c0_65 = arith.constant 0 : index
    %185 = vector.load %arg5[%c0_64, %c0_65] : memref<1x128xf32, #tpu.memory_space<vmem>>, vector<1x128xf32>
    %186 = vector.broadcast %185 : vector<1x128xf32> to vector<8x128xf32>
    %187 = arith.addf %184, %186 : vector<8x128xf32>
    %188 = arith.addf %1, %187 : vector<8x128xf32>
    %cst_66 = arith.constant dense<0.000000e+00> : vector<8xf32>
    %189 = vector.multi_reduction <add>, %188, %cst_66 [1] : vector<8x128xf32> to vector<8xf32>
    %190 = vector.shape_cast %189 : vector<8xf32> to vector<8x1xf32>
    %cst_67 = arith.constant 1.280000e+02 : f32
    %191 = vector.broadcast %cst_67 : f32 to vector<8x1xf32>
    %192 = arith.divf %190, %191 : vector<8x1xf32>
    %193 = vector.broadcast %192 : vector<8x1xf32> to vector<8x128xf32>
    %194 = arith.subf %188, %193 : vector<8x128xf32>
    %195 = arith.mulf %194, %194 : vector<8x128xf32>
    %cst_68 = arith.constant dense<0.000000e+00> : vector<8xf32>
    %196 = vector.multi_reduction <add>, %195, %cst_68 [1] : vector<8x128xf32> to vector<8xf32>
    %197 = vector.shape_cast %196 : vector<8xf32> to vector<8x1xf32>
    %cst_69 = arith.constant 1.280000e+02 : f32
    %198 = vector.broadcast %cst_69 : f32 to vector<8x1xf32>
    %199 = arith.divf %197, %198 : vector<8x1xf32>
    %200 = vector.broadcast %192 : vector<8x1xf32> to vector<8x128xf32>
    %201 = arith.subf %188, %200 : vector<8x128xf32>
    %cst_70 = arith.constant 9.99999974E-6 : f32
    %202 = vector.broadcast %cst_70 : f32 to vector<8x1xf32>
    %203 = arith.addf %199, %202 : vector<8x1xf32>
    %204 = math.rsqrt %203 : vector<8x1xf32>
    %205 = vector.broadcast %204 : vector<8x1xf32> to vector<8x128xf32>
    %206 = arith.mulf %201, %205 : vector<8x128xf32>
    %c0_71 = arith.constant 0 : index
    %c0_72 = arith.constant 0 : index
    %207 = vector.load %arg6[%c0_71, %c0_72] : memref<1x128xf32, #tpu.memory_space<vmem>>, vector<1x128xf32>
    %208 = vector.broadcast %207 : vector<1x128xf32> to vector<8x128xf32>
    %209 = arith.mulf %206, %208 : vector<8x128xf32>
    %c0_73 = arith.constant 0 : index
    %c0_74 = arith.constant 0 : index
    %210 = vector.load %arg7[%c0_73, %c0_74] : memref<1x128xf32, #tpu.memory_space<vmem>>, vector<1x128xf32>
    %211 = vector.broadcast %210 : vector<1x128xf32> to vector<8x128xf32>
    %212 = arith.addf %209, %211 : vector<8x128xf32>
    %213 = arith.truncf %212 : vector<8x128xf32> to vector<8x128xbf16>
    %c0_75 = arith.constant 0 : index
    %c0_76 = arith.constant 0 : index
    %214 = vector.load %arg8[%c0_75, %c0_76] : memref<128x512xbf16, #tpu.memory_space<vmem>>, vector<128x512xbf16>
    %cst_77 = arith.constant dense<0.000000e+00> : vector<8x512xf32>
    %215 = tpu.matmul %213, %214, %cst_77 {dimension_numbers = #tpu.dot_dimension_numbers<[1], [0], [0], [1], [0, 0, 1, 1], [], []>} : vector<8x128xbf16>, vector<128x512xbf16>, vector<8x512xf32> -> vector<8x512xf32>
    %c0_78 = arith.constant 0 : index
    %c0_79 = arith.constant 0 : index
    %216 = vector.load %arg9[%c0_78, %c0_79] : memref<1x512xf32, #tpu.memory_space<vmem>>, vector<1x512xf32>
    %217 = vector.broadcast %216 : vector<1x512xf32> to vector<8x512xf32>
    %218 = arith.addf %215, %217 : vector<8x512xf32>
    %cst_80 = arith.constant 0.000000e+00 : f32
    %219 = vector.broadcast %cst_80 : f32 to vector<8x512xf32>
    %220 = arith.maximumf %218, %219 : vector<8x512xf32>
    %221 = arith.truncf %220 : vector<8x512xf32> to vector<8x512xbf16>
    %c0_81 = arith.constant 0 : index
    %c0_82 = arith.constant 0 : index
    %222 = vector.load %arg10[%c0_81, %c0_82] : memref<512x128xbf16, #tpu.memory_space<vmem>>, vector<512x128xbf16>
    %cst_83 = arith.constant dense<0.000000e+00> : vector<8x128xf32>
    %223 = tpu.matmul %221, %222, %cst_83 {dimension_numbers = #tpu.dot_dimension_numbers<[1], [0], [0], [1], [0, 0, 1, 1], [], []>} : vector<8x512xbf16>, vector<512x128xbf16>, vector<8x128xf32> -> vector<8x128xf32>
    %c0_84 = arith.constant 0 : index
    %c0_85 = arith.constant 0 : index
    %224 = vector.load %arg11[%c0_84, %c0_85] : memref<1x128xf32, #tpu.memory_space<vmem>>, vector<1x128xf32>
    %225 = vector.broadcast %224 : vector<1x128xf32> to vector<8x128xf32>
    %226 = arith.addf %223, %225 : vector<8x128xf32>
    %227 = arith.addf %212, %226 : vector<8x128xf32>
    %cst_86 = arith.constant dense<0.000000e+00> : vector<8xf32>
    %228 = vector.multi_reduction <add>, %227, %cst_86 [1] : vector<8x128xf32> to vector<8xf32>
    %229 = vector.shape_cast %228 : vector<8xf32> to vector<8x1xf32>
    %cst_87 = arith.constant 1.280000e+02 : f32
    %230 = vector.broadcast %cst_87 : f32 to vector<8x1xf32>
    %231 = arith.divf %229, %230 : vector<8x1xf32>
    %232 = vector.broadcast %231 : vector<8x1xf32> to vector<8x128xf32>
    %233 = arith.subf %227, %232 : vector<8x128xf32>
    %234 = arith.mulf %233, %233 : vector<8x128xf32>
    %cst_88 = arith.constant dense<0.000000e+00> : vector<8xf32>
    %235 = vector.multi_reduction <add>, %234, %cst_88 [1] : vector<8x128xf32> to vector<8xf32>
    %236 = vector.shape_cast %235 : vector<8xf32> to vector<8x1xf32>
    %cst_89 = arith.constant 1.280000e+02 : f32
    %237 = vector.broadcast %cst_89 : f32 to vector<8x1xf32>
    %238 = arith.divf %236, %237 : vector<8x1xf32>
    %239 = vector.broadcast %231 : vector<8x1xf32> to vector<8x128xf32>
    %240 = arith.subf %227, %239 : vector<8x128xf32>
    %cst_90 = arith.constant 9.99999974E-6 : f32
    %241 = vector.broadcast %cst_90 : f32 to vector<8x1xf32>
    %242 = arith.addf %238, %241 : vector<8x1xf32>
    %243 = math.rsqrt %242 : vector<8x1xf32>
    %244 = vector.broadcast %243 : vector<8x1xf32> to vector<8x128xf32>
    %245 = arith.mulf %240, %244 : vector<8x128xf32>
    %c0_91 = arith.constant 0 : index
    %c0_92 = arith.constant 0 : index
    %246 = vector.load %arg12[%c0_91, %c0_92] : memref<1x128xf32, #tpu.memory_space<vmem>>, vector<1x128xf32>
    %247 = vector.broadcast %246 : vector<1x128xf32> to vector<8x128xf32>
    %248 = arith.mulf %245, %247 : vector<8x128xf32>
    %c0_93 = arith.constant 0 : index
    %c0_94 = arith.constant 0 : index
    %249 = vector.load %arg13[%c0_93, %c0_94] : memref<1x128xf32, #tpu.memory_space<vmem>>, vector<1x128xf32>
    %250 = vector.broadcast %249 : vector<1x128xf32> to vector<8x128xf32>
    %251 = arith.addf %248, %250 : vector<8x128xf32>
    %c0_95 = arith.constant 0 : index
    %c0_96 = arith.constant 0 : index
    %c0_97 = arith.constant 0 : index
    %252 = vector.load %arg14[%c0_95, %c0_96, %c0_97] : memref<1x8x128xf32, #tpu.memory_space<vmem>>, vector<1x8x128xf32>
    %253 = vector.shape_cast %252 : vector<1x8x128xf32> to vector<8x128xf32>
    %254 = vector.shape_cast %251 : vector<8x128xf32> to vector<1x8x128xf32>
    tpu.vector_store %arg14[%c0_95, %c0_96, %c0_97], %254 {strides = array<i32>} : memref<1x8x128xf32, #tpu.memory_space<vmem>>, vector<1x8x128xf32>,
    return
  }
  func.func @transform_0(%arg0: i32) -> (i32, i32, i32) {
    %c0_i32 = arith.constant 0 : i32
    %c0_i32_0 = arith.constant 0 : i32
    %c0_i32_1 = arith.constant 0 : i32
    return %arg0, %c0_i32, %c0_i32_0 : i32, i32, i32
  }
  func.func @transform_1(%arg0: i32) -> (i32, i32) {
    %c0_i32 = arith.constant 0 : i32
    %c0_i32_0 = arith.constant 0 : i32
    %c0_i32_1 = arith.constant 0 : i32
    return %c0_i32, %c0_i32_0 : i32, i32
  }
  func.func @transform_2(%arg0: i32) -> (i32, i32) {
    %c0_i32 = arith.constant 0 : i32
    %c0_i32_0 = arith.constant 0 : i32
    %c0_i32_1 = arith.constant 0 : i32
    return %c0_i32, %c0_i32_0 : i32, i32
  }
  func.func @transform_3(%arg0: i32) -> (i32, i32) {
    %c0_i32 = arith.constant 0 : i32
    %c0_i32_0 = arith.constant 0 : i32
    %c0_i32_1 = arith.constant 0 : i32
    return %c0_i32, %c0_i32_0 : i32, i32
  }
  func.func @transform_4(%arg0: i32) -> (i32, i32) {
    %c0_i32 = arith.constant 0 : i32
    %c0_i32_0 = arith.constant 0 : i32
    %c0_i32_1 = arith.constant 0 : i32
    return %c0_i32, %c0_i32_0 : i32, i32
  }
  func.func @transform_5(%arg0: i32) -> (i32, i32) {
    %c0_i32 = arith.constant 0 : i32
    %c0_i32_0 = arith.constant 0 : i32
    %c0_i32_1 = arith.constant 0 : i32
    return %c0_i32, %c0_i32_0 : i32, i32
  }
  func.func @transform_6(%arg0: i32) -> (i32, i32) {
    %c0_i32 = arith.constant 0 : i32
    %c0_i32_0 = arith.constant 0 : i32
    %c0_i32_1 = arith.constant 0 : i32
    return %c0_i32, %c0_i32_0 : i32, i32
  }
  func.func @transform_7(%arg0: i32) -> (i32, i32) {
    %c0_i32 = arith.constant 0 : i32
    %c0_i32_0 = arith.constant 0 : i32
    %c0_i32_1 = arith.constant 0 : i32
    return %c0_i32, %c0_i32_0 : i32, i32
  }
  func.func @transform_8(%arg0: i32) -> (i32, i32) {
    %c0_i32 = arith.constant 0 : i32
    %c0_i32_0 = arith.constant 0 : i32
    %c0_i32_1 = arith.constant 0 : i32
    return %c0_i32, %c0_i32_0 : i32, i32
  }
  func.func @transform_9(%arg0: i32) -> (i32, i32) {
    %c0_i32 = arith.constant 0 : i32
    %c0_i32_0 = arith.constant 0 : i32
    %c0_i32_1 = arith.constant 0 : i32
    return %c0_i32, %c0_i32_0 : i32, i32
  }
  func.func @transform_10(%arg0: i32) -> (i32, i32) {
    %c0_i32 = arith.constant 0 : i32
    %c0_i32_0 = arith.constant 0 : i32
    %c0_i32_1 = arith.constant 0 : i32
    return %c0_i32, %c0_i32_0 : i32, i32
  }
  func.func @transform_11(%arg0: i32) -> (i32, i32) {
    %c0_i32 = arith.constant 0 : i32
    %c0_i32_0 = arith.constant 0 : i32
    %c0_i32_1 = arith.constant 0 : i32
    return %c0_i32, %c0_i32_0 : i32, i32
  }
  func.func @transform_12(%arg0: i32) -> (i32, i32) {
    %c0_i32 = arith.constant 0 : i32
    %c0_i32_0 = arith.constant 0 : i32
    %c0_i32_1 = arith.constant 0 : i32
    return %c0_i32, %c0_i32_0 : i32, i32
  }
  func.func @transform_13(%arg0: i32) -> (i32, i32, i32) {
    %c0_i32 = arith.constant 0 : i32
    %c0_i32_0 = arith.constant 0 : i32
    %c0_i32_1 = arith.constant 0 : i32
    return %arg0, %c0_i32, %c0_i32_0 : i32, i32, i32
  }
}

</mosaic_0001>

<bundles_post_ra>
// kernel: _lambda_.3
= control target key start
LH: loop header
LB: loop body
LE: loop exit
PB: predicated region body
PF: predicated region fallthrough
CT: control target
= control target key end

     0   :  { %s377_s15 = smov 0   ;;  %s403_s0 = inlined_call_operand.vmem [shape: f32[2,8,16], index: 0, kind: input, shape index: {}]   ;;  %s404_s1 = inlined_call_operand.vmem [shape: bf16[16,128], index: 1, kind: input, shape index: {}]   ;;  %s405_s2 = inlined_call_operand.vmem [shape: f32[1,128], index: 2, kind: input, shape index: {}]   ;;  %s406_s3 = inlined_call_operand.vmem [shape: f32[8,128], index: 3, kind: input, shape index: {}]   ;;  %s407_s4 = inlined_call_operand.vmem [shape: f32[2,8,128], index: 4, kind: output, shape index: {}]  }
   0x1 LB: > { %s311_s16 = sadd.s32 4294967295, %s348_s15   ;;  %p315_p0 = scmp.ge.s32.totalorder %s348_s15, 1  ;;  %s348_s15 = sphi %s377_s15, %s14_s15  }
   0x2   : > { %p161_p1 = scmp.lt.s32.totalorder %s348_s15, 3 }
   0x4   : > { %p162_p2 = pnand %p315_p0, %p161_p1 }
   0x5   : > { %p185_p3 = scmp.lt.s32.totalorder (!%p162_p2), %s311_s16, 1 }
   0x6   : > { %165 = sbr.rel (%p162_p2) target bundleno = 216 (0xd8), region = 36 }
   0xb   : > { %v341_v0 = vld [vmem:[%s404_s1] sm:$0xff]   ;;  %v350_v1 = vmov 0.0   ;;  %vm351_vm0 = vmmov 0   ;;  %s409_s16 = smov (!%p185_p3, %s311_s16), 1  ;;  %vm211_vm1 = vcmask 130048  }
   0xc   : > { %325 = vmatprep.subr.bf16.mxu0 %v350_v1  ;;  %327 = vmatprep.mubr.msk.bf16.mxu0 %vm351_vm0, %v350_v1  ;;  %s316_s19 = sshll.u32 %s409_s16, 3  ;;  %v318_v4 = vld [vmem:[%s405_s2] ss:$0 sm:$0xff] }
   0xd   : > { %326 = vmatpush3.bf16.msra.mxu0 %v341_v0  ;;  %s188_s22 = scalar_lea.vmem %s403_s0, %s316_s19  ;;  %v255_v6 = vld [vmem:[%s406_s3] sm:$0xff]  ;;  %s192_s29 = scalar_lea.vmem %s407_s4, %s316_s19 }
   0xe   : > { %v194_v2 = vld [vmem:[%s188_s22] sm:$0xff] }
   0xf   : > { %v195_v3 = vpack.c.bf16 %v194_v2, %v194_v2 }
  0x11   : > { %328 = vmatmul.mubr.msk.bf16.vlgmr.msra.gmra.mxu0 %vm211_vm1, %v195_v3 }
  0xd1   : > { %v249_v5 = vpop.f32.mrf.mxu0 }
  0xd2   : > { %v250_v7 = vadd.f32 %v318_v4, %v249_v5 }
  0xd3   : > { %v329_v8 = vpop.f32.mrf.mxu0 }
  0xd4   : > { %v256_v9 = vadd.f32 %v255_v6, %v250_v7 }
  0xd5   : > { %v252_v10 = vpop.f32.mrf.mxu0 }
  0xd6   : > { %257 = vst [vmem:[%s192_s29] sm:$0xff] %v256_v9 }
  0xd7   : > { %v330_v11 = vpop.f32.mrf.mxu0 }
  0xd8 PF: > { %s14_s15 = sadd.s32 1, %s348_s15  }
  0xd9   : > { %p11_p4 = scmp.ge.s32.totalorder %s14_s15, 4  }
  0xdb   :  { %13 = sbr.rel (!%p11_p4) target bundleno = 1 (0x1), region = 66 }

// kernel: _lambda_.4
= control target key start
LH: loop header
LB: loop body
LE: loop exit
PB: predicated region body
PF: predicated region fallthrough
CT: control target
= control target key end

     0   :  { %18 = vsyncpa [#allocation3], 0  ;;  %s4425_s0 = inlined_call_operand.vmem [shape: f32[2,8,128], index: 0, kind: input, shape index: {}]   ;;  %s4426_s1 = inlined_call_operand.hbm [shape: bf16[128,384], index: 1, kind: input, shape index: {}]   ;;  %s4427_s2 = inlined_call_operand.vmem [shape: f32[1,384], index: 2, kind: input, shape index: {}]   ;;  %s4428_s3 = inlined_call_operand.vmem [shape: bf16[128,128], index: 3, kind: input, shape index: {}]   ;;  %s4429_s4 = inlined_call_operand.vmem [shape: f32[1,128], index: 4, kind: input, shape index: {}]   ;;  %s4430_s5 = inlined_call_operand.vmem [shape: f32[1,128], index: 5, kind: input, shape index: {}]   ;;  %s4431_s6 = inlined_call_operand.vmem [shape: f32[1,128], index: 6, kind: input, shape index: {}]   ;;  %s4432_s7 = inlined_call_operand.hbm [shape: bf16[128,512], index: 7, kind: input, shape index: {}]   ;;  %s4433_s8 = inlined_call_operand.vmem [shape: f32[1,512], index: 8, kind: input, shape index: {}]   ;;  %s4434_s9 = inlined_call_operand.hbm [shape: bf16[512,128], index: 9, kind: input, shape index: {}]   ;;  %s4435_s10 = inlined_call_operand.vmem [shape: f32[1,128], index: 10, kind: input, shape index: {}]   ;;  %s4436_s11 = inlined_call_operand.vmem [shape: f32[1,128], index: 11, kind: input, shape index: {}]   ;;  %s4437_s12 = inlined_call_operand.vmem [shape: f32[1,128], index: 12, kind: input, shape index: {}]   ;;  %s4438_s13 = inlined_call_operand.vmem [shape: f32[2,8,128], index: 13, kind: output, shape index: {}]  }
   0x1   :  { %19 = vsyncpa [#allocation5], 0  ;;  %s4079_s25 = smov 0  }
   0x2 LB: > { %s3990_s26 = smov [#allocation4]   ;;  %s4085_s28 = sadd.s32 4294967295, %s3988_s25   ;;  %s3988_s25 = sphi %s4079_s25, %s25_s25  }
   0x3   : > { %s374_s27 = sshll.u32 %s3990_s26, 4  ;;  %p3289_p0 = scmp.ge.s32.totalorder %s3988_s25, 1  ;;  %s375_s27 = int_to_ptr.vmem [resolvable:$true] %s374_s27 }
   0x4   : > { %p334_p1 = scmp.lt.s32.totalorder %s3988_s25, 3  ;;  %p3707_p2 = scmp.eq.s32.totalorder %s4085_s28, 0 }
   0x5   : > { %s3991_s30 = smov [#allocation2]   ;;  %s3992_s16 = smov [#allocation6]  }
   0x6   : > { %p4090_p3 = pnand %p3289_p0, %p334_p1  ;;  %s346_s14 = sshll.u32 %s3991_s30, 4  ;;  %s4096_s14 = int_to_ptr.vmem [resolvable:$true] %s346_s14 }
   0x7   : > { %s4104_s17 = sshll.u32 %s3992_s16, 4  ;;  %s3907_s18 = scalar_lea.vmem %s375_s27, 4096  ;;  %s391_s17 = int_to_ptr.vmem [resolvable:$true] %s4104_s17 }
   0x8   : > { %p3697_p4 = pneg %p4090_p3  ;;  %p3908_p7 = scmp.ne.s32.totalorder %s375_s27, %s3907_s18 }
   0x9   : > { %p3915_p10 = scmp.lt.s32.totalorder %s375_s27, %s375_s27  ;;  %p3916_p11 = scmp.lt.s32.totalorder %s3907_s18, %s3907_s18 }
   0xa   : > { %p4100_p5 = pnand %p3707_p2, %p3697_p4 }
   0xb   : > { %p3917_p12 = por %p3916_p11, %p3915_p10 }
   0xc   : > { %p3898_p6 = pneg %p4100_p5 }
   0xe   : > { %p3910_p8 = pnand %p3908_p7, %p3898_p6 }
  0x10   : > { %p3911_p9 = pneg %p3910_p8 }
  0x12   : > { %p3918_p13 = pnand %p3917_p12, %p3911_p9 }
  0x14   : > { %3921 = shalt.err (!%p3918_p13)
}
  0x15   : > { %s3993_s19 = smov 256   ;;  %s3994_s20 = smov 16  }
  0x16   : > { %3703 = dma.hbm_to_vmem [thread:$0]  (!%p4100_p5), %s4432_s7, 4096, %s375_s27, [#allocation5], %s3993_s19, %s3993_s19, %s3994_s20  }
  0x17   : > { %s3933_s23 = scalar_lea.vmem %s4096_s14, 3072  ;;  %p3941_p7 = scmp.lt.s32.totalorder %s4096_s14, %s4096_s14 }
  0x18   : > { %p3934_p0 = scmp.ne.s32.totalorder %s4096_s14, %s3933_s23  ;;  %p3942_p8 = scmp.lt.s32.totalorder %s3933_s23, %s3933_s23 }
  0x1a   : > { %p3936_p1 = pnand %p3934_p0, %p3898_p6  ;;  %p3943_p9 = por %p3942_p8, %p3941_p7 }
  0x1c   : > { %p3937_p4 = pneg %p3936_p1 }
  0x1e   : > { %p3944_p10 = pnand %p3943_p9, %p3937_p4 }
  0x20   : > { %3947 = shalt.err (!%p3944_p10)
}
  0x21   : > { %s3995_s24 = smov 192   ;;  %s3996_s26 = smov 12  }
  0x22   : > { %3700 = dma.hbm_to_vmem [thread:$0]  (!%p4100_p5), %s4426_s1, 3072, %s4096_s14, [#allocation3], %s3995_s24, %s3995_s24, %s3996_s26  }
  0x23   : > { %s3959_s16 = scalar_lea.vmem %s391_s17, 4096  ;;  %p3967_p0 = scmp.lt.s32.totalorder %s391_s17, %s391_s17 }
  0x24   : > { %p3960_p11 = scmp.ne.s32.totalorder %s391_s17, %s3959_s16  ;;  %p3968_p1 = scmp.lt.s32.totalorder %s3959_s16, %s3959_s16 }
  0x26   : > { %p3962_p12 = pnand %p3960_p11, %p3898_p6  ;;  %p3969_p4 = por %p3968_p1, %p3967_p0 }
  0x28   : > { %p3963_p13 = pneg %p3962_p12 }
  0x2a   : > { %p3970_p7 = pnand %p3969_p4, %p3963_p13 }
  0x2c   : > { %3973 = shalt.err (!%p3970_p7)
}
  0x2d   : > { %s3997_s18 = smov 64   ;;  %s3998_s19 = smov 4  }
  0x2e   : > { %3706 = dma.hbm_to_vmem [thread:$0]  (!%p4100_p5), %s4434_s9, 4096, %s391_s17, [#allocation5], %s3997_s18, %s3997_s18, %s3998_s19  }
  0x2f   : > { %422 = sbr.rel (%p4090_p3) target bundleno = 5590 (0x15d6), region = 72 }
  0x34   : > { %3979 = dma.done.wait (%p3707_p2), [#allocation3], 3072  }
  0x35   : > { %3981 = vsyncadd (%p3707_p2), [#allocation3], 4294964224 }
  0x36   : > { %3983 = dma.done.wait (%p3707_p2), [#allocation5], 8192  }
  0x37   : > { %3985 = vsyncadd (%p3707_p2), [#allocation5], 4294959104  ;;  %v3999_v0 = vmov 0   ;;  %v3740_v1 = vld [vmem:[#allocation2 + $0xac] ss:$12 sps:$4 sm:$0xff]   ;;  %p472_p3 = scmp.lt.s32.totalorder %s4085_s28, 1  ;;  %v517_v20 = vlaneseq }
  0x38   : > { %692 = vmatprep.mubr.bf16.mxu0 %v3999_v0  ;;  %v3742_v2 = vld [vmem:[#allocation2 + $0xa8] ss:$12 sps:$4 sm:$0xff]   ;;  %660 = vmatprep.subr.bf16.mxu0 %v3740_v1  ;;  %v3745_v4 = vld [vmem:[#allocation2 + $0x90] ss:$12 sps:$4 sm:$0xff]   ;;  %v3748_v6 = vld [vmem:[#allocation2 + $0x78] ss:$12 sps:$4 sm:$0xff]  }
  0x39   : > { %v3743_v3 = vld [vmem:[#allocation2 + $0x94] ss:$12 sps:$4 sm:$0xff]   ;;  %661 = vmatpush1.bf16.msra.mxu0 %v3742_v2  ;;  %v3746_v5 = vld [vmem:[#allocation2 + $0x7c] ss:$12 sps:$4 sm:$0xff]   ;;  %s4442_s28 = smov (!%p472_p3, %s4085_s28), 1  ;;  %v4000_v19 = vmov 0.0  }
  0x3a   : > { %662 = vmatprep.subr.bf16.mxu0 %v3743_v3  ;;  %v3749_v7 = vld [vmem:[#allocation2 + $0x64] ss:$12 sps:$4 sm:$0xff]   ;;  %v3751_v8 = vld [vmem:[#allocation2 + $0x60] ss:$12 sps:$4 sm:$0xff]   ;;  %s3298_s29 = sshll.u32 %s4442_s28, 3  ;;  %3537 = vmatprep.subr.bf16.mxu1 %v4000_v19  ;;  %vm4001_vm0 = vmmov 0  }
  0x3b   : > { %v3752_v9 = vld [vmem:[#allocation2 + $0x4c] ss:$12 sps:$4 sm:$0xff]   ;;  %v3754_v10 = vld [vmem:[#allocation2 + $0x48] ss:$12 sps:$4 sm:$0xff]   ;;  %v3757_v12 = vld [vmem:[#allocation2 + $0x30] ss:$12 sps:$4 sm:$0xff]   ;;  %s475_s17 = scalar_lea.vmem %s4425_s0, %s3298_s29  ;;  %3553 = vmatprep.mubr.msk.bf16.mxu1 %vm4001_vm0, %v4000_v19 }
  0x3c   : > { %v3755_v11 = vld [vmem:[#allocation2 + $0x34] ss:$12 sps:$4 sm:$0xff]   ;;  %v3758_v13 = vld [vmem:[#allocation2 + $0x1c] ss:$12 sps:$4 sm:$0xff]   ;;  %v3760_v14 = vld [vmem:[#allocation2 + $0x18] ss:$12 sps:$4 sm:$0xff]  }
  0x3d   : > { %663 = vmatpush1.bf16.msra.mxu0 %v3745_v4  ;;  %v3761_v15 = vld [vmem:[#allocation2 + $0x4] ss:$12 sps:$4 sm:$0xff]   ;;  %v3763_v16 = vld [vmem:[#allocation2] ss:$12 sps:$4 sm:$0xff]   ;;  %v4169_v21 = vshrl.u32 %v517_v20, 7  ;;  %vm741_vm1 = vcmask 130048  }
  0x3e   : > { %664 = vmatprep.subr.bf16.mxu0 %v3746_v5  ;;  %v4159_v17 = vld [vmem:[%s475_s17] sm:$0xff]  ;;  %s4002_s24 = smov 112   ;;  %v3764_v33 = vld [vmem:[#allocation2 + $0xb0] ss:$12 sps:$4 sm:$0xff]   ;;  %v3767_v36 = vld [vmem:[#allocation2 + $0x68] ss:$12 sps:$4 sm:$0xff]   ;;  %s479_s17 = scalar_lea.vmem %s4438_s13, %s3298_s29 }
  0x3f   : > { %v482_v18 = vpack.c.bf16 %v4159_v17, %v4159_v17  ;;  %v523_v22 = vsub.s32 1, %v4169_v21  ;;  %v4175_v23 = vld [vmem:[%s4427_s2] sm:$0x7]  ;;  %v519_v24 = vsub.s32 0, %v4169_v21  ;;  %3538 = vmatpush3.bf16.msra.mxu1 %v3764_v33  ;;  %v3765_v34 = vld [vmem:[#allocation2 + $0x98] ss:$12 sps:$4 sm:$0xff]  }
  0x40   : > { %3539 = vmatprep.subr.bf16.mxu1 %v4000_v19  ;;  %v3766_v35 = vld [vmem:[#allocation2 + $0x80] ss:$12 sps:$4 sm:$0xff]   ;;  %v3768_v37 = vld [vmem:[#allocation2 + $0x50] ss:$12 sps:$4 sm:$0xff]   ;;  %v3769_v38 = vld [vmem:[#allocation2 + $0x38] ss:$12 sps:$4 sm:$0xff]  }
  0x41   : > { %665 = vmatpush1.bf16.msra.mxu0 %v3748_v6  ;;  %v524_v25 = vrot.slane %v4175_v23, %v523_v22  ;;  %v520_v27 = vrot.slane %v4175_v23, %v519_v24  ;;  %v3770_v39 = vld [vmem:[#allocation2 + $0x20] ss:$12 sps:$4 sm:$0xff]   ;;  %v3771_v40 = vld [vmem:[#allocation2 + $0x8] ss:$12 sps:$4 sm:$0xff]   ;;  %vm819_vm2 = vcmask 64512   ;;  %v527_v54 = vsub.s32 2, %v4169_v21 }
  0x42   : > { %666 = vmatprep.subr.bf16.mxu0 %v3749_v7  ;;  %s4003_s26 = smov 96   ;;  %s4004_s19 = smov 80  }
  0x43   : > { %3540 = vmatpush3.bf16.msra.mxu1 %v3765_v34  ;;  %v528_v56 = vrot.slane %v4175_v23, %v527_v54  ;;  %s4005_s20 = smov 64   ;;  %s4006_s22 = smov 48  }
  0x44   : > { %3541 = vmatprep.subr.bf16.mxu1 %v4000_v19  ;;  %s4007_s23 = smov 32   ;;  %s4008_s16 = smov 16  }
  0x45   : > { %667 = vmatpush1.bf16.msra.mxu0 %v3751_v8  ;;  %v3773_v8 = vld [vmem:[%s4428_s3 + $0x8] sm:$0xff]  }
  0x46   : > { %668 = vmatprep.subr.bf16.mxu0 %v3752_v9 }
  0x47   : > { %3542 = vmatpush3.bf16.msra.mxu1 %v3766_v35 }
  0x48   : > { %3543 = vmatprep.subr.bf16.mxu1 %v4000_v19 }
  0x49   : > { %669 = vmatpush1.bf16.msra.mxu0 %v3754_v10 }
  0x4a   : > { %670 = vmatprep.subr.bf16.mxu0 %v3755_v11 }
  0x4b   : > { %3544 = vmatpush3.bf16.msra.mxu1 %v3767_v36 }
  0x4c   : > { %3545 = vmatprep.subr.bf16.mxu1 %v4000_v19 }
  0x4d   : > { %671 = vmatpush1.bf16.msra.mxu0 %v3757_v12  ;;  %v3772_v12 = vld [vmem:[%s4428_s3] sm:$0xff]  }
  0x4e   : > { %672 = vmatprep.subr.bf16.mxu0 %v3758_v13 }
  0x4f   : > { %3546 = vmatpush3.bf16.msra.mxu1 %v3768_v37 }
  0x50   : > { %3547 = vmatprep.subr.bf16.mxu1 %v4000_v19 }
  0x51   : > { %673 = vmatpush1.bf16.msra.mxu0 %v3760_v14 }
  0x52   : > { %674 = vmatprep.subr.bf16.mxu0 %v3761_v15 }
  0x53   : > { %3548 = vmatpush3.bf16.msra.mxu1 %v3769_v38 }
  0x54   : > { %3549 = vmatprep.subr.bf16.mxu1 %v4000_v19 }
  0x55   : > { %675 = vmatpush1.bf16.msra.mxu0 %v3763_v16 }
  0x56   : > { %3557 = vmatprep.subr.mxu0 %v4000_v19 }
  0x57   : > { %3550 = vmatpush3.bf16.msra.mxu1 %v3770_v39 }
  0x58   : > { %693 = vmatmul.mubr.bf16.vlgmr.msra.gmra.mxu0 %v482_v18  ;;  %3551 = vmatprep.subr.bf16.mxu1 %v4000_v19 }
  0x59   : > { %3559 = vmatprep.mubr.msk.f32.mxu0 %vm4001_vm0, %v4000_v19 }
  0x5b   : > { %3552 = vmatpush3.bf16.msra.mxu1 %v3771_v40 }
  0x5c   : > { %3562 = vmatprep.subr.mxu1 %v4000_v19 }
  0x5e   : > { %3554 = vmatmul.mubr.bf16.vlgmr.msra.gmra.mxu1 %v482_v18 }
  0x5f   : > { %3564 = vmatprep.mubr.msk.f32.mxu1 %vm4001_vm0, %v4000_v19 }
 0x118   : > { %v694_v26 = vpop.f32.mrf.mxu0 }
 0x119   : > { %v4190_v31 = vadd.f32 %v694_v26, %v520_v27 }
 0x11a   : > { %v696_v28 = vpop.f32.mrf.mxu0 }
 0x11b   : > { %v4184_v29 = vadd.f32 %v696_v28, %v524_v25 }
 0x11c   : > { %v698_v30 = vpop.f32.mrf.mxu0 }
 0x11d   : > { %909 = vrot.lane.b32.xlu0 %v4184_v29, %s4002_s24  ;;  %3558 = vmatpush3.xpose.msk.msra.mxu0 %vm741_vm1, %v4184_v29 }
 0x11e   : > { %v699_v32 = vpop.f32.mrf.mxu0  ;;  %3567 = vmatprep.subr.mxu0 %v4000_v19  ;;  %v735_v55 = vpop.f32.mrf.mxu1 }
 0x11f   : > { %v4220_v58 = vadd.f32 %v735_v55, %v528_v56 }
 0x120   : > { %3560 = vmatmul.mubr.msk.f32.vlgmr.msra.gmra.mxu0 %vm741_vm1, %v4190_v31  ;;  %v3555_v57 = vpop.f32.mrf.mxu1 }
 0x121   : > { %907 = vrot.lane.b32.xlu0 %v4190_v31, %s4002_s24  ;;  %3569 = vmatprep.mubr.msk.f32.mxu0 %vm4001_vm0, %v4000_v19 }
 0x122   : > { %v738_v59 = vpop.f32.mrf.mxu1  ;;  %3563 = vmatpush3.msra.mxu1 %v4220_v58 }
 0x123   : > { %3572 = vmatprep.subr.mxu1 %v4000_v19 }
 0x124   : > { %v3556_v60 = vpop.f32.mrf.mxu1 }
 0x18f   : > { %v910_v41 = vpop.permute.xlu0 %909 }
 0x190   : > { %3568 = vmatpush3.xpose.msk.msra.mxu0 %vm741_vm1, %v910_v41 }
 0x191   : > { %3577 = vmatprep.subr.bf16.mxu0 %v4000_v19 }
 0x193   : > { %v908_v42 = vpop.permute.xlu0 %907 }
 0x194   : > { %3570 = vmatmul.mubr.msk.f32.vlgmr.msra.gmra.mxu0 %vm741_vm1, %v908_v42 }
 0x195   : > { %3579 = vmatprep.mubr.msk.bf16.mxu0 %vm4001_vm0, %v4000_v19  ;;  %3578 = vmatpush3.bf16.msra.mxu0 %v3773_v8 }
 0x196   : > { %3589 = vmatprep.subr.mxu0 %v4000_v19 }
 0x1e0   : > { %v814_v43 = vpop.f32.mrf.mxu0 }
 0x1e1   : > { %v818_v44 = vmul.f32 0.25, %v814_v43 }
 0x1e2   : > { %v3561_v45 = vpop.f32.mrf.mxu0 }
 0x1e3   : > { %v820_v46 = vsel %vm819_vm2, %v818_v44, -inf }
 0x1e4   : > { %821 = vmax.xlane.f32.xlu1 %v820_v46 }
 0x254   : > { %v981_v47 = vpop.f32.mrf.mxu0 }
 0x255   : > { %v985_v48 = vmul.f32 0.25, %v981_v47 }
 0x256   : > { %v3571_v49 = vpop.f32.mrf.mxu0 }
 0x257   : > { %v986_v50 = vsel %vm819_vm2, %v985_v48, -inf }
 0x258   : > { %987 = vmax.xlane.f32.xlu1 %v986_v50 }
 0x26d   : > { %v822_v51 = vpop.xlane.xlu1 %821 }
 0x26e   : > { %v823_v52 = vsub.f32 %v818_v44, %v822_v51 }
 0x270   : > { %v824_v53 = vmul.f32 1.442695, %v823_v52 }
 0x272   : > { %3860 = vpow2.f32 %v824_v53  ;;  %v3774_v53 = vld [vmem:[%s4428_s3 + $0x10] sm:$0xff]  }
 0x27f   : > { %v3861_v61 = vpop.eup %3860 }
 0x280   : > { %v826_v62 = vsel %vm819_vm2, %v3861_v61, 0.0 }
 0x281   : > { %827 = vadd.xlane.f32.xlu0 %v826_v62 }
 0x297   : > { %1265 = vrot.lane.b32.xlu0 %v4220_v58, %s4003_s26 }
 0x2e1   : > { %v988_v63 = vpop.xlane.xlu1 %987 }
 0x2e2   : > { %v989_v1 = vsub.f32 %v985_v48, %v988_v63 }
 0x2e4   : > { %v990_v2 = vmul.f32 1.442695, %v989_v1 }
 0x2e6   : > { %3862 = vpow2.f32 %v990_v2 }
 0x2f3   : > { %v3863_v3 = vpop.eup %3862 }
 0x2f4   : > { %v992_v4 = vsel %vm819_vm2, %v3863_v3, 0.0 }
 0x2f5   : > { %993 = vadd.xlane.f32.xlu1 %v992_v4 }
 0x306   : > { %998 = vrot.lane.b32.xlu1 %v4220_v58, %s4002_s24 }
 0x30a   : > { %v828_v5 = vpop.xlane.xlu0 %827  ;;  %1177 = vrot.lane.b32.xlu1 %v4184_v29, %s4003_s26 }
 0x30b   : > { %3864 = vrcp.f32 %v828_v5 }
 0x30e   : > { %1175 = vrot.lane.b32.xlu1 %v4190_v31, %s4003_s26  ;;  %v1266_v18 = vpop.permute.xlu0 %1265 }
 0x318   : > { %v3865_v6 = vpop.eup %3864 }
 0x319   : > { %v830_v7 = vmul.f32 %v3865_v6, %v3861_v61 }
 0x31b   : > { %3565 = vmatmul.mubr.msk.f32.vlgmr.msra.gmra.mxu1 %vm819_vm2, %v830_v7 }
 0x31c   : > { %3574 = vmatprep.mubr.msk.f32.mxu1 %vm4001_vm0, %v4000_v19 }
 0x37e   : > { %v994_v9 = vpop.xlane.xlu1 %993 }
 0x37f   : > { %3866 = vrcp.f32 %v994_v9 }
 0x382   : > { %v999_v10 = vpop.permute.xlu1 %998 }
 0x383   : > { %3573 = vmatpush3.msra.mxu1 %v999_v10 }
 0x384   : > { %3583 = vmatprep.subr.bf16.mxu1 %v4000_v19 }
 0x386   : > { %v1178_v26 = vpop.permute.xlu1 %1177 }
 0x38a   : > { %v1176_v27 = vpop.permute.xlu1 %1175 }
 0x38c   : > { %v3867_v11 = vpop.eup %3866 }
 0x38d   : > { %v996_v13 = vmul.f32 %v3867_v11, %v3863_v3 }
 0x38f   : > { %3575 = vmatmul.mubr.msk.f32.vlgmr.msra.gmra.mxu1 %vm819_vm2, %v996_v13 }
 0x390   : > { %3584 = vmatpush3.bf16.msra.mxu1 %v3772_v12  ;;  %3585 = vmatprep.mubr.msk.bf16.mxu1 %vm4001_vm0, %v4000_v19 }
 0x391   : > { %3594 = vmatprep.subr.mxu1 %v4000_v19 }
 0x3db   : > { %v900_v14 = vpop.f32.mrf.mxu1 }
 0x3dc   : > { %v904_v15 = vpack.c.bf16 %v900_v14, %v900_v14 }
 0x3dd   : > { %v3566_v16 = vpop.f32.mrf.mxu1 }
 0x3de   : > { %3586 = vmatmul.mubr.msk.bf16.vlgmr.msra.gmra.mxu1 %vm741_vm1, %v904_v15 }
 0x3df   : > { %3595 = vmatpush3.msra.mxu1 %v1266_v18  ;;  %3596 = vmatprep.mubr.msk.f32.mxu1 %vm4001_vm0, %v4000_v19  ;;  %v3775_v18 = vld [vmem:[%s4428_s3 + $0x18] sm:$0xff]  }
 0x3e0   : > { %3605 = vmatprep.subr.mxu1 %v4000_v19 }
 0x44f   : > { %v1070_v20 = vpop.f32.mrf.mxu1 }
 0x450   : > { %v1074_v23 = vpack.c.bf16 %v1070_v20, %v1070_v20 }
 0x451   : > { %v3576_v25 = vpop.f32.mrf.mxu1 }
 0x452   : > { %3580 = vmatmul.mubr.msk.bf16.vlgmr.msra.gmra.mxu0 %vm741_vm1, %v1074_v23 }
 0x453   : > { %3590 = vmatpush3.xpose.msk.msra.mxu0 %vm741_vm1, %v1178_v26  ;;  %3591 = vmatprep.mubr.msk.f32.mxu0 %vm4001_vm0, %v4000_v19 }
 0x454   : > { %3599 = vmatprep.subr.bf16.mxu0 %v4000_v19 }
 0x45a   : > { %3592 = vmatmul.mubr.msk.f32.vlgmr.msra.gmra.mxu0 %vm741_vm1, %v1176_v27 }
 0x45b   : > { %3601 = vmatprep.mubr.msk.bf16.mxu0 %vm4001_vm0, %v4000_v19  ;;  %3600 = vmatpush3.bf16.msra.mxu0 %v3774_v53 }
 0x45c   : > { %3615 = vmatprep.subr.bf16.mxu0 %v4000_v19 }
 0x49e   : > { %v4258_v28 = vpop.f32.mrf.mxu1 }
 0x4a0   : > { %v3587_v30 = vpop.f32.mrf.mxu1 }
 0x4a2   : > { %v1172_v32 = vpop.f32.mrf.mxu1 }
 0x4a4   : > { %v3588_v33 = vpop.f32.mrf.mxu1 }
 0x512   : > { %v1120_v34 = vpop.f32.mrf.mxu0 }
 0x513   : > { %v1170_v5 = vadd.f32 %v4258_v28, %v1120_v34 }
 0x514   : > { %v3581_v35 = vpop.f32.mrf.mxu0 }
 0x516   : > { %v1123_v36 = vpop.f32.mrf.mxu0 }
 0x518   : > { %v3582_v37 = vpop.f32.mrf.mxu0 }
 0x51a   : > { %v1249_v38 = vpop.f32.mrf.mxu0 }
 0x51b   : > { %v1253_v39 = vmul.f32 0.25, %v1249_v38 }
 0x51c   : > { %v3593_v40 = vpop.f32.mrf.mxu0 }
 0x51d   : > { %v1254_v41 = vsel %vm819_vm2, %v1253_v39, -inf }
 0x51e   : > { %1255 = vmax.xlane.f32.xlu1 %v1254_v41 }
 0x52f   : > { %1484 = vrot.lane.b32.xlu1 %v4220_v58, %s4004_s19 }
 0x533   : > { %1615 = vrot.lane.b32.xlu1 %v4184_v29, %s4005_s20 }
 0x5a7   : > { %v1256_v42 = vpop.xlane.xlu1 %1255 }
 0x5a8   : > { %v1257_v43 = vsub.f32 %v1253_v39, %v1256_v42 }
 0x5aa   : > { %v1258_v44 = vmul.f32 1.442695, %v1257_v43 }
 0x5ab   : > { %v1485_v52 = vpop.permute.xlu1 %1484 }
 0x5ac   : > { %3868 = vpow2.f32 %v1258_v44 }
 0x5af   : > { %v1616_v11 = vpop.permute.xlu1 %1615 }
 0x5b9   : > { %v3869_v45 = vpop.eup %3868 }
 0x5ba   : > { %v1260_v46 = vsel %vm819_vm2, %v3869_v45, 0.0 }
 0x5bb   : > { %1261 = vadd.xlane.f32.xlu0 %v1260_v46 }
 0x5d1   : > { %1396 = vrot.lane.b32.xlu0 %v4184_v29, %s4004_s19 }
 0x5d5   : > { %1394 = vrot.lane.b32.xlu0 %v4190_v31, %s4004_s19 }
 0x644   : > { %v1262_v47 = vpop.xlane.xlu0 %1261 }
 0x645   : > { %3870 = vrcp.f32 %v1262_v47 }
 0x648   : > { %v1397_v49 = vpop.permute.xlu0 %1396 }
 0x64c   : > { %v1395_v51 = vpop.permute.xlu0 %1394 }
 0x652   : > { %v3871_v48 = vpop.eup %3870 }
 0x653   : > { %v1264_v50 = vmul.f32 %v3871_v48, %v3869_v45  ;;  %v3776_v48 = vld [vmem:[%s4428_s3 + $0x20] sm:$0xff]  }
 0x655   : > { %3597 = vmatmul.mubr.msk.f32.vlgmr.msra.gmra.mxu1 %vm819_vm2, %v1264_v50 }
 0x656   : > { %3606 = vmatpush3.xpose.msk.msra.mxu1 %vm741_vm1, %v1397_v49  ;;  %3607 = vmatprep.mubr.msk.f32.mxu1 %vm4001_vm0, %v4000_v19 }
 0x657   : > { %3610 = vmatprep.subr.mxu1 %v4000_v19 }
 0x659   : > { %3608 = vmatmul.mubr.msk.f32.vlgmr.msra.gmra.mxu1 %vm741_vm1, %v1395_v51 }
 0x65a   : > { %3611 = vmatpush3.msra.mxu1 %v1485_v52  ;;  %3612 = vmatprep.mubr.msk.f32.mxu1 %vm4001_vm0, %v4000_v19 }
 0x65b   : > { %3621 = vmatprep.subr.mxu1 %v4000_v19 }
 0x715   : > { %v1337_v55 = vpop.f32.mrf.mxu1 }
 0x716   : > { %v1341_v56 = vpack.c.bf16 %v1337_v55, %v1337_v55 }
 0x717   : > { %v3598_v57 = vpop.f32.mrf.mxu1 }
 0x718   : > { %3602 = vmatmul.mubr.msk.bf16.vlgmr.msra.gmra.mxu0 %vm741_vm1, %v1341_v56 }
 0x719   : > { %v1468_v59 = vpop.f32.mrf.mxu1  ;;  %3617 = vmatprep.mubr.msk.bf16.mxu0 %vm4001_vm0, %v4000_v19  ;;  %3616 = vmatpush3.bf16.msra.mxu0 %v3775_v18 }
 0x71a   : > { %v1472_v60 = vmul.f32 0.25, %v1468_v59  ;;  %3631 = vmatprep.subr.bf16.mxu0 %v4000_v19 }
 0x71b   : > { %v3609_v61 = vpop.f32.mrf.mxu1 }
 0x71c   : > { %v1473_v62 = vsel %vm819_vm2, %v1472_v60, -inf }
 0x71d   : > { %1474 = vmax.xlane.f32.xlu0 %v1473_v62 }
 0x733   : > { %1703 = vrot.lane.b32.xlu0 %v4220_v58, %s4005_s20 }
 0x7a6   : > { %v1475_v63 = vpop.xlane.xlu0 %1474 }
 0x7a7   : > { %v1476_v1 = vsub.f32 %v1472_v60, %v1475_v63 }
 0x7a9   : > { %v1477_v2 = vmul.f32 1.442695, %v1476_v1 }
 0x7aa   : > { %v1704_v16 = vpop.permute.xlu0 %1703 }
 0x7ab   : > { %3872 = vpow2.f32 %v1477_v2 }
 0x7b8   : > { %v3873_v3 = vpop.eup %3872 }
 0x7b9   : > { %v1479_v4 = vsel %vm819_vm2, %v3873_v3, 0.0 }
 0x7ba   : > { %1480 = vadd.xlane.f32.xlu1 %v1479_v4 }
 0x7cb   : > { %1613 = vrot.lane.b32.xlu1 %v4190_v31, %s4005_s20 }
 0x7d8   : > { %v1387_v6 = vpop.f32.mrf.mxu0 }
 0x7d9   : > { %v1393_v7 = vadd.f32 %v1387_v6, %v1170_v5 }
 0x7da   : > { %v3603_v8 = vpop.f32.mrf.mxu0 }
 0x7dc   : > { %v1390_v9 = vpop.f32.mrf.mxu0 }
 0x7de   : > { %v3604_v10 = vpop.f32.mrf.mxu0 }
 0x843   : > { %v1481_v12 = vpop.xlane.xlu1 %1480 }
 0x844   : > { %3874 = vrcp.f32 %v1481_v12 }
 0x847   : > { %v1614_v15 = vpop.permute.xlu1 %1613 }
 0x851   : > { %v3875_v13 = vpop.eup %3874 }
 0x852   : > { %v1483_v14 = vmul.f32 %v3875_v13, %v3873_v3 }
 0x854   : > { %3613 = vmatmul.mubr.msk.f32.vlgmr.msra.gmra.mxu1 %vm819_vm2, %v1483_v14 }
 0x855   : > { %3622 = vmatpush3.xpose.msk.msra.mxu1 %vm741_vm1, %v1616_v11  ;;  %3623 = vmatprep.mubr.msk.f32.mxu1 %vm4001_vm0, %v4000_v19  ;;  %v3777_v11 = vld [vmem:[%s4428_s3 + $0x28] sm:$0xff]  }
 0x856   : > { %3626 = vmatprep.subr.mxu1 %v4000_v19 }
 0x858   : > { %3624 = vmatmul.mubr.msk.f32.vlgmr.msra.gmra.mxu1 %vm741_vm1, %v1614_v15 }
 0x859   : > { %3627 = vmatpush3.msra.mxu1 %v1704_v16  ;;  %3628 = vmatprep.mubr.msk.f32.mxu1 %vm4001_vm0, %v4000_v19 }
 0x85a   : > { %3637 = vmatprep.subr.mxu1 %v4000_v19 }
 0x914   : > { %v1556_v20 = vpop.f32.mrf.mxu1 }
 0x915   : > { %v1560_v23 = vpack.c.bf16 %v1556_v20, %v1556_v20 }
 0x916   : > { %v3614_v25 = vpop.f32.mrf.mxu1 }
 0x917   : > { %3618 = vmatmul.mubr.msk.bf16.vlgmr.msra.gmra.mxu0 %vm741_vm1, %v1560_v23 }
 0x918   : > { %v1687_v26 = vpop.f32.mrf.mxu1  ;;  %3633 = vmatprep.mubr.msk.bf16.mxu0 %vm4001_vm0, %v4000_v19  ;;  %3632 = vmatpush3.bf16.msra.mxu0 %v3776_v48 }
 0x919   : > { %v1691_v27 = vmul.f32 0.25, %v1687_v26  ;;  %3647 = vmatprep.subr.bf16.mxu0 %v4000_v19 }
 0x91a   : > { %v3625_v28 = vpop.f32.mrf.mxu1 }
 0x91b   : > { %v1692_v30 = vsel %vm819_vm2, %v1691_v27, -inf }
 0x91c   : > { %1693 = vmax.xlane.f32.xlu1 %v1692_v30 }
 0x92d   : > { %1922 = vrot.lane.b32.xlu1 %v4220_v58, %s4006_s22 }
 0x931   : > { %2053 = vrot.lane.b32.xlu1 %v4184_v29, %s4007_s23 }
 0x9a5   : > { %v1694_v32 = vpop.xlane.xlu1 %1693 }
 0x9a6   : > { %v1695_v33 = vsub.f32 %v1691_v27, %v1694_v32 }
 0x9a8   : > { %v1696_v34 = vmul.f32 1.442695, %v1695_v33 }
 0x9a9   : > { %v1923_v47 = vpop.permute.xlu1 %1922 }
 0x9aa   : > { %3876 = vpow2.f32 %v1696_v34 }
 0x9ad   : > { %v2054_v5 = vpop.permute.xlu1 %2053 }
 0x9b7   : > { %v3877_v35 = vpop.eup %3876 }
 0x9b8   : > { %v1698_v36 = vsel %vm819_vm2, %v3877_v35, 0.0 }
 0x9b9   : > { %1699 = vadd.xlane.f32.xlu0 %v1698_v36 }
 0x9cf   : > { %1834 = vrot.lane.b32.xlu0 %v4184_v29, %s4006_s22 }
 0x9d3   : > { %1832 = vrot.lane.b32.xlu0 %v4190_v31, %s4006_s22 }
 0x9d7   : > { %v1606_v37 = vpop.f32.mrf.mxu0 }
 0x9d8   : > { %v1612_v38 = vadd.f32 %v1606_v37, %v1393_v7 }
 0x9d9   : > { %v3619_v39 = vpop.f32.mrf.mxu0 }
 0x9db   : > { %v1609_v40 = vpop.f32.mrf.mxu0 }
 0x9dd   : > { %v3620_v41 = vpop.f32.mrf.mxu0 }
 0xa42   : > { %v1700_v42 = vpop.xlane.xlu0 %1699 }
 0xa43   : > { %3878 = vrcp.f32 %v1700_v42 }
 0xa46   : > { %v1835_v44 = vpop.permute.xlu0 %1834 }
 0xa4a   : > { %v1833_v46 = vpop.permute.xlu0 %1832 }
 0xa50   : > { %v3879_v43 = vpop.eup %3878 }
 0xa51   : > { %v1702_v45 = vmul.f32 %v3879_v43, %v3877_v35 }
 0xa53   : > { %3629 = vmatmul.mubr.msk.f32.vlgmr.msra.gmra.mxu1 %vm819_vm2, %v1702_v45 }
 0xa54   : > { %3638 = vmatpush3.xpose.msk.msra.mxu1 %vm741_vm1, %v1835_v44  ;;  %3639 = vmatprep.mubr.msk.f32.mxu1 %vm4001_vm0, %v4000_v19 }
 0xa55   : > { %3642 = vmatprep.subr.mxu1 %v4000_v19 }
 0xa57   : > { %3640 = vmatmul.mubr.msk.f32.vlgmr.msra.gmra.mxu1 %vm741_vm1, %v1833_v46 }
 0xa58   : > { %3643 = vmatpush3.msra.mxu1 %v1923_v47  ;;  %3644 = vmatprep.mubr.msk.f32.mxu1 %vm4001_vm0, %v4000_v19 }
 0xa59   : > { %3653 = vmatprep.subr.mxu1 %v4000_v19 }
 0xb13   : > { %v1775_v49 = vpop.f32.mrf.mxu1 }
 0xb14   : > { %v1779_v50 = vpack.c.bf16 %v1775_v49, %v1775_v49 }
 0xb15   : > { %v3630_v51 = vpop.f32.mrf.mxu1 }
 0xb16   : > { %3634 = vmatmul.mubr.msk.bf16.vlgmr.msra.gmra.mxu0 %vm741_vm1, %v1779_v50 }
 0xb17   : > { %v1906_v52 = vpop.f32.mrf.mxu1  ;;  %3649 = vmatprep.mubr.msk.bf16.mxu0 %vm4001_vm0, %v4000_v19  ;;  %3648 = vmatpush3.bf16.msra.mxu0 %v3777_v11  ;;  %v3782_v11 = vld [vmem:[#allocation4 + $0xe4] ss:$16 sps:$4 sm:$0xff]  }
 0xb18   : > { %v1910_v53 = vmul.f32 0.25, %v1906_v52  ;;  %3663 = vmatprep.subr.bf16.mxu0 %v4000_v19 }
 0xb19   : > { %v3641_v55 = vpop.f32.mrf.mxu1 }
 0xb1a   : > { %v1911_v56 = vsel %vm819_vm2, %v1910_v53, -inf }
 0xb1b   : > { %1912 = vmax.xlane.f32.xlu0 %v1911_v56 }
 0xb31   : > { %2141 = vrot.lane.b32.xlu0 %v4220_v58, %s4007_s23 }
 0xba4   : > { %v1913_v57 = vpop.xlane.xlu0 %1912 }
 0xba5   : > { %v1914_v59 = vsub.f32 %v1910_v53, %v1913_v57 }
 0xba7   : > { %v1915_v60 = vmul.f32 1.442695, %v1914_v59 }
 0xba8   : > { %v2142_v10 = vpop.permute.xlu0 %2141 }
 0xba9   : > { %3880 = vpow2.f32 %v1915_v60 }
 0xbb6   : > { %v3881_v61 = vpop.eup %3880 }
 0xbb7   : > { %v1917_v62 = vsel %vm819_vm2, %v3881_v61, 0.0 }
 0xbb8   : > { %1918 = vadd.xlane.f32.xlu1 %v1917_v62 }
 0xbc9   : > { %2051 = vrot.lane.b32.xlu1 %v4190_v31, %s4007_s23 }
 0xbd6   : > { %v1825_v63 = vpop.f32.mrf.mxu0 }
 0xbd7   : > { %v1831_v1 = vadd.f32 %v1825_v63, %v1612_v38 }
 0xbd8   : > { %v3635_v2 = vpop.f32.mrf.mxu0 }
 0xbda   : > { %v1828_v3 = vpop.f32.mrf.mxu0 }
 0xbdb   : > { %v3364_v3 = vld [vmem:[%s4429_s4] ss:$0 sm:$0xff] }
 0xbdc   : > { %v3636_v4 = vpop.f32.mrf.mxu0 }
 0xc41   : > { %v1919_v6 = vpop.xlane.xlu1 %1918 }
 0xc42   : > { %3882 = vrcp.f32 %v1919_v6 }
 0xc45   : > { %v2052_v9 = vpop.permute.xlu1 %2051 }
 0xc4f   : > { %v3883_v7 = vpop.eup %3882 }
 0xc50   : > { %v1921_v8 = vmul.f32 %v3883_v7, %v3881_v61 }
 0xc52   : > { %3645 = vmatmul.mubr.msk.f32.vlgmr.msra.gmra.mxu1 %vm819_vm2, %v1921_v8 }
 0xc53   : > { %3654 = vmatpush3.xpose.msk.msra.mxu1 %vm741_vm1, %v2054_v5  ;;  %3655 = vmatprep.mubr.msk.f32.mxu1 %vm4001_vm0, %v4000_v19 }
 0xc54   : > { %3658 = vmatprep.subr.mxu1 %v4000_v19 }
 0xc56   : > { %3656 = vmatmul.mubr.msk.f32.vlgmr.msra.gmra.mxu1 %vm741_vm1, %v2052_v9 }
 0xc57   : > { %3659 = vmatpush3.msra.mxu1 %v2142_v10  ;;  %3660 = vmatprep.mubr.msk.f32.mxu1 %vm4001_vm0, %v4000_v19  ;;  %v3780_v10 = vld [vmem:[#allocation4 + $0xe0] ss:$16 sps:$4 sm:$0xff]  }
 0xc58   : > { %3669 = vmatprep.subr.mxu1 %v4000_v19 }
 0xd12   : > { %v1994_v12 = vpop.f32.mrf.mxu1 }
 0xd13   : > { %v1998_v13 = vpack.c.bf16 %v1994_v12, %v1994_v12  ;;  %v3783_v12 = vld [vmem:[#allocation4 + $0xe8] ss:$16 sps:$4 sm:$0xff]  }
 0xd14   : > { %v3646_v14 = vpop.f32.mrf.mxu1 }
 0xd15   : > { %3650 = vmatmul.mubr.msk.bf16.vlgmr.msra.gmra.mxu0 %vm741_vm1, %v1998_v13  ;;  %v3785_v13 = vld [vmem:[#allocation4 + $0xec] ss:$16 sps:$4 sm:$0xff]   ;;  %v3788_v14 = vld [vmem:[#allocation4 + $0xc4] ss:$16 sps:$4 sm:$0xff]  }
 0xd16   : > { %v2125_v15 = vpop.f32.mrf.mxu1  ;;  %3665 = vmatprep.mubr.msk.bf16.mxu0 %vm4001_vm0, %v4000_v19 }
 0xd17   : > { %v2129_v16 = vmul.f32 0.25, %v2125_v15  ;;  %v3786_v15 = vld [vmem:[#allocation4 + $0xc0] ss:$16 sps:$4 sm:$0xff]  }
 0xd18   : > { %v3657_v18 = vpop.f32.mrf.mxu1 }
 0xd19   : > { %v2130_v20 = vsel %vm819_vm2, %v2129_v16, -inf }
 0xd1a   : > { %2131 = vmax.xlane.f32.xlu1 %v2130_v20 }
 0xda3   : > { %v2132_v23 = vpop.xlane.xlu1 %2131 }
 0xda4   : > { %v2133_v25 = vsub.f32 %v2129_v16, %v2132_v23  ;;  %v3789_v16 = vld [vmem:[#allocation4 + $0xc8] ss:$16 sps:$4 sm:$0xff]  }
 0xda6   : > { %v2134_v26 = vmul.f32 1.442695, %v2133_v25  ;;  %v3794_v25 = vld [vmem:[#allocation4 + $0xa4] ss:$16 sps:$4 sm:$0xff]  }
 0xda8   : > { %3884 = vpow2.f32 %v2134_v26  ;;  %v3797_v26 = vld [vmem:[#allocation4 + $0xac] ss:$16 sps:$4 sm:$0xff]  }
 0xdb5   : > { %v3885_v27 = vpop.eup %3884 }
 0xdb6   : > { %v2136_v28 = vsel %vm819_vm2, %v3885_v27, 0.0 }
 0xdb7   : > { %2137 = vadd.xlane.f32.xlu0 %v2136_v28  ;;  %v3795_v28 = vld [vmem:[#allocation4 + $0xa8] ss:$16 sps:$4 sm:$0xff]  }
 0xdcd   : > { %2272 = vrot.lane.b32.xlu0 %v4184_v29, %s4008_s16 }
 0xdd1   : > { %2270 = vrot.lane.b32.xlu0 %v4190_v31, %s4008_s16  ;;  %v3778_v31 = vld [vmem:[%s4428_s3 + $0x30] sm:$0xff]  }
 0xdd2   : > { %3664 = vmatpush3.bf16.msra.mxu0 %v3778_v31  ;;  %v3810_v31 = vld [vmem:[#allocation4 + $0x40] ss:$16 sps:$4 sm:$0xff]  }
 0xdd3   : > { %3679 = vmatprep.subr.bf16.mxu0 %v4000_v19 }
 0xdd5   : > { %v2044_v30 = vpop.f32.mrf.mxu0 }
 0xdd6   : > { %v2050_v32 = vadd.f32 %v2044_v30, %v1831_v1  ;;  %v3798_v30 = vld [vmem:[#allocation4 + $0x80] ss:$16 sps:$4 sm:$0xff]  }
 0xdd7   : > { %v3651_v33 = vpop.f32.mrf.mxu0 }
 0xdd8   : > { %v3801_v33 = vld [vmem:[#allocation4 + $0x88] ss:$16 sps:$4 sm:$0xff]  }
 0xdd9   : > { %v2047_v34 = vpop.f32.mrf.mxu0 }
 0xdda   : > { %v3803_v34 = vld [vmem:[#allocation4 + $0x8c] ss:$16 sps:$4 sm:$0xff]  }
 0xddb   : > { %v3652_v35 = vpop.f32.mrf.mxu0 }
 0xddc   : > { %v3806_v35 = vld [vmem:[#allocation4 + $0x64] ss:$16 sps:$4 sm:$0xff]  }
 0xe40   : > { %v2138_v36 = vpop.xlane.xlu0 %2137 }
 0xe41   : > { %3886 = vrcp.f32 %v2138_v36  ;;  %v3809_v36 = vld [vmem:[#allocation4 + $0x6c] ss:$16 sps:$4 sm:$0xff]  }
 0xe44   : > { %v2273_v38 = vpop.permute.xlu0 %2272 }
 0xe48   : > { %v2271_v29 = vpop.permute.xlu0 %2270 }
 0xe4e   : > { %v3887_v37 = vpop.eup %3886 }
 0xe4f   : > { %v2140_v39 = vmul.f32 %v3887_v37, %v3885_v27  ;;  %v3792_v27 = vld [vmem:[#allocation4 + $0xa0] ss:$16 sps:$4 sm:$0xff]  }
 0xe50   : > { %v3804_v37 = vld [vmem:[#allocation4 + $0x60] ss:$16 sps:$4 sm:$0xff]  }
 0xe51   : > { %3661 = vmatmul.mubr.msk.f32.vlgmr.msra.gmra.mxu1 %vm819_vm2, %v2140_v39  ;;  %v3812_v39 = vld [vmem:[#allocation4 + $0x44] ss:$16 sps:$4 sm:$0xff]  }
 0xe52   : > { %3670 = vmatpush3.xpose.msk.msra.mxu1 %vm741_vm1, %v2273_v38  ;;  %3671 = vmatprep.mubr.msk.f32.mxu1 %vm4001_vm0, %v4000_v19  ;;  %v3807_v38 = vld [vmem:[#allocation4 + $0x68] ss:$16 sps:$4 sm:$0xff]  }
 0xe53   : > { %3674 = vmatprep.subr.mxu1 %v4000_v19 }
 0xe55   : > { %3672 = vmatmul.mubr.msk.f32.vlgmr.msra.gmra.mxu1 %vm741_vm1, %v2271_v29  ;;  %v3815_v29 = vld [vmem:[#allocation4 + $0x4c] ss:$16 sps:$4 sm:$0xff]  }
 0xe56   : > { %3676 = vmatprep.mubr.msk.f32.mxu1 %vm4001_vm0, %v4000_v19 }
 0xf11   : > { %v2213_v40 = vpop.f32.mrf.mxu1 }
 0xf12   : > { %v2217_v41 = vpack.c.bf16 %v2213_v40, %v2213_v40  ;;  %v3813_v40 = vld [vmem:[#allocation4 + $0x48] ss:$16 sps:$4 sm:$0xff]  }
 0xf13   : > { %v3662_v42 = vpop.f32.mrf.mxu1 }
 0xf14   : > { %3666 = vmatmul.mubr.msk.bf16.vlgmr.msra.gmra.mxu0 %vm741_vm1, %v2217_v41  ;;  %v3818_v41 = vld [vmem:[#allocation4 + $0x24] ss:$16 sps:$4 sm:$0xff]   ;;  %v3821_v42 = vld [vmem:[#allocation4 + $0x2c] ss:$16 sps:$4 sm:$0xff]  }
 0xf15   : > { %v2344_v43 = vpop.f32.mrf.mxu1  ;;  %3681 = vmatprep.mubr.msk.bf16.mxu0 %vm4001_vm0, %v4000_v19  ;;  %v3779_v19 = vld [vmem:[%s4428_s3 + $0x38] sm:$0xff]  }
 0xf16   : > { %v2348_v44 = vmul.f32 0.25, %v2344_v43  ;;  %3680 = vmatpush3.bf16.msra.mxu0 %v3779_v19  ;;  %v3816_v43 = vld [vmem:[#allocation4 + $0x20] ss:$16 sps:$4 sm:$0xff]  }
 0xf17   : > { %v3673_v45 = vpop.f32.mrf.mxu1  ;;  %2782 = vmatprep.subr.bf16.mxu0 %v3785_v13  ;;  %v3845_v13 = vld [vmem:[#allocation6 + $0xd8] sm:$0xff]  }
 0xf18   : > { %v2349_v46 = vsel %vm819_vm2, %v2348_v44, -inf  ;;  %v3824_v45 = vld [vmem:[#allocation4 + $0x4] ss:$16 sps:$4 sm:$0xff]  }
 0xf19   : > { %2350 = vmax.xlane.f32.xlu0 %v2349_v46  ;;  %v3827_v46 = vld [vmem:[#allocation4 + $0xc] ss:$16 sps:$4 sm:$0xff]  }
 0xfa2   : > { %v2351_v47 = vpop.xlane.xlu0 %2350 }
 0xfa3   : > { %v2352_v48 = vsub.f32 %v2348_v44, %v2351_v47  ;;  %v3819_v44 = vld [vmem:[#allocation4 + $0x28] ss:$16 sps:$4 sm:$0xff]   ;;  %v3822_v47 = vld [vmem:[#allocation4] ss:$16 sps:$4 sm:$0xff]  }
 0xfa5   : > { %v2353_v49 = vmul.f32 1.442695, %v2352_v48  ;;  %v3825_v48 = vld [vmem:[#allocation4 + $0x8] ss:$16 sps:$4 sm:$0xff]  }
 0xfa7   : > { %3888 = vpow2.f32 %v2353_v49  ;;  %v3828_v49 = vld [vmem:[#allocation6 + $0x78] sm:$0xff]  }
 0xfb4   : > { %v3889_v50 = vpop.eup %3888 }
 0xfb5   : > { %v2355_v51 = vsel %vm819_vm2, %v3889_v50, 0.0 }
 0xfb6   : > { %2356 = vadd.xlane.f32.xlu1 %v2355_v51 }
 0xfc7   : > { %2360 = vrot.lane.b32.xlu1 %v4220_v58, %s4008_s16 }
 0xfd4   : > { %v2263_v52 = vpop.f32.mrf.mxu0 }
 0xfd5   : > { %v2269_v53 = vadd.f32 %v2263_v52, %v2050_v32  ;;  %v3800_v32 = vld [vmem:[#allocation4 + $0x84] ss:$16 sps:$4 sm:$0xff]  }
 0xfd6   : > { %v3667_v55 = vpop.f32.mrf.mxu0 }
 0xfd7   : > { %v3365_v55 = vld [vmem:[%s4430_s5] ss:$0 sm:$0xff] }
 0xfd8   : > { %v2266_v56 = vpop.f32.mrf.mxu0 }
 0xfda   : > { %v3668_v57 = vpop.f32.mrf.mxu0 }
 0xfdb   : > { %v3366_v57 = vld [vmem:[%s4431_s6] ss:$0 sm:$0xff] }
0x103f   : > { %v2357_v59 = vpop.xlane.xlu1 %2356 }
0x1040   : > { %3890 = vrcp.f32 %v2357_v59 }
0x1043   : > { %v2361_v60 = vpop.permute.xlu1 %2360 }
0x1044   : > { %3675 = vmatpush3.msra.mxu1 %v2361_v60 }
0x1045   : > { %2741 = vmatprep.subr.bf16.mxu1 %v3782_v11  ;;  %v3843_v11 = vld [vmem:[#allocation6 + $0xa0] sm:$0xff]  }
0x104d   : > { %v3891_v61 = vpop.eup %3890 }
0x104e   : > { %v2359_v62 = vmul.f32 %v3891_v61, %v3889_v50  ;;  %v3829_v50 = vld [vmem:[#allocation6 + $0xf8] sm:$0xff]  }
0x104f   : > { %v3830_v61 = vld [vmem:[#allocation6 + $0x38] sm:$0xff]  }
0x1050   : > { %3677 = vmatmul.mubr.msk.f32.vlgmr.msra.gmra.mxu1 %vm819_vm2, %v2359_v62  ;;  %v3831_v62 = vld [vmem:[#allocation6 + $0xb8] sm:$0xff]  }
0x1051   : > { %2773 = vmatprep.mubr.bf16.mxu1 %v3999_v0  ;;  %2742 = vmatpush1.bf16.msra.mxu1 %v3780_v10  ;;  %v3842_v10 = vld [vmem:[#allocation6 + $0x20] sm:$0xff]  }
0x1052   : > { %2743 = vmatprep.subr.bf16.mxu1 %v3788_v14  ;;  %v3846_v14 = vld [vmem:[#allocation6 + $0x18] sm:$0xff]  }
0x1055   : > { %2744 = vmatpush1.bf16.msra.mxu1 %v3786_v15  ;;  %v3848_v15 = vld [vmem:[#allocation6 + $0x50] sm:$0xff]  }
0x1056   : > { %2745 = vmatprep.subr.bf16.mxu1 %v3794_v25  ;;  %v3854_v25 = vld [vmem:[#allocation6 + $0x8] sm:$0xff]  }
0x1059   : > { %2746 = vmatpush1.bf16.msra.mxu1 %v3792_v27  ;;  %v3856_v27 = vld [vmem:[#allocation6 + $0x40] sm:$0xff]  }
0x105a   : > { %2747 = vmatprep.subr.bf16.mxu1 %v3800_v32  ;;  %v3859_v32 = vld [vmem:[#allocation6 + $0x80] sm:$0xff]  }
0x105d   : > { %2748 = vmatpush1.bf16.msra.mxu1 %v3798_v30  ;;  %v3858_v30 = vld [vmem:[#allocation6] sm:$0xff]  }
0x105e   : > { %2749 = vmatprep.subr.bf16.mxu1 %v3806_v35 }
0x1061   : > { %2750 = vmatpush1.bf16.msra.mxu1 %v3804_v37 }
0x1062   : > { %2751 = vmatprep.subr.bf16.mxu1 %v3812_v39 }
0x1065   : > { %2752 = vmatpush1.bf16.msra.mxu1 %v3810_v31 }
0x1066   : > { %2753 = vmatprep.subr.bf16.mxu1 %v3818_v41 }
0x1069   : > { %2754 = vmatpush1.bf16.msra.mxu1 %v3816_v43 }
0x106a   : > { %2755 = vmatprep.subr.bf16.mxu1 %v3824_v45 }
0x106d   : > { %2756 = vmatpush1.bf16.msra.mxu1 %v3822_v47 }
0x106e   : > { %3493 = vmatprep.subr.bf16.mxu1 %v3828_v49 }
0x1110   : > { %v2432_v58 = vpop.f32.mrf.mxu1 }
0x1111   : > { %v2436_v63 = vpack.c.bf16 %v2432_v58, %v2432_v58 }
0x1112   : > { %v3678_v1 = vpop.f32.mrf.mxu1 }
0x1113   : > { %3682 = vmatmul.mubr.msk.bf16.vlgmr.msra.gmra.mxu0 %vm741_vm1, %v2436_v63  ;;  %v3832_v63 = vld [vmem:[#allocation6 + $0x70] sm:$0xff]  }
0x1114   : > { %2814 = vmatprep.mubr.bf16.mxu0 %v3999_v0  ;;  %v3791_v0 = vld [vmem:[#allocation4 + $0xcc] ss:$16 sps:$4 sm:$0xff]   ;;  %2783 = vmatpush1.bf16.msra.mxu0 %v3783_v12  ;;  %v3833_v1 = vld [vmem:[#allocation6 + $0xf0] sm:$0xff]  }
0x1115   : > { %2784 = vmatprep.subr.bf16.mxu0 %v3791_v0  ;;  %v3844_v12 = vld [vmem:[#allocation6 + $0x58] sm:$0xff]  }
0x1116   : > { %v3847_v0 = vld [vmem:[#allocation6 + $0x98] sm:$0xff]  }
0x1118   : > { %2785 = vmatpush1.bf16.msra.mxu0 %v3789_v16  ;;  %v3849_v16 = vld [vmem:[#allocation6 + $0xd0] sm:$0xff]  }
0x1119   : > { %2786 = vmatprep.subr.bf16.mxu0 %v3797_v26  ;;  %v3855_v26 = vld [vmem:[#allocation6 + $0x88] sm:$0xff]  }
0x111c   : > { %2787 = vmatpush1.bf16.msra.mxu0 %v3795_v28  ;;  %v3857_v28 = vld [vmem:[#allocation6 + $0xc0] sm:$0xff]  }
0x111d   : > { %2788 = vmatprep.subr.bf16.mxu0 %v3803_v34  ;;  %v2575_v34 = vsub.s32 3, %v4169_v21 }
0x1120   : > { %2789 = vmatpush1.bf16.msra.mxu0 %v3801_v33  ;;  %v2559_v33 = vld [vmem:[%s4433_s8] sm:$0xf] }
0x1121   : > { %2790 = vmatprep.subr.bf16.mxu0 %v3809_v36  ;;  %v2564_v35 = vrot.slane %v2559_v33, %v519_v24  ;;  %v2572_v36 = vrot.slane %v2559_v33, %v527_v54  ;;  %v2568_v37 = vrot.slane %v2559_v33, %v523_v22 }
0x1124   : > { %2791 = vmatpush1.bf16.msra.mxu0 %v3807_v38  ;;  %v2576_v38 = vrot.slane %v2559_v33, %v2575_v34 }
0x1125   : > { %2792 = vmatprep.subr.bf16.mxu0 %v3815_v29 }
0x1128   : > { %2793 = vmatpush1.bf16.msra.mxu0 %v3813_v40 }
0x1129   : > { %2794 = vmatprep.subr.bf16.mxu0 %v3821_v42 }
0x112c   : > { %2795 = vmatpush1.bf16.msra.mxu0 %v3819_v44 }
0x112d   : > { %2796 = vmatprep.subr.bf16.mxu0 %v3827_v46 }
0x1130   : > { %2797 = vmatpush1.bf16.msra.mxu0 %v3825_v48 }
0x1131   : > { %3515 = vmatprep.subr.bf16.mxu0 %v3829_v50 }
0x11d3   : > { %v2482_v2 = vpop.f32.mrf.mxu0 }
0x11d4   : > { %v2488_v4 = vadd.f32 %v2482_v2, %v2269_v53  ;;  %v3834_v2 = vld [vmem:[#allocation6 + $0x30] sm:$0xff]  }
0x11d5   : > { %v3683_v5 = vpop.f32.mrf.mxu0 }
0x11d6   : > { %v2496_v6 = vadd.f32 %v3364_v3, %v2488_v4  ;;  %v3835_v3 = vld [vmem:[#allocation6 + $0xb0] sm:$0xff]   ;;  %v3836_v4 = vld [vmem:[#allocation6 + $0x68] sm:$0xff]  }
0x11d7   : > { %v2485_v7 = vpop.f32.mrf.mxu0  ;;  %v3837_v5 = vld [vmem:[#allocation6 + $0xe8] sm:$0xff]  }
0x11d8   : > { %v2497_v8 = vadd.f32 %v2496_v6, %v4159_v17  ;;  %v3838_v6 = vld [vmem:[#allocation6 + $0x28] sm:$0xff]  }
0x11d9   : > { %v3684_v9 = vpop.f32.mrf.mxu0  ;;  %v3839_v7 = vld [vmem:[#allocation6 + $0xa8] sm:$0xff]  }
0x11da   : > { %2498 = vadd.xlane.f32.xlu1 %v2497_v8  ;;  %v3841_v9 = vld [vmem:[#allocation6 + $0xe0] sm:$0xff]  }
0x1263   : > { %v2499_v18 = vpop.xlane.xlu1 %2498 }
0x1264   : > { %v2501_v17 = vmul.f32 0.0078125, %v2499_v18  ;;  %v3850_v18 = vld [vmem:[#allocation6 + $0x10] sm:$0xff]  }
0x1266   : > { %v2502_v20 = vsub.f32 %v2497_v8, %v2501_v17  ;;  %v3840_v8 = vld [vmem:[#allocation6 + $0x60] sm:$0xff]   ;;  %v3851_v17 = vld [vmem:[#allocation6 + $0x90] sm:$0xff]  }
0x1268   : > { %v2503_v23 = vmul.f32 %v2502_v20, %v2502_v20 }
0x126a   : > { %2504 = vadd.xlane.f32.xlu0 %v2503_v23  ;;  %v3853_v23 = vld [vmem:[#allocation6 + $0xc8] sm:$0xff]  }
0x12f3   : > { %v2505_v51 = vpop.xlane.xlu0 %2504 }
0x12f4   : > { %v2506_v19 = vmul.f32 0.0078125, %v2505_v51 }
0x12f6   : > { %v2507_v52 = vadd.f32 1e-05, %v2506_v19 }
0x12f8   : > { %3892 = vrsqrt.f32 %v2507_v52 }
0x1305   : > { %v3893_v53 = vpop.eup %3892 }
0x1306   : > { %v2509_v56 = vmul.f32 %v3893_v53, %v2502_v20  ;;  %v3852_v20 = vld [vmem:[#allocation6 + $0x48] sm:$0xff]  }
0x1308   : > { %v2517_v59 = vmul.f32 %v3365_v55, %v2509_v56  ;;  %v3399_v55 = vld [vmem:[%s4435_s10] ss:$0 sm:$0xff] }
0x130a   : > { %v4393_v60 = vadd.f32 %v3366_v57, %v2517_v59 }
0x130c   : > { %v2526_v58 = vpack.c.bf16 %v4393_v60, %v4393_v60 }
0x130e   : > { %2774 = vmatmul.mubr.bf16.vlgmr.msra.gmra.mxu1 %v2526_v58  ;;  %2815 = vmatmul.mubr.bf16.vlgmr.msra.gmra.mxu0 %v2526_v58 }
0x130f   : > { %3494 = vmatpush3.bf16.msra.mxu1 %v3830_v61  ;;  %3516 = vmatpush3.bf16.msra.mxu0 %v3831_v62 }
0x1310   : > { %3495 = vmatprep.subr.bf16.mxu1 %v3832_v63  ;;  %3517 = vmatprep.subr.bf16.mxu0 %v3833_v1 }
0x1313   : > { %3496 = vmatpush3.bf16.msra.mxu1 %v3834_v2  ;;  %3518 = vmatpush3.bf16.msra.mxu0 %v3835_v3 }
0x1314   : > { %3497 = vmatprep.subr.bf16.mxu1 %v3836_v4  ;;  %3519 = vmatprep.subr.bf16.mxu0 %v3837_v5 }
0x1317   : > { %3498 = vmatpush3.bf16.msra.mxu1 %v3838_v6  ;;  %3520 = vmatpush3.bf16.msra.mxu0 %v3839_v7 }
0x1318   : > { %3499 = vmatprep.subr.bf16.mxu1 %v3840_v8  ;;  %3521 = vmatprep.subr.bf16.mxu0 %v3841_v9 }
0x131b   : > { %3500 = vmatpush3.bf16.msra.mxu1 %v3842_v10  ;;  %3522 = vmatpush3.bf16.msra.mxu0 %v3843_v11 }
0x131c   : > { %3501 = vmatprep.subr.bf16.mxu1 %v3844_v12  ;;  %3523 = vmatprep.subr.bf16.mxu0 %v3845_v13  ;;  %v3432_v13 = vld [vmem:[%s4436_s11] ss:$0 sm:$0xff] }
0x131f   : > { %3502 = vmatpush3.bf16.msra.mxu1 %v3846_v14  ;;  %3524 = vmatpush3.bf16.msra.mxu0 %v3847_v0 }
0x1320   : > { %3503 = vmatprep.subr.bf16.mxu1 %v3848_v15  ;;  %3525 = vmatprep.subr.bf16.mxu0 %v3849_v16 }
0x1323   : > { %3504 = vmatpush3.bf16.msra.mxu1 %v3850_v18  ;;  %3526 = vmatpush3.bf16.msra.mxu0 %v3851_v17 }
0x1324   : > { %3505 = vmatprep.subr.bf16.mxu1 %v3852_v20  ;;  %3527 = vmatprep.subr.bf16.mxu0 %v3853_v23 }
0x1327   : > { %3506 = vmatpush3.bf16.msra.mxu1 %v3854_v25  ;;  %3528 = vmatpush3.bf16.msra.mxu0 %v3855_v26 }
0x1328   : > { %3507 = vmatprep.subr.bf16.mxu1 %v3856_v27  ;;  %3529 = vmatprep.subr.bf16.mxu0 %v3857_v28 }
0x132b   : > { %3508 = vmatpush3.bf16.msra.mxu1 %v3858_v30  ;;  %3530 = vmatpush3.bf16.msra.mxu0 %v3859_v32 }
0x13ce   : > { %v2775_v39 = vpop.f32.mrf.mxu1  ;;  %v2816_v29 = vpop.f32.mrf.mxu0 }
0x13cf   : > { %v2776_v31 = vadd.f32 %v2775_v39, %v2564_v35  ;;  %v2817_v40 = vadd.f32 %v2816_v29, %v2572_v36 }
0x13d0   : > { %v2777_v41 = vpop.f32.mrf.mxu1  ;;  %v2818_v42 = vpop.f32.mrf.mxu0 }
0x13d1   : > { %v2778_v43 = vadd.f32 %v2777_v41, %v2568_v37  ;;  %v2819_v44 = vadd.f32 %v2818_v42, %v2576_v38  ;;  %v2823_v45 = vmax.f32 %v2776_v31, 0.0  ;;  %v2825_v46 = vmax.f32 %v2817_v40, 0.0 }
0x13d2   : > { %v2779_v47 = vpop.f32.mrf.mxu1  ;;  %v2820_v48 = vpop.f32.mrf.mxu0 }
0x13d3   : > { %v2824_v24 = vmax.f32 %v2778_v43, 0.0  ;;  %v2826_v49 = vmax.f32 %v2819_v44, 0.0  ;;  %v2827_v22 = vpack.c.bf16 %v2823_v45, %v2823_v45  ;;  %v2829_v19 = vpack.c.bf16 %v2825_v46, %v2825_v46 }
0x13d4   : > { %v2780_v50 = vpop.f32.mrf.mxu1  ;;  %v2821_v54 = vpop.f32.mrf.mxu0 }
0x13d5   : > { %v2828_v51 = vpack.c.bf16 %v2824_v24, %v2824_v24  ;;  %v2830_v21 = vpack.c.bf16 %v2826_v49, %v2826_v49 }
0x13d7   : > { %3126 = vmatprep.mubr.bf16.mxu1 %v2828_v51  ;;  %3166 = vmatprep.mubr.bf16.mxu0 %v2830_v21 }
0x13d8   : > { %3127 = vmatmul.mubr.bf16.vlgmr.msra.gmra.mxu1 %v2827_v22  ;;  %3167 = vmatmul.mubr.bf16.vlgmr.msra.gmra.mxu0 %v2829_v19 }
0x1498   : > { %v3509_v52 = vpop.f32.mrf.mxu1  ;;  %v3531_v53 = vpop.f32.mrf.mxu0 }
0x149a   : > { %v3510_v56 = vpop.f32.mrf.mxu1  ;;  %v3532_v57 = vpop.f32.mrf.mxu0 }
0x149b   : > { %v3511_v59 = vadd.f32 %v3510_v56, %v3509_v52  ;;  %v3533_v63 = vadd.f32 %v3532_v57, %v3531_v53 }
0x149c   : > { %v3512_v61 = vpop.f32.mrf.mxu1  ;;  %v3534_v62 = vpop.f32.mrf.mxu0 }
0x149d   : > { %v3129_v58 = vadd.f32 %v3511_v59, %v3399_v55 }
0x149e   : > { %v3513_v1 = vpop.f32.mrf.mxu1  ;;  %v3535_v2 = vpop.f32.mrf.mxu0 }
0x149f   : > { %v3169_v3 = vadd.f32 %v3533_v63, %v3129_v58 }
0x14a1   : > { %v3174_v4 = vadd.f32 %v3169_v3, %v4393_v60  ;;  %v3433_v60 = vld [vmem:[%s4437_s12] ss:$0 sm:$0xff] }
0x14a3   : > { %3175 = vadd.xlane.f32.xlu0 %v3174_v4 }
0x152c   : > { %v3176_v5 = vpop.xlane.xlu0 %3175 }
0x152d   : > { %v3177_v6 = vmul.f32 0.0078125, %v3176_v5 }
0x152f   : > { %v3178_v7 = vsub.f32 %v3174_v4, %v3177_v6 }
0x1531   : > { %v3179_v8 = vmul.f32 %v3178_v7, %v3178_v7 }
0x1533   : > { %3180 = vadd.xlane.f32.xlu0 %v3179_v8 }
0x15bc   : > { %v3181_v9 = vpop.xlane.xlu0 %3180 }
0x15bd   : > { %v3182_v10 = vmul.f32 0.0078125, %v3181_v9 }
0x15bf   : > { %v3183_v11 = vadd.f32 1e-05, %v3182_v10 }
0x15c1   : > { %3894 = vrsqrt.f32 %v3183_v11 }
0x15ce   : > { %v3895_v12 = vpop.eup %3894 }
0x15cf   : > { %v3185_v14 = vmul.f32 %v3895_v12, %v3178_v7 }
0x15d1   : > { %v3193_v0 = vmul.f32 %v3432_v13, %v3185_v14 }
0x15d3   : > { %v3201_v15 = vadd.f32 %v3433_v60, %v3193_v0 }
0x15d5   : > { %3202 = vst [vmem:[%s479_s17] sm:$0xff] %v3201_v15 }
0x15d6 PF: > { %s25_s25 = sadd.s32 1, %s3988_s25  }
0x15d7   : > { %p22_p2 = scmp.ge.s32.totalorder %s25_s25, 4  }
0x15d9   :  { %24 = sbr.rel (!%p22_p2) target bundleno = 2 (0x2), region = 115 }
0x15de   :  { %3222 = vsyncpa [#allocation3], 1 }
0x15df   :  { %3224 = vsyncpa [#allocation3 + $0x1], 1 }
0x15e0   :  { %3225 = vsyncpa [#allocation5], 1 }

// kernel: _lambda_.5
= control target key start
LH: loop header
LB: loop body
LE: loop exit
PB: predicated region body
PF: predicated region fallthrough
CT: control target
= control target key end

     0   :  { %s4583_s0 = inlined_call_operand.vmem [shape: f32[2,8,128], index: 0, kind: input, shape index: {}]   ;;  %s4584_s1 = inlined_call_operand.vmem [shape: bf16[128,384], index: 1, kind: input, shape index: {}]   ;;  %s4585_s2 = inlined_call_operand.vmem [shape: f32[1,384], index: 2, kind: input, shape index: {}]   ;;  %s4586_s3 = inlined_call_operand.vmem [shape: bf16[128,128], index: 3, kind: input, shape index: {}]   ;;  %s4587_s4 = inlined_call_operand.vmem [shape: f32[1,128], index: 4, kind: input, shape index: {}]   ;;  %s4588_s5 = inlined_call_operand.vmem [shape: f32[1,128], index: 5, kind: input, shape index: {}]   ;;  %s4589_s6 = inlined_call_operand.vmem [shape: f32[1,128], index: 6, kind: input, shape index: {}]   ;;  %s4590_s7 = inlined_call_operand.vmem [shape: bf16[128,512], index: 7, kind: input, shape index: {}]   ;;  %s4591_s8 = inlined_call_operand.vmem [shape: f32[1,512], index: 8, kind: input, shape index: {}]   ;;  %s4592_s9 = inlined_call_operand.vmem [shape: bf16[512,128], index: 9, kind: input, shape index: {}]   ;;  %s4593_s10 = inlined_call_operand.vmem [shape: f32[1,128], index: 10, kind: input, shape index: {}]   ;;  %s4594_s11 = inlined_call_operand.vmem [shape: f32[1,128], index: 11, kind: input, shape index: {}]   ;;  %s4595_s12 = inlined_call_operand.vmem [shape: f32[1,128], index: 12, kind: input, shape index: {}]   ;;  %s4596_s13 = inlined_call_operand.hbm [shape: f32[2,8,128], index: 13, kind: output, shape index: {}]  }
   0x1   :  { %4601 = sst [smem:[#allocation9_spill]] %s4583_s0 }
   0x2   :  { %4602 = sst [smem:[#allocation10_spill]] %s4584_s1 }
   0x3   :  { %18 = vsyncpa [#allocation3], 0 }
   0x4   :  { %20 = vsyncpa [#allocation3 + $0x1], 0  ;;  %s3973_s25 = smov 0   ;;  %s3975_s26 = smov 0  }
   0x5   :  { %s3977_s27 = smov 0   ;;  %s3979_s28 = smov 0  }
   0x6 LB: > { %4603 = sst [smem:[#allocation5_spill]] %s3886_s27  ;;  %s3994_s29 = sadd.s32 4294967295, %s3890_s28   ;;  %s3890_s28 = sphi %s3979_s28, %s4612_s28   ;;  %s3886_s27 = sphi %s3977_s27, %s4614_s27   ;;  %s3882_s26 = sphi %s3975_s26, %s4616_s26   ;;  %s3878_s25 = sphi %s3973_s25, %s4615_s25  }
   0x7   : > { %s3232_s30 = sadd.s32 4294967294, %s3890_s28   ;;  %s3998_s14 = sadd.s32 1, %s3890_s28  }
   0x8   : > { %4604 = sst [smem:[#allocation6_spill]] %s3998_s14  ;;  %s311_s15 = sadd.s32 1, %s3886_s27 }
   0x9   : > { %s308_s16 = ssub.s32 %s3890_s28, %s3998_s14  ;;  %p321_p0 = scmp.ne.s32.totalorder %s3886_s27, %s3882_s26 }
   0xa   : > { %p309_p1 = scmp.eq.s32.totalorder %s308_s16, 0  ;;  %p322_p2 = scmp.eq.s32.totalorder %s3994_s29, 1 }
   0xb   : > { %p327_p3 = scmp.ne.s32.totalorder %s3882_s26, %s3878_s25  ;;  %p328_p4 = scmp.eq.s32.totalorder %s3232_s30, 1 }
   0xc   : > { %s4009_s17 = scalar_select %p309_p1, %s3886_s27, %s311_s15  }
   0xd   : > { %p4011_p5 = por %p322_p2, %p321_p0  ;;  %p4015_p6 = por %p328_p4, %p327_p3 }
   0xe   : > { %4605 = sst [smem:[#allocation7_spill]] %s4009_s17  ;;  %p3235_p7 = scmp.ge.s32.totalorder %s3890_s28, 1 }
   0xf   : > { %s4607_s19 = scalar_select %p4015_p6, 1, 0 }
  0x10   : > { %p389_p8 = scmp.lt.s32.totalorder %s3890_s28, 3 }
  0x11   : > { %4608 = sst [smem:[#allocation8_spill]] %s4607_s19 }
  0x12   : > { %p390_p9 = pnand %p3235_p7, %p389_p8 }
  0x13   : > { %s4609_s1 = sld [smem:[#allocation10_spill]] (!%p390_p9)  ;;  %p432_p10 = scmp.lt.s32.totalorder (!%p390_p9), %s3994_s29, 1 }
  0x14   : > { %393 = sbr.rel (%p390_p9) target bundleno = 5572 (0x15c4), region = 72  ;;  %s4610_s0 = sld [smem:[#allocation9_spill]] (!%p390_p9) }
  0x15   : > { %s3896_s17 = smov (!%p390_p9), 96   ;;  %s3898_s14 = smov (!%p390_p9), 64  }
  0x16   : > { %s3899_s21 = smov (!%p390_p9), 48   ;;  %s429_s27 = sand.u32 (!%p390_p9), 1, %s3882_s26  }
  0x17   : > { %s3373_s20 = sshll.u32 (!%p390_p9), %s3994_s29, 7 }
  0x19   : > { %v3674_v0 = vld [vmem:[%s4609_s1 + $0xac] ss:$12 sps:$4 sm:$0xff]   ;;  %v3676_v1 = vld [vmem:[%s4609_s1 + $0xa8] ss:$12 sps:$4 sm:$0xff]   ;;  %v3892_v2 = vmov 0   ;;  %s433_s22 = scalar_select %p432_p10, %s3994_s29, 1  ;;  %v473_v20 = vlaneseq }
  0x1a   : > { %648 = vmatprep.mubr.bf16.mxu0 %v3892_v2  ;;  %616 = vmatprep.subr.bf16.mxu0 %v3674_v0  ;;  %v3677_v3 = vld [vmem:[%s4609_s1 + $0x94] ss:$12 sps:$4 sm:$0xff]   ;;  %v3679_v4 = vld [vmem:[%s4609_s1 + $0x90] ss:$12 sps:$4 sm:$0xff]   ;;  %v3682_v6 = vld [vmem:[%s4609_s1 + $0x78] ss:$12 sps:$4 sm:$0xff]  }
  0x1b   : > { %617 = vmatpush1.bf16.msra.mxu0 %v3676_v1  ;;  %v3680_v5 = vld [vmem:[%s4609_s1 + $0x7c] ss:$12 sps:$4 sm:$0xff]   ;;  %v3683_v7 = vld [vmem:[%s4609_s1 + $0x64] ss:$12 sps:$4 sm:$0xff]   ;;  %v3685_v8 = vld [vmem:[%s4609_s1 + $0x60] ss:$12 sps:$4 sm:$0xff]  }
  0x1c   : > { %618 = vmatprep.subr.bf16.mxu0 %v3677_v3  ;;  %s3237_s15 = sshll.u32 %s433_s22, 3  ;;  %v3686_v9 = vld [vmem:[%s4609_s1 + $0x4c] ss:$12 sps:$4 sm:$0xff]   ;;  %v3688_v10 = vld [vmem:[%s4609_s1 + $0x48] ss:$12 sps:$4 sm:$0xff]   ;;  %v3893_v19 = vmov 0.0  }
  0x1d   : > { %v3689_v11 = vld [vmem:[%s4609_s1 + $0x34] ss:$12 sps:$4 sm:$0xff]   ;;  %v3691_v12 = vld [vmem:[%s4609_s1 + $0x30] ss:$12 sps:$4 sm:$0xff]   ;;  %v3694_v14 = vld [vmem:[%s4609_s1 + $0x18] ss:$12 sps:$4 sm:$0xff]   ;;  %s435_s23 = scalar_lea.vmem %s4610_s0, %s3237_s15  ;;  %3477 = vmatprep.subr.bf16.mxu1 %v3893_v19 }
  0x1e   : > { %v3692_v13 = vld [vmem:[%s4609_s1 + $0x1c] ss:$12 sps:$4 sm:$0xff]   ;;  %v3695_v15 = vld [vmem:[%s4609_s1 + $0x4] ss:$12 sps:$4 sm:$0xff]   ;;  %v3697_v16 = vld [vmem:[%s4609_s1] ss:$12 sps:$4 sm:$0xff]  }
  0x1f   : > { %619 = vmatpush1.bf16.msra.mxu0 %v3679_v4  ;;  %v4075_v17 = vld [vmem:[%s435_s23] sm:$0xff]  ;;  %vm3894_vm0 = vmmov 0   ;;  %v4085_v21 = vshrl.u32 %v473_v20, 7  ;;  %vm697_vm1 = vcmask 130048   ;;  %s3895_s22 = smov 112   ;;  %vm775_vm2 = vcmask 64512  }
  0x20   : > { %620 = vmatprep.subr.bf16.mxu0 %v3680_v5  ;;  %v438_v18 = vpack.c.bf16 %v4075_v17, %v4075_v17  ;;  %3493 = vmatprep.mubr.msk.bf16.mxu1 %vm3894_vm0, %v3893_v19  ;;  %v4091_v23 = vld [vmem:[%s4585_s2] sm:$0x7]  ;;  %v3698_v33 = vld [vmem:[%s4609_s1 + $0xb0] ss:$12 sps:$4 sm:$0xff]   ;;  %v3699_v34 = vld [vmem:[%s4609_s1 + $0x98] ss:$12 sps:$4 sm:$0xff]  }
  0x21   : > { %v479_v22 = vsub.s32 1, %v4085_v21  ;;  %v475_v24 = vsub.s32 0, %v4085_v21  ;;  %3478 = vmatpush3.bf16.msra.mxu1 %v3698_v33  ;;  %v3700_v35 = vld [vmem:[%s4609_s1 + $0x80] ss:$12 sps:$4 sm:$0xff]   ;;  %v3701_v36 = vld [vmem:[%s4609_s1 + $0x68] ss:$12 sps:$4 sm:$0xff]  }
  0x22   : > { %3479 = vmatprep.subr.bf16.mxu1 %v3893_v19  ;;  %v3702_v37 = vld [vmem:[%s4609_s1 + $0x50] ss:$12 sps:$4 sm:$0xff]   ;;  %v3703_v38 = vld [vmem:[%s4609_s1 + $0x38] ss:$12 sps:$4 sm:$0xff]   ;;  %v3704_v39 = vld [vmem:[%s4609_s1 + $0x20] ss:$12 sps:$4 sm:$0xff]  }
  0x23   : > { %621 = vmatpush1.bf16.msra.mxu0 %v3682_v6  ;;  %v480_v25 = vrot.slane %v4091_v23, %v479_v22  ;;  %v476_v27 = vrot.slane %v4091_v23, %v475_v24  ;;  %v3705_v40 = vld [vmem:[%s4609_s1 + $0x8] ss:$12 sps:$4 sm:$0xff]   ;;  %v483_v54 = vsub.s32 2, %v4085_v21  ;;  %s3897_s15 = smov 80   ;;  %s3160_s0 = scalar_lea.sflag [#allocation3], %s429_s27 }
  0x24   : > { %622 = vmatprep.subr.bf16.mxu0 %v3683_v7 }
  0x25   : > { %3480 = vmatpush3.bf16.msra.mxu1 %v3699_v34  ;;  %v484_v56 = vrot.slane %v4091_v23, %v483_v54 }
  0x26   : > { %3481 = vmatprep.subr.bf16.mxu1 %v3893_v19 }
  0x27   : > { %623 = vmatpush1.bf16.msra.mxu0 %v3685_v8  ;;  %v3707_v8 = vld [vmem:[%s4586_s3 + $0x8] sm:$0xff]  }
  0x28   : > { %624 = vmatprep.subr.bf16.mxu0 %v3686_v9 }
  0x29   : > { %3482 = vmatpush3.bf16.msra.mxu1 %v3700_v35 }
  0x2a   : > { %3483 = vmatprep.subr.bf16.mxu1 %v3893_v19 }
  0x2b   : > { %625 = vmatpush1.bf16.msra.mxu0 %v3688_v10 }
  0x2c   : > { %626 = vmatprep.subr.bf16.mxu0 %v3689_v11 }
  0x2d   : > { %3484 = vmatpush3.bf16.msra.mxu1 %v3701_v36 }
  0x2e   : > { %3485 = vmatprep.subr.bf16.mxu1 %v3893_v19 }
  0x2f   : > { %627 = vmatpush1.bf16.msra.mxu0 %v3691_v12  ;;  %v3706_v12 = vld [vmem:[%s4586_s3] sm:$0xff]  }
  0x30   : > { %628 = vmatprep.subr.bf16.mxu0 %v3692_v13 }
  0x31   : > { %3486 = vmatpush3.bf16.msra.mxu1 %v3702_v37 }
  0x32   : > { %3487 = vmatprep.subr.bf16.mxu1 %v3893_v19 }
  0x33   : > { %629 = vmatpush1.bf16.msra.mxu0 %v3694_v14 }
  0x34   : > { %630 = vmatprep.subr.bf16.mxu0 %v3695_v15 }
  0x35   : > { %3488 = vmatpush3.bf16.msra.mxu1 %v3703_v38 }
  0x36   : > { %3489 = vmatprep.subr.bf16.mxu1 %v3893_v19 }
  0x37   : > { %631 = vmatpush1.bf16.msra.mxu0 %v3697_v16 }
  0x38   : > { %3497 = vmatprep.subr.mxu0 %v3893_v19 }
  0x39   : > { %3490 = vmatpush3.bf16.msra.mxu1 %v3704_v39 }
  0x3a   : > { %649 = vmatmul.mubr.bf16.vlgmr.msra.gmra.mxu0 %v438_v18  ;;  %3491 = vmatprep.subr.bf16.mxu1 %v3893_v19 }
  0x3b   : > { %3499 = vmatprep.mubr.msk.f32.mxu0 %vm3894_vm0, %v3893_v19 }
  0x3d   : > { %3492 = vmatpush3.bf16.msra.mxu1 %v3705_v40 }
  0x3e   : > { %3502 = vmatprep.subr.mxu1 %v3893_v19 }
  0x40   : > { %3494 = vmatmul.mubr.bf16.vlgmr.msra.gmra.mxu1 %v438_v18 }
  0x41   : > { %3504 = vmatprep.mubr.msk.f32.mxu1 %vm3894_vm0, %v3893_v19 }
  0xfa   : > { %v650_v26 = vpop.f32.mrf.mxu0 }
  0xfb   : > { %v4106_v31 = vadd.f32 %v650_v26, %v476_v27 }
  0xfc   : > { %v652_v28 = vpop.f32.mrf.mxu0 }
  0xfd   : > { %v4100_v29 = vadd.f32 %v652_v28, %v480_v25 }
  0xfe   : > { %v654_v30 = vpop.f32.mrf.mxu0 }
  0xff   : > { %865 = vrot.lane.b32.xlu0 %v4100_v29, %s3895_s22  ;;  %3498 = vmatpush3.xpose.msk.msra.mxu0 %vm697_vm1, %v4100_v29 }
 0x100   : > { %v655_v32 = vpop.f32.mrf.mxu0  ;;  %3507 = vmatprep.subr.mxu0 %v3893_v19  ;;  %v691_v55 = vpop.f32.mrf.mxu1 }
 0x101   : > { %v4160_v58 = vadd.f32 %v691_v55, %v484_v56 }
 0x102   : > { %3500 = vmatmul.mubr.msk.f32.vlgmr.msra.gmra.mxu0 %vm697_vm1, %v4106_v31  ;;  %v3495_v57 = vpop.f32.mrf.mxu1 }
 0x103   : > { %863 = vrot.lane.b32.xlu0 %v4106_v31, %s3895_s22  ;;  %3509 = vmatprep.mubr.msk.f32.mxu0 %vm3894_vm0, %v3893_v19 }
 0x104   : > { %v694_v59 = vpop.f32.mrf.mxu1  ;;  %3503 = vmatpush3.msra.mxu1 %v4160_v58 }
 0x105   : > { %3512 = vmatprep.subr.mxu1 %v3893_v19 }
 0x106   : > { %v3496_v60 = vpop.f32.mrf.mxu1 }
 0x171   : > { %v866_v41 = vpop.permute.xlu0 %865 }
 0x172   : > { %3508 = vmatpush3.xpose.msk.msra.mxu0 %vm697_vm1, %v866_v41 }
 0x173   : > { %3517 = vmatprep.subr.bf16.mxu0 %v3893_v19 }
 0x175   : > { %v864_v42 = vpop.permute.xlu0 %863 }
 0x176   : > { %3510 = vmatmul.mubr.msk.f32.vlgmr.msra.gmra.mxu0 %vm697_vm1, %v864_v42 }
 0x177   : > { %3519 = vmatprep.mubr.msk.bf16.mxu0 %vm3894_vm0, %v3893_v19  ;;  %3518 = vmatpush3.bf16.msra.mxu0 %v3707_v8 }
 0x178   : > { %3529 = vmatprep.subr.mxu0 %v3893_v19 }
 0x1c2   : > { %v770_v43 = vpop.f32.mrf.mxu0 }
 0x1c3   : > { %v774_v44 = vmul.f32 0.25, %v770_v43 }
 0x1c4   : > { %v3501_v45 = vpop.f32.mrf.mxu0 }
 0x1c5   : > { %v776_v46 = vsel %vm775_vm2, %v774_v44, -inf }
 0x1c6   : > { %777 = vmax.xlane.f32.xlu1 %v776_v46 }
 0x236   : > { %v937_v47 = vpop.f32.mrf.mxu0 }
 0x237   : > { %v941_v48 = vmul.f32 0.25, %v937_v47 }
 0x238   : > { %v3511_v49 = vpop.f32.mrf.mxu0 }
 0x239   : > { %v942_v50 = vsel %vm775_vm2, %v941_v48, -inf }
 0x23a   : > { %943 = vmax.xlane.f32.xlu1 %v942_v50 }
 0x24f   : > { %v778_v51 = vpop.xlane.xlu1 %777 }
 0x250   : > { %v779_v52 = vsub.f32 %v774_v44, %v778_v51 }
 0x252   : > { %v780_v53 = vmul.f32 1.442695, %v779_v52 }
 0x254   : > { %3794 = vpow2.f32 %v780_v53  ;;  %v3708_v53 = vld [vmem:[%s4586_s3 + $0x10] sm:$0xff]  }
 0x261   : > { %v3795_v61 = vpop.eup %3794 }
 0x262   : > { %v782_v62 = vsel %vm775_vm2, %v3795_v61, 0.0 }
 0x263   : > { %783 = vadd.xlane.f32.xlu0 %v782_v62 }
 0x279   : > { %1221 = vrot.lane.b32.xlu0 %v4160_v58, %s3896_s17 }
 0x2c3   : > { %v944_v63 = vpop.xlane.xlu1 %943 }
 0x2c4   : > { %v945_v0 = vsub.f32 %v941_v48, %v944_v63 }
 0x2c6   : > { %v946_v1 = vmul.f32 1.442695, %v945_v0 }
 0x2c8   : > { %3796 = vpow2.f32 %v946_v1 }
 0x2d5   : > { %v3797_v3 = vpop.eup %3796 }
 0x2d6   : > { %v948_v4 = vsel %vm775_vm2, %v3797_v3, 0.0 }
 0x2d7   : > { %949 = vadd.xlane.f32.xlu1 %v948_v4 }
 0x2e8   : > { %954 = vrot.lane.b32.xlu1 %v4160_v58, %s3895_s22  ;;  %s3171_s22 = scalar_lea.hbm %s4596_s13, %s3373_s20 }
 0x2ec   : > { %v784_v5 = vpop.xlane.xlu0 %783  ;;  %1133 = vrot.lane.b32.xlu1 %v4100_v29, %s3896_s17 }
 0x2ed   : > { %3798 = vrcp.f32 %v784_v5 }
 0x2f0   : > { %1131 = vrot.lane.b32.xlu1 %v4106_v31, %s3896_s17  ;;  %v1222_v18 = vpop.permute.xlu0 %1221  ;;  %s3900_s17 = smov 32  }
 0x2fa   : > { %v3799_v6 = vpop.eup %3798 }
 0x2fb   : > { %v786_v7 = vmul.f32 %v3799_v6, %v3795_v61 }
 0x2fd   : > { %3505 = vmatmul.mubr.msk.f32.vlgmr.msra.gmra.mxu1 %vm775_vm2, %v786_v7 }
 0x2fe   : > { %3514 = vmatprep.mubr.msk.f32.mxu1 %vm3894_vm0, %v3893_v19 }
 0x360   : > { %v950_v9 = vpop.xlane.xlu1 %949 }
 0x361   : > { %3800 = vrcp.f32 %v950_v9 }
 0x364   : > { %v955_v10 = vpop.permute.xlu1 %954 }
 0x365   : > { %3513 = vmatpush3.msra.mxu1 %v955_v10 }
 0x366   : > { %3523 = vmatprep.subr.bf16.mxu1 %v3893_v19 }
 0x368   : > { %v1134_v26 = vpop.permute.xlu1 %1133 }
 0x36c   : > { %v1132_v27 = vpop.permute.xlu1 %1131 }
 0x36e   : > { %v3801_v11 = vpop.eup %3800 }
 0x36f   : > { %v952_v13 = vmul.f32 %v3801_v11, %v3797_v3 }
 0x371   : > { %3515 = vmatmul.mubr.msk.f32.vlgmr.msra.gmra.mxu1 %vm775_vm2, %v952_v13 }
 0x372   : > { %3524 = vmatpush3.bf16.msra.mxu1 %v3706_v12  ;;  %3525 = vmatprep.mubr.msk.bf16.mxu1 %vm3894_vm0, %v3893_v19 }
 0x373   : > { %3534 = vmatprep.subr.mxu1 %v3893_v19 }
 0x3bd   : > { %v856_v14 = vpop.f32.mrf.mxu1 }
 0x3be   : > { %v860_v15 = vpack.c.bf16 %v856_v14, %v856_v14 }
 0x3bf   : > { %v3506_v16 = vpop.f32.mrf.mxu1 }
 0x3c0   : > { %3526 = vmatmul.mubr.msk.bf16.vlgmr.msra.gmra.mxu1 %vm697_vm1, %v860_v15 }
 0x3c1   : > { %3535 = vmatpush3.msra.mxu1 %v1222_v18  ;;  %3536 = vmatprep.mubr.msk.f32.mxu1 %vm3894_vm0, %v3893_v19  ;;  %v3709_v18 = vld [vmem:[%s4586_s3 + $0x18] sm:$0xff]  }
 0x3c2   : > { %3545 = vmatprep.subr.mxu1 %v3893_v19 }
 0x431   : > { %v1026_v20 = vpop.f32.mrf.mxu1 }
 0x432   : > { %v1030_v23 = vpack.c.bf16 %v1026_v20, %v1026_v20 }
 0x433   : > { %v3516_v25 = vpop.f32.mrf.mxu1 }
 0x434   : > { %3520 = vmatmul.mubr.msk.bf16.vlgmr.msra.gmra.mxu0 %vm697_vm1, %v1030_v23 }
 0x435   : > { %3530 = vmatpush3.xpose.msk.msra.mxu0 %vm697_vm1, %v1134_v26  ;;  %3531 = vmatprep.mubr.msk.f32.mxu0 %vm3894_vm0, %v3893_v19 }
 0x436   : > { %3539 = vmatprep.subr.bf16.mxu0 %v3893_v19 }
 0x43c   : > { %3532 = vmatmul.mubr.msk.f32.vlgmr.msra.gmra.mxu0 %vm697_vm1, %v1132_v27 }
 0x43d   : > { %3541 = vmatprep.mubr.msk.bf16.mxu0 %vm3894_vm0, %v3893_v19  ;;  %3540 = vmatpush3.bf16.msra.mxu0 %v3708_v53 }
 0x43e   : > { %3555 = vmatprep.subr.bf16.mxu0 %v3893_v19 }
 0x480   : > { %v4198_v28 = vpop.f32.mrf.mxu1 }
 0x482   : > { %v3527_v30 = vpop.f32.mrf.mxu1 }
 0x484   : > { %v1128_v32 = vpop.f32.mrf.mxu1 }
 0x486   : > { %v3528_v33 = vpop.f32.mrf.mxu1 }
 0x4f4   : > { %v1076_v34 = vpop.f32.mrf.mxu0 }
 0x4f5   : > { %v1126_v5 = vadd.f32 %v4198_v28, %v1076_v34 }
 0x4f6   : > { %v3521_v35 = vpop.f32.mrf.mxu0 }
 0x4f8   : > { %v1079_v36 = vpop.f32.mrf.mxu0 }
 0x4fa   : > { %v3522_v37 = vpop.f32.mrf.mxu0 }
 0x4fc   : > { %v1205_v38 = vpop.f32.mrf.mxu0 }
 0x4fd   : > { %v1209_v39 = vmul.f32 0.25, %v1205_v38 }
 0x4fe   : > { %v3533_v40 = vpop.f32.mrf.mxu0 }
 0x4ff   : > { %v1210_v41 = vsel %vm775_vm2, %v1209_v39, -inf }
 0x500   : > { %1211 = vmax.xlane.f32.xlu1 %v1210_v41 }
 0x511   : > { %1440 = vrot.lane.b32.xlu1 %v4160_v58, %s3897_s15 }
 0x515   : > { %1571 = vrot.lane.b32.xlu1 %v4100_v29, %s3898_s14 }
 0x589   : > { %v1212_v42 = vpop.xlane.xlu1 %1211 }
 0x58a   : > { %v1213_v43 = vsub.f32 %v1209_v39, %v1212_v42 }
 0x58c   : > { %v1214_v44 = vmul.f32 1.442695, %v1213_v43 }
 0x58d   : > { %v1441_v52 = vpop.permute.xlu1 %1440 }
 0x58e   : > { %3802 = vpow2.f32 %v1214_v44 }
 0x591   : > { %v1572_v11 = vpop.permute.xlu1 %1571 }
 0x59b   : > { %v3803_v45 = vpop.eup %3802 }
 0x59c   : > { %v1216_v46 = vsel %vm775_vm2, %v3803_v45, 0.0 }
 0x59d   : > { %1217 = vadd.xlane.f32.xlu0 %v1216_v46 }
 0x5b3   : > { %1352 = vrot.lane.b32.xlu0 %v4100_v29, %s3897_s15 }
 0x5b7   : > { %1350 = vrot.lane.b32.xlu0 %v4106_v31, %s3897_s15  ;;  %s3901_s15 = smov 16  }
 0x626   : > { %v1218_v47 = vpop.xlane.xlu0 %1217 }
 0x627   : > { %3804 = vrcp.f32 %v1218_v47 }
 0x62a   : > { %v1353_v49 = vpop.permute.xlu0 %1352 }
 0x62e   : > { %v1351_v51 = vpop.permute.xlu0 %1350 }
 0x634   : > { %v3805_v48 = vpop.eup %3804 }
 0x635   : > { %v1220_v50 = vmul.f32 %v3805_v48, %v3803_v45  ;;  %v3710_v48 = vld [vmem:[%s4586_s3 + $0x20] sm:$0xff]  }
 0x637   : > { %3537 = vmatmul.mubr.msk.f32.vlgmr.msra.gmra.mxu1 %vm775_vm2, %v1220_v50 }
 0x638   : > { %3546 = vmatpush3.xpose.msk.msra.mxu1 %vm697_vm1, %v1353_v49  ;;  %3547 = vmatprep.mubr.msk.f32.mxu1 %vm3894_vm0, %v3893_v19 }
 0x639   : > { %3550 = vmatprep.subr.mxu1 %v3893_v19 }
 0x63b   : > { %3548 = vmatmul.mubr.msk.f32.vlgmr.msra.gmra.mxu1 %vm697_vm1, %v1351_v51 }
 0x63c   : > { %3551 = vmatpush3.msra.mxu1 %v1441_v52  ;;  %3552 = vmatprep.mubr.msk.f32.mxu1 %vm3894_vm0, %v3893_v19 }
 0x63d   : > { %3561 = vmatprep.subr.mxu1 %v3893_v19 }
 0x6f7   : > { %v1293_v55 = vpop.f32.mrf.mxu1 }
 0x6f8   : > { %v1297_v56 = vpack.c.bf16 %v1293_v55, %v1293_v55 }
 0x6f9   : > { %v3538_v57 = vpop.f32.mrf.mxu1 }
 0x6fa   : > { %3542 = vmatmul.mubr.msk.bf16.vlgmr.msra.gmra.mxu0 %vm697_vm1, %v1297_v56 }
 0x6fb   : > { %v1424_v59 = vpop.f32.mrf.mxu1  ;;  %3557 = vmatprep.mubr.msk.bf16.mxu0 %vm3894_vm0, %v3893_v19  ;;  %3556 = vmatpush3.bf16.msra.mxu0 %v3709_v18 }
 0x6fc   : > { %v1428_v60 = vmul.f32 0.25, %v1424_v59  ;;  %3571 = vmatprep.subr.bf16.mxu0 %v3893_v19 }
 0x6fd   : > { %v3549_v61 = vpop.f32.mrf.mxu1 }
 0x6fe   : > { %v1429_v62 = vsel %vm775_vm2, %v1428_v60, -inf }
 0x6ff   : > { %1430 = vmax.xlane.f32.xlu0 %v1429_v62 }
 0x715   : > { %1659 = vrot.lane.b32.xlu0 %v4160_v58, %s3898_s14 }
 0x788   : > { %v1431_v63 = vpop.xlane.xlu0 %1430 }
 0x789   : > { %v1432_v0 = vsub.f32 %v1428_v60, %v1431_v63 }
 0x78b   : > { %v1433_v1 = vmul.f32 1.442695, %v1432_v0 }
 0x78c   : > { %v1660_v16 = vpop.permute.xlu0 %1659 }
 0x78d   : > { %3806 = vpow2.f32 %v1433_v1 }
 0x79a   : > { %v3807_v3 = vpop.eup %3806 }
 0x79b   : > { %v1435_v4 = vsel %vm775_vm2, %v3807_v3, 0.0 }
 0x79c   : > { %1436 = vadd.xlane.f32.xlu1 %v1435_v4 }
 0x7ad   : > { %1569 = vrot.lane.b32.xlu1 %v4106_v31, %s3898_s14  ;;  %s3902_s14 = smov [#allocation2]  }
 0x7ae   : > { %s3834_s30 = sshll.u32 %s3902_s14, 4  ;;  %s3835_s30 = int_to_ptr.vmem [resolvable:$false] %s3834_s30 }
 0x7af   : > { %s3836_s29 = scalar_lea.vmem %s3835_s30, 256 }
 0x7ba   : > { %v1343_v6 = vpop.f32.mrf.mxu0 }
 0x7bb   : > { %v1349_v7 = vadd.f32 %v1343_v6, %v1126_v5 }
 0x7bc   : > { %v3543_v8 = vpop.f32.mrf.mxu0 }
 0x7be   : > { %v1346_v9 = vpop.f32.mrf.mxu0 }
 0x7c0   : > { %v3544_v10 = vpop.f32.mrf.mxu0 }
 0x825   : > { %v1437_v12 = vpop.xlane.xlu1 %1436 }
 0x826   : > { %3808 = vrcp.f32 %v1437_v12 }
 0x829   : > { %v1570_v15 = vpop.permute.xlu1 %1569 }
 0x833   : > { %v3809_v13 = vpop.eup %3808 }
 0x834   : > { %v1439_v14 = vmul.f32 %v3809_v13, %v3807_v3 }
 0x836   : > { %3553 = vmatmul.mubr.msk.f32.vlgmr.msra.gmra.mxu1 %vm775_vm2, %v1439_v14 }
 0x837   : > { %3562 = vmatpush3.xpose.msk.msra.mxu1 %vm697_vm1, %v1572_v11  ;;  %3563 = vmatprep.mubr.msk.f32.mxu1 %vm3894_vm0, %v3893_v19  ;;  %v3711_v11 = vld [vmem:[%s4586_s3 + $0x28] sm:$0xff]  }
 0x838   : > { %3566 = vmatprep.subr.mxu1 %v3893_v19 }
 0x83a   : > { %3564 = vmatmul.mubr.msk.f32.vlgmr.msra.gmra.mxu1 %vm697_vm1, %v1570_v15 }
 0x83b   : > { %3567 = vmatpush3.msra.mxu1 %v1660_v16  ;;  %3568 = vmatprep.mubr.msk.f32.mxu1 %vm3894_vm0, %v3893_v19 }
 0x83c   : > { %3577 = vmatprep.subr.mxu1 %v3893_v19 }
 0x8f6   : > { %v1512_v20 = vpop.f32.mrf.mxu1 }
 0x8f7   : > { %v1516_v23 = vpack.c.bf16 %v1512_v20, %v1512_v20 }
 0x8f8   : > { %v3554_v25 = vpop.f32.mrf.mxu1 }
 0x8f9   : > { %3558 = vmatmul.mubr.msk.bf16.vlgmr.msra.gmra.mxu0 %vm697_vm1, %v1516_v23 }
 0x8fa   : > { %v1643_v26 = vpop.f32.mrf.mxu1  ;;  %3573 = vmatprep.mubr.msk.bf16.mxu0 %vm3894_vm0, %v3893_v19  ;;  %3572 = vmatpush3.bf16.msra.mxu0 %v3710_v48 }
 0x8fb   : > { %v1647_v27 = vmul.f32 0.25, %v1643_v26  ;;  %3587 = vmatprep.subr.bf16.mxu0 %v3893_v19 }
 0x8fc   : > { %v3565_v28 = vpop.f32.mrf.mxu1 }
 0x8fd   : > { %v1648_v30 = vsel %vm775_vm2, %v1647_v27, -inf }
 0x8fe   : > { %1649 = vmax.xlane.f32.xlu1 %v1648_v30 }
 0x90f   : > { %1878 = vrot.lane.b32.xlu1 %v4160_v58, %s3899_s21 }
 0x913   : > { %2009 = vrot.lane.b32.xlu1 %v4100_v29, %s3900_s17 }
 0x987   : > { %v1650_v32 = vpop.xlane.xlu1 %1649 }
 0x988   : > { %v1651_v33 = vsub.f32 %v1647_v27, %v1650_v32 }
 0x98a   : > { %v1652_v34 = vmul.f32 1.442695, %v1651_v33 }
 0x98b   : > { %v1879_v47 = vpop.permute.xlu1 %1878 }
 0x98c   : > { %3810 = vpow2.f32 %v1652_v34 }
 0x98f   : > { %v2010_v5 = vpop.permute.xlu1 %2009 }
 0x999   : > { %v3811_v35 = vpop.eup %3810 }
 0x99a   : > { %v1654_v36 = vsel %vm775_vm2, %v3811_v35, 0.0 }
 0x99b   : > { %1655 = vadd.xlane.f32.xlu0 %v1654_v36 }
 0x9b1   : > { %1790 = vrot.lane.b32.xlu0 %v4100_v29, %s3899_s21 }
 0x9b5   : > { %1788 = vrot.lane.b32.xlu0 %v4106_v31, %s3899_s21 }
 0x9b9   : > { %v1562_v37 = vpop.f32.mrf.mxu0 }
 0x9ba   : > { %v1568_v38 = vadd.f32 %v1562_v37, %v1349_v7 }
 0x9bb   : > { %v3559_v39 = vpop.f32.mrf.mxu0 }
 0x9bd   : > { %v1565_v40 = vpop.f32.mrf.mxu0 }
 0x9bf   : > { %v3560_v41 = vpop.f32.mrf.mxu0 }
 0xa24   : > { %v1656_v42 = vpop.xlane.xlu0 %1655 }
 0xa25   : > { %3812 = vrcp.f32 %v1656_v42 }
 0xa28   : > { %v1791_v44 = vpop.permute.xlu0 %1790 }
 0xa2c   : > { %v1789_v46 = vpop.permute.xlu0 %1788 }
 0xa32   : > { %v3813_v43 = vpop.eup %3812 }
 0xa33   : > { %v1658_v45 = vmul.f32 %v3813_v43, %v3811_v35 }
 0xa35   : > { %3569 = vmatmul.mubr.msk.f32.vlgmr.msra.gmra.mxu1 %vm775_vm2, %v1658_v45 }
 0xa36   : > { %3578 = vmatpush3.xpose.msk.msra.mxu1 %vm697_vm1, %v1791_v44  ;;  %3579 = vmatprep.mubr.msk.f32.mxu1 %vm3894_vm0, %v3893_v19 }
 0xa37   : > { %3582 = vmatprep.subr.mxu1 %v3893_v19 }
 0xa39   : > { %3580 = vmatmul.mubr.msk.f32.vlgmr.msra.gmra.mxu1 %vm697_vm1, %v1789_v46 }
 0xa3a   : > { %3583 = vmatpush3.msra.mxu1 %v1879_v47  ;;  %3584 = vmatprep.mubr.msk.f32.mxu1 %vm3894_vm0, %v3893_v19 }
 0xa3b   : > { %3593 = vmatprep.subr.mxu1 %v3893_v19 }
 0xaf5   : > { %v1731_v49 = vpop.f32.mrf.mxu1 }
 0xaf6   : > { %v1735_v50 = vpack.c.bf16 %v1731_v49, %v1731_v49 }
 0xaf7   : > { %v3570_v51 = vpop.f32.mrf.mxu1 }
 0xaf8   : > { %3574 = vmatmul.mubr.msk.bf16.vlgmr.msra.gmra.mxu0 %vm697_vm1, %v1735_v50 }
 0xaf9   : > { %v1862_v52 = vpop.f32.mrf.mxu1  ;;  %3589 = vmatprep.mubr.msk.bf16.mxu0 %vm3894_vm0, %v3893_v19  ;;  %3588 = vmatpush3.bf16.msra.mxu0 %v3711_v11  ;;  %v3717_v11 = vld [vmem:[%s4590_s7 + $0xe8] ss:$16 sps:$4 sm:$0xff]  }
 0xafa   : > { %v1866_v53 = vmul.f32 0.25, %v1862_v52  ;;  %3603 = vmatprep.subr.bf16.mxu0 %v3893_v19 }
 0xafb   : > { %v3581_v55 = vpop.f32.mrf.mxu1 }
 0xafc   : > { %v1867_v56 = vsel %vm775_vm2, %v1866_v53, -inf }
 0xafd   : > { %1868 = vmax.xlane.f32.xlu0 %v1867_v56 }
 0xb13   : > { %2097 = vrot.lane.b32.xlu0 %v4160_v58, %s3900_s17 }
 0xb86   : > { %v1869_v57 = vpop.xlane.xlu0 %1868 }
 0xb87   : > { %v1870_v59 = vsub.f32 %v1866_v53, %v1869_v57 }
 0xb89   : > { %v1871_v60 = vmul.f32 1.442695, %v1870_v59 }
 0xb8a   : > { %v2098_v10 = vpop.permute.xlu0 %2097 }
 0xb8b   : > { %3814 = vpow2.f32 %v1871_v60 }
 0xb98   : > { %v3815_v61 = vpop.eup %3814 }
 0xb99   : > { %v1873_v62 = vsel %vm775_vm2, %v3815_v61, 0.0 }
 0xb9a   : > { %1874 = vadd.xlane.f32.xlu1 %v1873_v62 }
 0xbab   : > { %2007 = vrot.lane.b32.xlu1 %v4106_v31, %s3900_s17 }
 0xbb8   : > { %v1781_v63 = vpop.f32.mrf.mxu0 }
 0xbb9   : > { %v1787_v0 = vadd.f32 %v1781_v63, %v1568_v38 }
 0xbba   : > { %v3575_v1 = vpop.f32.mrf.mxu0 }
 0xbbc   : > { %v1784_v3 = vpop.f32.mrf.mxu0 }
 0xbbd   : > { %v3302_v3 = vld [vmem:[%s4587_s4] ss:$0 sm:$0xff] }
 0xbbe   : > { %v3576_v4 = vpop.f32.mrf.mxu0 }
 0xc23   : > { %v1875_v6 = vpop.xlane.xlu1 %1874 }
 0xc24   : > { %3816 = vrcp.f32 %v1875_v6 }
 0xc27   : > { %v2008_v9 = vpop.permute.xlu1 %2007 }
 0xc31   : > { %v3817_v7 = vpop.eup %3816 }
 0xc32   : > { %v1877_v8 = vmul.f32 %v3817_v7, %v3815_v61 }
 0xc34   : > { %3585 = vmatmul.mubr.msk.f32.vlgmr.msra.gmra.mxu1 %vm775_vm2, %v1877_v8 }
 0xc35   : > { %3594 = vmatpush3.xpose.msk.msra.mxu1 %vm697_vm1, %v2010_v5  ;;  %3595 = vmatprep.mubr.msk.f32.mxu1 %vm3894_vm0, %v3893_v19 }
 0xc36   : > { %3598 = vmatprep.subr.mxu1 %v3893_v19 }
 0xc38   : > { %3596 = vmatmul.mubr.msk.f32.vlgmr.msra.gmra.mxu1 %vm697_vm1, %v2008_v9 }
 0xc39   : > { %3599 = vmatpush3.msra.mxu1 %v2098_v10  ;;  %3600 = vmatprep.mubr.msk.f32.mxu1 %vm3894_vm0, %v3893_v19  ;;  %v3714_v10 = vld [vmem:[%s4590_s7 + $0xe0] ss:$16 sps:$4 sm:$0xff]  }
 0xc3a   : > { %3609 = vmatprep.subr.mxu1 %v3893_v19 }
 0xcf4   : > { %v1950_v12 = vpop.f32.mrf.mxu1 }
 0xcf5   : > { %v1954_v13 = vpack.c.bf16 %v1950_v12, %v1950_v12  ;;  %v3719_v12 = vld [vmem:[%s4590_s7 + $0xec] ss:$16 sps:$4 sm:$0xff]  }
 0xcf6   : > { %v3586_v14 = vpop.f32.mrf.mxu1 }
 0xcf7   : > { %3590 = vmatmul.mubr.msk.bf16.vlgmr.msra.gmra.mxu0 %vm697_vm1, %v1954_v13  ;;  %v3725_v13 = vld [vmem:[%s4590_s7 + $0xcc] ss:$16 sps:$4 sm:$0xff]   ;;  %v3720_v14 = vld [vmem:[%s4590_s7 + $0xc0] ss:$16 sps:$4 sm:$0xff]  }
 0xcf8   : > { %v2081_v15 = vpop.f32.mrf.mxu1  ;;  %3605 = vmatprep.mubr.msk.bf16.mxu0 %vm3894_vm0, %v3893_v19 }
 0xcf9   : > { %v2085_v16 = vmul.f32 0.25, %v2081_v15  ;;  %v3723_v15 = vld [vmem:[%s4590_s7 + $0xc8] ss:$16 sps:$4 sm:$0xff]  }
 0xcfa   : > { %v3597_v18 = vpop.f32.mrf.mxu1 }
 0xcfb   : > { %v2086_v20 = vsel %vm775_vm2, %v2085_v16, -inf }
 0xcfc   : > { %2087 = vmax.xlane.f32.xlu1 %v2086_v20 }
 0xd85   : > { %v2088_v23 = vpop.xlane.xlu1 %2087 }
 0xd86   : > { %v2089_v25 = vsub.f32 %v2085_v16, %v2088_v23 }
 0xd88   : > { %v2090_v26 = vmul.f32 1.442695, %v2089_v25  ;;  %v3728_v25 = vld [vmem:[%s4590_s7 + $0xa4] ss:$16 sps:$4 sm:$0xff]  }
 0xd8a   : > { %3818 = vpow2.f32 %v2090_v26  ;;  %v3731_v26 = vld [vmem:[%s4590_s7 + $0xac] ss:$16 sps:$4 sm:$0xff]  }
 0xd97   : > { %v3819_v27 = vpop.eup %3818 }
 0xd98   : > { %v2092_v28 = vsel %vm775_vm2, %v3819_v27, 0.0 }
 0xd99   : > { %2093 = vadd.xlane.f32.xlu0 %v2092_v28  ;;  %v3729_v28 = vld [vmem:[%s4590_s7 + $0xa8] ss:$16 sps:$4 sm:$0xff]  }
 0xdaf   : > { %2228 = vrot.lane.b32.xlu0 %v4100_v29, %s3901_s15 }
 0xdb3   : > { %2226 = vrot.lane.b32.xlu0 %v4106_v31, %s3901_s15  ;;  %v3712_v31 = vld [vmem:[%s4586_s3 + $0x30] sm:$0xff]  }
 0xdb4   : > { %3604 = vmatpush3.bf16.msra.mxu0 %v3712_v31  ;;  %v3744_v31 = vld [vmem:[%s4590_s7 + $0x40] ss:$16 sps:$4 sm:$0xff]  }
 0xdb5   : > { %3619 = vmatprep.subr.bf16.mxu0 %v3893_v19 }
 0xdb7   : > { %v2000_v30 = vpop.f32.mrf.mxu0 }
 0xdb8   : > { %v2006_v32 = vadd.f32 %v2000_v30, %v1787_v0  ;;  %v3732_v30 = vld [vmem:[%s4590_s7 + $0x80] ss:$16 sps:$4 sm:$0xff]  }
 0xdb9   : > { %v3591_v33 = vpop.f32.mrf.mxu0 }
 0xdba   : > { %v3735_v33 = vld [vmem:[%s4590_s7 + $0x88] ss:$16 sps:$4 sm:$0xff]  }
 0xdbb   : > { %v2003_v34 = vpop.f32.mrf.mxu0 }
 0xdbc   : > { %v3737_v34 = vld [vmem:[%s4590_s7 + $0x8c] ss:$16 sps:$4 sm:$0xff]  }
 0xdbd   : > { %v3592_v35 = vpop.f32.mrf.mxu0 }
 0xdbe   : > { %v3740_v35 = vld [vmem:[%s4590_s7 + $0x64] ss:$16 sps:$4 sm:$0xff]  }
 0xe22   : > { %v2094_v36 = vpop.xlane.xlu0 %2093 }
 0xe23   : > { %3820 = vrcp.f32 %v2094_v36  ;;  %v3743_v36 = vld [vmem:[%s4590_s7 + $0x6c] ss:$16 sps:$4 sm:$0xff]  }
 0xe26   : > { %v2229_v38 = vpop.permute.xlu0 %2228 }
 0xe2a   : > { %v2227_v29 = vpop.permute.xlu0 %2226 }
 0xe30   : > { %v3821_v37 = vpop.eup %3820 }
 0xe31   : > { %v2096_v39 = vmul.f32 %v3821_v37, %v3819_v27  ;;  %v3726_v27 = vld [vmem:[%s4590_s7 + $0xa0] ss:$16 sps:$4 sm:$0xff]  }
 0xe32   : > { %v3738_v37 = vld [vmem:[%s4590_s7 + $0x60] ss:$16 sps:$4 sm:$0xff]  }
 0xe33   : > { %3601 = vmatmul.mubr.msk.f32.vlgmr.msra.gmra.mxu1 %vm775_vm2, %v2096_v39  ;;  %v3746_v39 = vld [vmem:[%s4590_s7 + $0x44] ss:$16 sps:$4 sm:$0xff]  }
 0xe34   : > { %3610 = vmatpush3.xpose.msk.msra.mxu1 %vm697_vm1, %v2229_v38  ;;  %3611 = vmatprep.mubr.msk.f32.mxu1 %vm3894_vm0, %v3893_v19  ;;  %v3741_v38 = vld [vmem:[%s4590_s7 + $0x68] ss:$16 sps:$4 sm:$0xff]  }
 0xe35   : > { %3614 = vmatprep.subr.mxu1 %v3893_v19 }
 0xe37   : > { %3612 = vmatmul.mubr.msk.f32.vlgmr.msra.gmra.mxu1 %vm697_vm1, %v2227_v29  ;;  %v3749_v29 = vld [vmem:[%s4590_s7 + $0x4c] ss:$16 sps:$4 sm:$0xff]  }
 0xe38   : > { %3616 = vmatprep.mubr.msk.f32.mxu1 %vm3894_vm0, %v3893_v19 }
 0xef3   : > { %v2169_v40 = vpop.f32.mrf.mxu1 }
 0xef4   : > { %v2173_v41 = vpack.c.bf16 %v2169_v40, %v2169_v40  ;;  %v3747_v40 = vld [vmem:[%s4590_s7 + $0x48] ss:$16 sps:$4 sm:$0xff]  }
 0xef5   : > { %v3602_v42 = vpop.f32.mrf.mxu1 }
 0xef6   : > { %3606 = vmatmul.mubr.msk.bf16.vlgmr.msra.gmra.mxu0 %vm697_vm1, %v2173_v41  ;;  %v3752_v41 = vld [vmem:[%s4590_s7 + $0x24] ss:$16 sps:$4 sm:$0xff]   ;;  %v3755_v42 = vld [vmem:[%s4590_s7 + $0x2c] ss:$16 sps:$4 sm:$0xff]  }
 0xef7   : > { %v2300_v43 = vpop.f32.mrf.mxu1  ;;  %3621 = vmatprep.mubr.msk.bf16.mxu0 %vm3894_vm0, %v3893_v19  ;;  %v3713_v19 = vld [vmem:[%s4586_s3 + $0x38] sm:$0xff]  }
 0xef8   : > { %v2304_v44 = vmul.f32 0.25, %v2300_v43  ;;  %3620 = vmatpush3.bf16.msra.mxu0 %v3713_v19  ;;  %v3750_v43 = vld [vmem:[%s4590_s7 + $0x20] ss:$16 sps:$4 sm:$0xff]  }
 0xef9   : > { %v3613_v45 = vpop.f32.mrf.mxu1  ;;  %2738 = vmatprep.subr.bf16.mxu0 %v3719_v12  ;;  %v3779_v12 = vld [vmem:[%s4592_s9 + $0xd8] sm:$0xff]  }
 0xefa   : > { %v2305_v46 = vsel %vm775_vm2, %v2304_v44, -inf  ;;  %v3758_v45 = vld [vmem:[%s4590_s7 + $0x4] ss:$16 sps:$4 sm:$0xff]  }
 0xefb   : > { %2306 = vmax.xlane.f32.xlu0 %v2305_v46  ;;  %v3761_v46 = vld [vmem:[%s4590_s7 + $0xc] ss:$16 sps:$4 sm:$0xff]  }
 0xf84   : > { %v2307_v47 = vpop.xlane.xlu0 %2306 }
 0xf85   : > { %v2308_v48 = vsub.f32 %v2304_v44, %v2307_v47  ;;  %v3753_v44 = vld [vmem:[%s4590_s7 + $0x28] ss:$16 sps:$4 sm:$0xff]   ;;  %v3756_v47 = vld [vmem:[%s4590_s7] ss:$16 sps:$4 sm:$0xff]  }
 0xf87   : > { %v2309_v49 = vmul.f32 1.442695, %v2308_v48  ;;  %v3759_v48 = vld [vmem:[%s4590_s7 + $0x8] ss:$16 sps:$4 sm:$0xff]  }
 0xf89   : > { %3822 = vpow2.f32 %v2309_v49  ;;  %v3762_v49 = vld [vmem:[%s4592_s9 + $0x78] sm:$0xff]  }
 0xf96   : > { %v3823_v50 = vpop.eup %3822 }
 0xf97   : > { %v2311_v51 = vsel %vm775_vm2, %v3823_v50, 0.0 }
 0xf98   : > { %2312 = vadd.xlane.f32.xlu1 %v2311_v51 }
 0xfa9   : > { %2316 = vrot.lane.b32.xlu1 %v4160_v58, %s3901_s15  ;;  %s3236_s15 = sshll.u32 %s429_s27, 3 }
 0xfaa   : > { %s431_s21 = scalar_lea.vmem [#allocation2], %s3236_s15 }
 0xfab   : > { %s3173_s17 = sshll.u32 %s431_s21, 4  ;;  %s3174_s17 = int_to_ptr.vmem [resolvable:$true] %s3173_s17 }
 0xfac   : > { %s3830_s1 = scalar_lea.vmem %s3174_s17, 128  ;;  %p3837_p0 = scmp.lt.s32.totalorder %s3174_s17, %s3835_s30 }
 0xfad   : > { %p3831_p11 = scmp.ne.s32.totalorder %s3174_s17, %s3830_s1  ;;  %p3838_p1 = scmp.lt.s32.totalorder %s3836_s29, %s3830_s1 }
 0xfaf   : > { %p3832_p12 = pnand %p3831_p11, %p4011_p5  ;;  %p3839_p2 = por %p3838_p1, %p3837_p0 }
 0xfb1   : > { %p3833_p13 = pneg %p3832_p12 }
 0xfb3   : > { %p3840_p3 = pnand %p3839_p2, %p3833_p13 }
 0xfb6   : > { %v2219_v52 = vpop.f32.mrf.mxu0 }
 0xfb7   : > { %v2225_v53 = vadd.f32 %v2219_v52, %v2006_v32  ;;  %v3734_v32 = vld [vmem:[%s4590_s7 + $0x84] ss:$16 sps:$4 sm:$0xff]  }
 0xfb8   : > { %v3607_v55 = vpop.f32.mrf.mxu0 }
 0xfb9   : > { %v3303_v55 = vld [vmem:[%s4588_s5] ss:$0 sm:$0xff] }
 0xfba   : > { %v2222_v56 = vpop.f32.mrf.mxu0 }
 0xfbc   : > { %v3608_v57 = vpop.f32.mrf.mxu0 }
 0xfbd   : > { %v3304_v57 = vld [vmem:[%s4589_s6] ss:$0 sm:$0xff] }
0x1021   : > { %v2313_v59 = vpop.xlane.xlu1 %2312 }
0x1022   : > { %3824 = vrcp.f32 %v2313_v59 }
0x1025   : > { %v2317_v60 = vpop.permute.xlu1 %2316 }
0x1026   : > { %3615 = vmatpush3.msra.mxu1 %v2317_v60 }
0x102f   : > { %v3825_v61 = vpop.eup %3824 }
0x1030   : > { %v2315_v62 = vmul.f32 %v3825_v61, %v3823_v50  ;;  %v3763_v50 = vld [vmem:[%s4592_s9 + $0xf8] sm:$0xff]  }
0x1031   : > { %v3764_v61 = vld [vmem:[%s4592_s9 + $0x38] sm:$0xff]  }
0x1032   : > { %3617 = vmatmul.mubr.msk.f32.vlgmr.msra.gmra.mxu1 %vm775_vm2, %v2315_v62  ;;  %v3765_v62 = vld [vmem:[%s4592_s9 + $0xb8] sm:$0xff]  }
0x1033   : > { %2729 = vmatprep.mubr.bf16.mxu1 %v3892_v2 }
0x10f2   : > { %v2388_v58 = vpop.f32.mrf.mxu1 }
0x10f3   : > { %v2392_v63 = vpack.c.bf16 %v2388_v58, %v2388_v58 }
0x10f4   : > { %v3618_v0 = vpop.f32.mrf.mxu1 }
0x10f5   : > { %3622 = vmatmul.mubr.msk.bf16.vlgmr.msra.gmra.mxu0 %vm697_vm1, %v2392_v63  ;;  %v3766_v63 = vld [vmem:[%s4592_s9 + $0x70] sm:$0xff]  }
0x10f6   : > { %2770 = vmatprep.mubr.bf16.mxu0 %v3892_v2  ;;  %v3716_v2 = vld [vmem:[%s4590_s7 + $0xe4] ss:$16 sps:$4 sm:$0xff]   ;;  %2739 = vmatpush1.bf16.msra.mxu0 %v3717_v11  ;;  %v3778_v11 = vld [vmem:[%s4592_s9 + $0x58] sm:$0xff]  }
0x10f7   : > { %2697 = vmatprep.subr.bf16.mxu1 %v3716_v2  ;;  %2740 = vmatprep.subr.bf16.mxu0 %v3725_v13  ;;  %v3767_v0 = vld [vmem:[%s4592_s9 + $0xf0] sm:$0xff]   ;;  %v3777_v2 = vld [vmem:[%s4592_s9 + $0xa0] sm:$0xff]   ;;  %v3781_v13 = vld [vmem:[%s4592_s9 + $0x98] sm:$0xff]  }
0x10f8   : > { %2698 = vmatpush1.bf16.msra.mxu1 %v3714_v10  ;;  %v3776_v10 = vld [vmem:[%s4592_s9 + $0x20] sm:$0xff]  }
0x10fa   : > { %2741 = vmatpush1.bf16.msra.mxu0 %v3723_v15  ;;  %v3783_v15 = vld [vmem:[%s4592_s9 + $0xd0] sm:$0xff]  }
0x10fb   : > { %2742 = vmatprep.subr.bf16.mxu0 %v3731_v26  ;;  %v3789_v26 = vld [vmem:[%s4592_s9 + $0x88] sm:$0xff]  }
0x10fe   : > { %2743 = vmatpush1.bf16.msra.mxu0 %v3729_v28  ;;  %v3791_v28 = vld [vmem:[%s4592_s9 + $0xc0] sm:$0xff]  }
0x10ff   : > { %2744 = vmatprep.subr.bf16.mxu0 %v3737_v34  ;;  %v2531_v34 = vsub.s32 3, %v4085_v21 }
0x1102   : > { %2745 = vmatpush1.bf16.msra.mxu0 %v3735_v33  ;;  %v2515_v33 = vld [vmem:[%s4591_s8] sm:$0xf] }
0x1103   : > { %2746 = vmatprep.subr.bf16.mxu0 %v3743_v36  ;;  %v2528_v36 = vrot.slane %v2515_v33, %v483_v54 }
0x1106   : > { %2747 = vmatpush1.bf16.msra.mxu0 %v3741_v38  ;;  %v2532_v38 = vrot.slane %v2515_v33, %v2531_v34 }
0x1107   : > { %2748 = vmatprep.subr.bf16.mxu0 %v3749_v29 }
0x110a   : > { %2749 = vmatpush1.bf16.msra.mxu0 %v3747_v40 }
0x110b   : > { %2750 = vmatprep.subr.bf16.mxu0 %v3755_v42 }
0x110e   : > { %2751 = vmatpush1.bf16.msra.mxu0 %v3753_v44 }
0x110f   : > { %2752 = vmatprep.subr.bf16.mxu0 %v3761_v46 }
0x1112   : > { %2753 = vmatpush1.bf16.msra.mxu0 %v3759_v48 }
0x1113   : > { %3455 = vmatprep.subr.bf16.mxu0 %v3763_v50 }
0x11b5   : > { %v2438_v1 = vpop.f32.mrf.mxu0 }
0x11b6   : > { %v2444_v4 = vadd.f32 %v2438_v1, %v2225_v53  ;;  %v3768_v1 = vld [vmem:[%s4592_s9 + $0x30] sm:$0xff]  }
0x11b7   : > { %v3623_v5 = vpop.f32.mrf.mxu0 }
0x11b8   : > { %v2452_v6 = vadd.f32 %v3302_v3, %v2444_v4  ;;  %v3769_v3 = vld [vmem:[%s4592_s9 + $0xb0] sm:$0xff]   ;;  %v3770_v4 = vld [vmem:[%s4592_s9 + $0x68] sm:$0xff]  }
0x11b9   : > { %v2441_v7 = vpop.f32.mrf.mxu0  ;;  %v3771_v5 = vld [vmem:[%s4592_s9 + $0xe8] sm:$0xff]  }
0x11ba   : > { %v2453_v8 = vadd.f32 %v2452_v6, %v4075_v17  ;;  %v3722_v17 = vld [vmem:[%s4590_s7 + $0xc4] ss:$16 sps:$4 sm:$0xff]   ;;  %v3772_v6 = vld [vmem:[%s4592_s9 + $0x28] sm:$0xff]  }
0x11bb   : > { %v3624_v9 = vpop.f32.mrf.mxu0  ;;  %2699 = vmatprep.subr.bf16.mxu1 %v3722_v17  ;;  %v3773_v7 = vld [vmem:[%s4592_s9 + $0xa8] sm:$0xff]   ;;  %v3780_v17 = vld [vmem:[%s4592_s9 + $0x18] sm:$0xff]  }
0x11bc   : > { %2454 = vadd.xlane.f32.xlu1 %v2453_v8  ;;  %2700 = vmatpush1.bf16.msra.mxu1 %v3720_v14  ;;  %v3775_v9 = vld [vmem:[%s4592_s9 + $0xe0] sm:$0xff]   ;;  %v3782_v14 = vld [vmem:[%s4592_s9 + $0x50] sm:$0xff]  }
0x11bd   : > { %2701 = vmatprep.subr.bf16.mxu1 %v3728_v25  ;;  %v3788_v25 = vld [vmem:[%s4592_s9 + $0x8] sm:$0xff]  }
0x11c0   : > { %2702 = vmatpush1.bf16.msra.mxu1 %v3726_v27  ;;  %v3790_v27 = vld [vmem:[%s4592_s9 + $0x40] sm:$0xff]  }
0x11c1   : > { %2703 = vmatprep.subr.bf16.mxu1 %v3734_v32  ;;  %v3793_v32 = vld [vmem:[%s4592_s9 + $0x80] sm:$0xff]  }
0x11c4   : > { %2704 = vmatpush1.bf16.msra.mxu1 %v3732_v30  ;;  %v3792_v30 = vld [vmem:[%s4592_s9] sm:$0xff]  }
0x11c5   : > { %2705 = vmatprep.subr.bf16.mxu1 %v3740_v35  ;;  %v2520_v35 = vrot.slane %v2515_v33, %v475_v24 }
0x11c8   : > { %2706 = vmatpush1.bf16.msra.mxu1 %v3738_v37  ;;  %v2524_v37 = vrot.slane %v2515_v33, %v479_v22 }
0x11c9   : > { %2707 = vmatprep.subr.bf16.mxu1 %v3746_v39 }
0x11cc   : > { %2708 = vmatpush1.bf16.msra.mxu1 %v3744_v31 }
0x11cd   : > { %2709 = vmatprep.subr.bf16.mxu1 %v3752_v41 }
0x11d0   : > { %2710 = vmatpush1.bf16.msra.mxu1 %v3750_v43 }
0x11d1   : > { %2711 = vmatprep.subr.bf16.mxu1 %v3758_v45 }
0x11d4   : > { %2712 = vmatpush1.bf16.msra.mxu1 %v3756_v47 }
0x11d5   : > { %3433 = vmatprep.subr.bf16.mxu1 %v3762_v49 }
0x1245   : > { %v2455_v16 = vpop.xlane.xlu1 %2454 }
0x1246   : > { %v2457_v18 = vmul.f32 0.0078125, %v2455_v16  ;;  %v3784_v16 = vld [vmem:[%s4592_s9 + $0x10] sm:$0xff]  }
0x1248   : > { %v2458_v20 = vsub.f32 %v2453_v8, %v2457_v18  ;;  %v3774_v8 = vld [vmem:[%s4592_s9 + $0x60] sm:$0xff]   ;;  %v3785_v18 = vld [vmem:[%s4592_s9 + $0x90] sm:$0xff]  }
0x124a   : > { %v2459_v23 = vmul.f32 %v2458_v20, %v2458_v20 }
0x124c   : > { %2460 = vadd.xlane.f32.xlu0 %v2459_v23  ;;  %v3787_v23 = vld [vmem:[%s4592_s9 + $0xc8] sm:$0xff]  }
0x12d5   : > { %v2461_v51 = vpop.xlane.xlu0 %2460 }
0x12d6   : > { %v2462_v19 = vmul.f32 0.0078125, %v2461_v51 }
0x12d8   : > { %v2463_v52 = vadd.f32 1e-05, %v2462_v19 }
0x12da   : > { %3826 = vrsqrt.f32 %v2463_v52 }
0x12e7   : > { %v3827_v53 = vpop.eup %3826 }
0x12e8   : > { %v2465_v56 = vmul.f32 %v3827_v53, %v2458_v20  ;;  %v3786_v20 = vld [vmem:[%s4592_s9 + $0x48] sm:$0xff]  }
0x12ea   : > { %v2473_v59 = vmul.f32 %v3303_v55, %v2465_v56  ;;  %v3337_v55 = vld [vmem:[%s4593_s10] ss:$0 sm:$0xff] }
0x12ec   : > { %v4435_v60 = vadd.f32 %v3304_v57, %v2473_v59 }
0x12ee   : > { %v2482_v58 = vpack.c.bf16 %v4435_v60, %v4435_v60 }
0x12f0   : > { %2730 = vmatmul.mubr.bf16.vlgmr.msra.gmra.mxu1 %v2482_v58  ;;  %2771 = vmatmul.mubr.bf16.vlgmr.msra.gmra.mxu0 %v2482_v58 }
0x12f1   : > { %3434 = vmatpush3.bf16.msra.mxu1 %v3764_v61  ;;  %3456 = vmatpush3.bf16.msra.mxu0 %v3765_v62 }
0x12f2   : > { %3435 = vmatprep.subr.bf16.mxu1 %v3766_v63  ;;  %3457 = vmatprep.subr.bf16.mxu0 %v3767_v0 }
0x12f5   : > { %3436 = vmatpush3.bf16.msra.mxu1 %v3768_v1  ;;  %3458 = vmatpush3.bf16.msra.mxu0 %v3769_v3 }
0x12f6   : > { %3437 = vmatprep.subr.bf16.mxu1 %v3770_v4  ;;  %3459 = vmatprep.subr.bf16.mxu0 %v3771_v5 }
0x12f9   : > { %3438 = vmatpush3.bf16.msra.mxu1 %v3772_v6  ;;  %3460 = vmatpush3.bf16.msra.mxu0 %v3773_v7 }
0x12fa   : > { %3439 = vmatprep.subr.bf16.mxu1 %v3774_v8  ;;  %3461 = vmatprep.subr.bf16.mxu0 %v3775_v9 }
0x12fd   : > { %3440 = vmatpush3.bf16.msra.mxu1 %v3776_v10  ;;  %3462 = vmatpush3.bf16.msra.mxu0 %v3777_v2 }
0x12fe   : > { %3441 = vmatprep.subr.bf16.mxu1 %v3778_v11  ;;  %3463 = vmatprep.subr.bf16.mxu0 %v3779_v12  ;;  %v3370_v12 = vld [vmem:[%s4594_s11] ss:$0 sm:$0xff] }
0x1301   : > { %3442 = vmatpush3.bf16.msra.mxu1 %v3780_v17  ;;  %3464 = vmatpush3.bf16.msra.mxu0 %v3781_v13  ;;  %v3371_v17 = vld [vmem:[%s4595_s12] ss:$0 sm:$0xff] }
0x1302   : > { %3443 = vmatprep.subr.bf16.mxu1 %v3782_v14  ;;  %3465 = vmatprep.subr.bf16.mxu0 %v3783_v15 }
0x1305   : > { %3444 = vmatpush3.bf16.msra.mxu1 %v3784_v16  ;;  %3466 = vmatpush3.bf16.msra.mxu0 %v3785_v18 }
0x1306   : > { %3445 = vmatprep.subr.bf16.mxu1 %v3786_v20  ;;  %3467 = vmatprep.subr.bf16.mxu0 %v3787_v23 }
0x1309   : > { %3446 = vmatpush3.bf16.msra.mxu1 %v3788_v25  ;;  %3468 = vmatpush3.bf16.msra.mxu0 %v3789_v26 }
0x130a   : > { %3447 = vmatprep.subr.bf16.mxu1 %v3790_v27  ;;  %3469 = vmatprep.subr.bf16.mxu0 %v3791_v28 }
0x130d   : > { %3448 = vmatpush3.bf16.msra.mxu1 %v3792_v30  ;;  %3470 = vmatpush3.bf16.msra.mxu0 %v3793_v32 }
0x13b0   : > { %v2731_v39 = vpop.f32.mrf.mxu1  ;;  %v2772_v29 = vpop.f32.mrf.mxu0 }
0x13b1   : > { %v2732_v31 = vadd.f32 %v2731_v39, %v2520_v35  ;;  %v2773_v40 = vadd.f32 %v2772_v29, %v2528_v36 }
0x13b2   : > { %v2733_v41 = vpop.f32.mrf.mxu1  ;;  %v2774_v42 = vpop.f32.mrf.mxu0 }
0x13b3   : > { %v2734_v43 = vadd.f32 %v2733_v41, %v2524_v37  ;;  %v2775_v44 = vadd.f32 %v2774_v42, %v2532_v38  ;;  %v2779_v45 = vmax.f32 %v2732_v31, 0.0  ;;  %v2781_v46 = vmax.f32 %v2773_v40, 0.0 }
0x13b4   : > { %v2735_v47 = vpop.f32.mrf.mxu1  ;;  %v2776_v48 = vpop.f32.mrf.mxu0 }
0x13b5   : > { %v2780_v24 = vmax.f32 %v2734_v43, 0.0  ;;  %v2782_v49 = vmax.f32 %v2775_v44, 0.0  ;;  %v2783_v22 = vpack.c.bf16 %v2779_v45, %v2779_v45  ;;  %v2785_v19 = vpack.c.bf16 %v2781_v46, %v2781_v46 }
0x13b6   : > { %v2736_v50 = vpop.f32.mrf.mxu1  ;;  %v2777_v54 = vpop.f32.mrf.mxu0 }
0x13b7   : > { %v2784_v51 = vpack.c.bf16 %v2780_v24, %v2780_v24  ;;  %v2786_v21 = vpack.c.bf16 %v2782_v49, %v2782_v49 }
0x13b9   : > { %3082 = vmatprep.mubr.bf16.mxu1 %v2784_v51  ;;  %3122 = vmatprep.mubr.bf16.mxu0 %v2786_v21 }
0x13ba   : > { %3083 = vmatmul.mubr.bf16.vlgmr.msra.gmra.mxu1 %v2783_v22  ;;  %3123 = vmatmul.mubr.bf16.vlgmr.msra.gmra.mxu0 %v2785_v19 }
0x147a   : > { %v3449_v52 = vpop.f32.mrf.mxu1  ;;  %v3471_v53 = vpop.f32.mrf.mxu0 }
0x147c   : > { %v3450_v56 = vpop.f32.mrf.mxu1  ;;  %v3472_v57 = vpop.f32.mrf.mxu0 }
0x147d   : > { %v3451_v59 = vadd.f32 %v3450_v56, %v3449_v52  ;;  %v3473_v63 = vadd.f32 %v3472_v57, %v3471_v53 }
0x147e   : > { %v3452_v61 = vpop.f32.mrf.mxu1  ;;  %v3474_v62 = vpop.f32.mrf.mxu0 }
0x147f   : > { %v3085_v58 = vadd.f32 %v3451_v59, %v3337_v55 }
0x1480   : > { %v3453_v0 = vpop.f32.mrf.mxu1  ;;  %v3475_v1 = vpop.f32.mrf.mxu0 }
0x1481   : > { %v3125_v3 = vadd.f32 %v3473_v63, %v3085_v58 }
0x1483   : > { %v3130_v4 = vadd.f32 %v3125_v3, %v4435_v60 }
0x1485   : > { %3131 = vadd.xlane.f32.xlu0 %v3130_v4 }
0x150e   : > { %v3132_v5 = vpop.xlane.xlu0 %3131 }
0x150f   : > { %v3133_v6 = vmul.f32 0.0078125, %v3132_v5 }
0x1511   : > { %v3134_v7 = vsub.f32 %v3130_v4, %v3133_v6 }
0x1513   : > { %v3135_v8 = vmul.f32 %v3134_v7, %v3134_v7 }
0x1515   : > { %3136 = vadd.xlane.f32.xlu0 %v3135_v8 }
0x159e   : > { %v3137_v9 = vpop.xlane.xlu0 %3136 }
0x159f   : > { %v3138_v10 = vmul.f32 0.0078125, %v3137_v9 }
0x15a1   : > { %v3139_v2 = vadd.f32 1e-05, %v3138_v10 }
0x15a3   : > { %3828 = vrsqrt.f32 %v3139_v2 }
0x15b0   : > { %v3829_v11 = vpop.eup %3828 }
0x15b1   : > { %v3141_v60 = vmul.f32 %v3829_v11, %v3134_v7 }
0x15b3   : > { %v3149_v13 = vmul.f32 %v3370_v12, %v3141_v60 }
0x15b5   : > { %v3157_v14 = vadd.f32 %v3371_v17, %v3149_v13 }
0x15b7   : > { %3158 = vst [vmem:[%s431_s21] sm:$0xff] %v3157_v14 }
0x15b8   : > { %3843 = shalt.err (!%p3840_p3)
}
0x15b9   : > { %s3844_s15 = scalar_lea.hbm %s3171_s22, 128  ;;  %s3848_s19 = scalar_lea.hbm %s4596_s13, 256 }
0x15ba   : > { %p3845_p4 = scmp.ne.s32.totalorder %s3171_s22, %s3844_s15  ;;  %p3849_p9 = scmp.lt.s32.totalorder %s3171_s22, %s4596_s13 }
0x15bb   : > { %p3850_p10 = scmp.lt.s32.totalorder %s3848_s19, %s3844_s15 }
0x15bc   : > { %p3846_p7 = pnand %p3845_p4, %p4011_p5 }
0x15bd   : > { %p3851_p11 = por %p3850_p10, %p3849_p9 }
0x15be   : > { %p3847_p8 = pneg %p3846_p7 }
0x15c0   : > { %p3852_p12 = pnand %p3851_p11, %p3847_p8 }
0x15c2   : > { %3855 = shalt.err (!%p3852_p12)
}
0x15c3   : > { %3625 = dma.vmem_to_hbm [thread:$0]  (%p4011_p5), %s3174_s17, 128, %s3171_s22, %s3160_s0  }
0x15c4 PF: > { %p3631_p13 = scmp.ge.s32.totalorder %s3890_s28, 2  ;;  %s3185_s23 = sand.u32 1, %s3878_s25  }
0x15c5   : > { %s3186_s24 = scalar_lea.sflag [#allocation3], %s3185_s23 }
0x15c6   : > { %p3628_p0 = pnand %p3631_p13, %p4015_p6 }
0x15c8   : > { %p3629_p1 = pneg %p3628_p0 }
0x15ca   : > { %3873 = dma.done.wait (%p3629_p1), %s3186_s24, 128  }
0x15cb   : > { %3875 = vsyncadd (%p3629_p1), %s3186_s24, 4294967168  ;;  %s4612_s28 = sld [smem:[#allocation6_spill]]  ;;  %s4615_s25 = smov %s3882_s26 }
0x15cc   : > { %s4613_s14 = sld [smem:[#allocation5_spill]] }
0x15cd   : > { %s4614_s27 = sld [smem:[#allocation7_spill]] }
0x15d1   : > { %p23_p2 = scmp.ge.s32.totalorder %s4612_s28, 4  }
0x15d2   : > { %s4616_s26 = smov %s4613_s14 }
0x15d3   :  { %25 = sbr.rel (!%p23_p2) target bundleno = 6 (0x6), region = 107 }
0x15d8   :  { %3191 = vsyncpa [#allocation3], 1 }
0x15d9   :  { %3193 = vsyncpa [#allocation3 + $0x1], 1 }

</bundles_post_ra>
